<compile_context>
chip_gen: v7x
topology: tpu7x:2x2x1
jax: 0.10.0
libtpu: 0.0.40
codegen_flags: <defaults>
</compile_context>

<pallas_src>
import jax
import jax.numpy as jnp
from jax.experimental import pallas as pl
from jax.experimental.pallas import tpu as pltpu


def _mish(x):
    # mish(x) = x * tanh(softplus(x)); numerically-stable softplus.
    sp = jnp.maximum(x, 0.0) + jnp.log(1.0 + jnp.exp(-jnp.abs(x)))
    return x * jnp.tanh(sp)


def _vovcsp_kernel(x_ref, w1_ref, s1_ref, b1_ref,
                   w2_ref, s2_ref, b2_ref,
                   w3a_ref, w3b_ref, s3_ref, b3_ref,
                   o_ref, y1p_ref):
    """Fused VoVCSP forward for one batch element.

    x_ref  : (1, H+2, W+2, Cin)   zero-padded input half (NHWC)
    w1_ref : (9, Cin, C1)         conv1 3x3 weights (tap-major)
    w2_ref : (9, C1, C1)          conv2 3x3 weights
    w3a/b  : (C1, Cout)           conv3 1x1 weights split over the concat
    s*/b*  : (1, C)               folded BatchNorm scale / shift
    o_ref  : (1, H, W, Cout)
    y1p_ref: (H+2, W+2, C1)       VMEM scratch holding zero-padded y1
    """
    H = o_ref.shape[1]
    W = o_ref.shape[2]
    Cin = x_ref.shape[3]
    C1 = w1_ref.shape[2]
    Cout = o_ref.shape[3]

    x = x_ref[0]  # (H+2, W+2, Cin)

    # ---- conv1: 3x3 + BN + Mish -------------------------------------------
    acc1 = jnp.zeros((H * W, C1), jnp.float32)
    for dy in range(3):
        for dx in range(3):
            patch = x[dy:dy + H, dx:dx + W, :].reshape(H * W, Cin)
            acc1 = acc1 + jnp.dot(patch, w1_ref[dy * 3 + dx],
                                  preferred_element_type=jnp.float32)
    y1 = _mish(acc1 * s1_ref[0] + b1_ref[0])  # (H*W, C1)

    # Stage y1 into a zero-padded VMEM scratch for conv2's 'same' padding.
    y1p_ref[...] = jnp.zeros_like(y1p_ref)
    y1p_ref[1:H + 1, 1:W + 1, :] = y1.reshape(H, W, C1)
    y1p = y1p_ref[...]

    # ---- conv2: 3x3 + BN + Mish -------------------------------------------
    acc2 = jnp.zeros((H * W, C1), jnp.float32)
    for dy in range(3):
        for dx in range(3):
            patch = y1p[dy:dy + H, dx:dx + W, :].reshape(H * W, C1)
            acc2 = acc2 + jnp.dot(patch, w2_ref[dy * 3 + dx],
                                  preferred_element_type=jnp.float32)
    y2 = _mish(acc2 * s2_ref[0] + b2_ref[0])  # (H*W, C1)

    # ---- conv3: 1x1 on concat(y1, y2) + BN + Mish --------------------------
    # concat is fused: cat(y1, y2) @ W3 == y1 @ W3[:C1] + y2 @ W3[C1:]
    acc3 = jnp.dot(y1, w3a_ref[...], preferred_element_type=jnp.float32)
    acc3 = acc3 + jnp.dot(y2, w3b_ref[...], preferred_element_type=jnp.float32)
    y3 = _mish(acc3 * s3_ref[0] + b3_ref[0])  # (H*W, Cout)

    o_ref[0] = y3.reshape(H, W, Cout).astype(o_ref.dtype)


def vovcsp_forward(x_nchw, w1, s1, b1, w2, s2, b2, w3, s3, b3):
    """VoVCSP forward. x_nchw: (B, C, H, W) f32. Weights in HWIO layout.

    w1: (3,3,C//2,C1)  w2: (3,3,C1,C1)  w3: (1,1,2*C1,Cout)
    s*/b*: (C,) folded BatchNorm scale / shift.
    """
    B, C, H, W = x_nchw.shape
    # channel split: keep the second half (PyTorch: `_, x1 = x.chunk(2, 1)`)
    x1 = x_nchw[:, C // 2:, :, :]
    x1 = jnp.transpose(x1, (0, 2, 3, 1))                    # NHWC
    x1p = jnp.pad(x1, ((0, 0), (1, 1), (1, 1), (0, 0)))     # 'same' pad for 3x3

    Cin = x1.shape[-1]
    C1 = w1.shape[-1]
    Cout = w3.shape[-1]

    w1_t = w1.reshape(9, Cin, C1)
    w2_t = w2.reshape(9, C1, C1)
    w3_flat = w3.reshape(2 * C1, Cout)
    w3a = w3_flat[:C1]
    w3b = w3_flat[C1:]

    s1_t = s1.reshape(1, C1).astype(jnp.float32)
    b1_t = b1.reshape(1, C1).astype(jnp.float32)
    s2_t = s2.reshape(1, C1).astype(jnp.float32)
    b2_t = b2.reshape(1, C1).astype(jnp.float32)
    s3_t = s3.reshape(1, Cout).astype(jnp.float32)
    b3_t = b3.reshape(1, Cout).astype(jnp.float32)

    out_nhwc = pl.pallas_call(
        _vovcsp_kernel,
        out_shape=jax.ShapeDtypeStruct((B, H, W, Cout), jnp.float32),
        grid=(B,),
        in_specs=[
            pl.BlockSpec((1, H + 2, W + 2, Cin), lambda b: (b, 0, 0, 0)),
            pl.BlockSpec((9, Cin, C1), lambda b: (0, 0, 0)),
            pl.BlockSpec((1, C1), lambda b: (0, 0)),
            pl.BlockSpec((1, C1), lambda b: (0, 0)),
            pl.BlockSpec((9, C1, C1), lambda b: (0, 0, 0)),
            pl.BlockSpec((1, C1), lambda b: (0, 0)),
            pl.BlockSpec((1, C1), lambda b: (0, 0)),
            pl.BlockSpec((C1, Cout), lambda b: (0, 0)),
            pl.BlockSpec((C1, Cout), lambda b: (0, 0)),
            pl.BlockSpec((1, Cout), lambda b: (0, 0)),
            pl.BlockSpec((1, Cout), lambda b: (0, 0)),
        ],
        out_specs=pl.BlockSpec((1, H, W, Cout), lambda b: (b, 0, 0, 0)),
        scratch_shapes=[pltpu.VMEM((H + 2, W + 2, C1), jnp.float32)],
        compiler_params=pltpu.CompilerParams(
            dimension_semantics=("parallel",)),
    )(x1p, w1_t, s1_t, b1_t, w2_t, s2_t, b2_t, w3a, w3b, s3_t, b3_t)

    return jnp.transpose(out_nhwc, (0, 3, 1, 2))  # back to NCHW


class VoVCSPPallas:
    """JAX/Pallas equivalent of base.layers.VoVCSP (inference forward)."""

    def __init__(self, params):
        (self.w1, self.s1, self.b1,
         self.w2, self.s2, self.b2,
         self.w3, self.s3, self.b3) = params

    def __call__(self, x_nchw):
        return vovcsp_forward(x_nchw,
                              self.w1, self.s1, self.b1,
                              self.w2, self.s2, self.b2,
                              self.w3, self.s3, self.b3)


# ---------------------------- pure-JAX reference ----------------------------
def _ref_conv_bn_mish(x_nhwc, w_hwio, scale, shift):
    y = jax.lax.conv_general_dilated(
        x_nhwc, w_hwio, window_strides=(1, 1), padding='SAME',
        dimension_numbers=('NHWC', 'HWIO', 'NHWC'))
    y = y * scale + shift
    return y * jnp.tanh(jax.nn.softplus(y))


def vovcsp_reference(x_nchw, w1, s1, b1, w2, s2, b2, w3, s3, b3):
    C = x_nchw.shape[1]
    x1 = jnp.transpose(x_nchw[:, C // 2:, :, :], (0, 2, 3, 1))
    y1 = _ref_conv_bn_mish(x1, w1, s1, b1)
    y2 = _ref_conv_bn_mish(y1, w2, s2, b2)
    ycat = jnp.concatenate([y1, y2], axis=-1)
    y3 = _ref_conv_bn_mish(ycat, w3, s3, b3)
    return jnp.transpose(y3, (0, 3, 1, 2))


if __name__ == "__main__":
    key = jax.random.PRNGKey(0)
    B, in_ch, out_ch, H, W = 2, 4, 8, 16, 16
    hid_ch = out_ch
    c_in_half = in_ch // 2        # conv1 input channels
    c1 = hid_ch // 2              # conv1 / conv2 output channels

    ks = jax.random.split(key, 8)
    x = jax.random.normal(ks[0], (B, in_ch, H, W), dtype=jnp.float32)

    w1 = jax.random.normal(ks[1], (3, 3, c_in_half, c1), jnp.float32) * 0.2
    w2 = jax.random.normal(ks[2], (3, 3, c1, c1), jnp.float32) * 0.2
    w3 = jax.random.normal(ks[3], (1, 1, 2 * c1, out_ch), jnp.float32) * 0.2

    def bn_fold(k, c, eps=1e-5):
        kg, kb, km, kv = jax.random.split(k, 4)
        gamma = 1.0 + 0.1 * jax.random.normal(kg, (c,), jnp.float32)
        beta = 0.1 * jax.random.normal(kb, (c,), jnp.float32)
        mean = 0.1 * jax.random.normal(km, (c,), jnp.float32)
        var = jnp.abs(jax.random.normal(kv, (c,), jnp.float32)) + 0.5
        scale = gamma / jnp.sqrt(var + eps)
        shift = beta - mean * scale
        return scale, shift

    s1, b1 = bn_fold(ks[4], c1)
    s2, b2 = bn_fold(ks[5], c1)
    s3, b3 = bn_fold(ks[6], out_ch)

    mod = VoVCSPPallas((w1, s1, b1, w2, s2, b2, w3, s3, b3))
    y = mod(x)
    jax.block_until_ready(y)

    ref = vovcsp_reference(x, w1, s1, b1, w2, s2, b2, w3, s3, b3)
    jax.block_until_ready(ref)

    assert y.shape == (B, out_ch, H, W) and y.dtype == jnp.float32
    assert jnp.allclose(y, ref, atol=3e-2, rtol=3e-2), (
        "max abs diff = %f" % float(jnp.max(jnp.abs(y - ref))))

    print("KERNEL_OK")
</pallas_src>

<mosaic_0001>
module attributes {stable_mosaic.version = 11 : i64} {
  func.func @_vovcsp_kernel(%arg0: i32, %arg1: memref<1x18x18x2xf32, #tpu.memory_space<vmem>>, %arg2: memref<9x2x4xf32, #tpu.memory_space<vmem>>, %arg3: memref<1x4xf32, #tpu.memory_space<vmem>>, %arg4: memref<1x4xf32, #tpu.memory_space<vmem>>, %arg5: memref<9x4x4xf32, #tpu.memory_space<vmem>>, %arg6: memref<1x4xf32, #tpu.memory_space<vmem>>, %arg7: memref<1x4xf32, #tpu.memory_space<vmem>>, %arg8: memref<4x8xf32, #tpu.memory_space<vmem>>, %arg9: memref<4x8xf32, #tpu.memory_space<vmem>>, %arg10: memref<1x8xf32, #tpu.memory_space<vmem>>, %arg11: memref<1x8xf32, #tpu.memory_space<vmem>>, %arg12: memref<1x16x16x8xf32, #tpu.memory_space<vmem>>, %arg13: memref<18x18x4xf32, #tpu.memory_space<vmem>>) attributes {dimension_semantics = [#tpu.dimension_semantics<parallel>], iteration_bounds = array<i64: 2>, scalar_prefetch = 0 : i64, scratch_operands = 1 : i64, tpu.core_type = #tpu.core_type<tc>, window_params = [{transform_indices = @transform_0, window_bounds = array<i64: 1, 18, 18, 2>}, {pipeline_mode = #tpu.pipeline_mode<synchronous>, transform_indices = @transform_1, window_bounds = array<i64: 9, 2, 4>}, {pipeline_mode = #tpu.pipeline_mode<synchronous>, transform_indices = @transform_2, window_bounds = array<i64: 1, 4>}, {pipeline_mode = #tpu.pipeline_mode<synchronous>, transform_indices = @transform_3, window_bounds = array<i64: 1, 4>}, {pipeline_mode = #tpu.pipeline_mode<synchronous>, transform_indices = @transform_4, window_bounds = array<i64: 9, 4, 4>}, {pipeline_mode = #tpu.pipeline_mode<synchronous>, transform_indices = @transform_5, window_bounds = array<i64: 1, 4>}, {pipeline_mode = #tpu.pipeline_mode<synchronous>, transform_indices = @transform_6, window_bounds = array<i64: 1, 4>}, {pipeline_mode = #tpu.pipeline_mode<synchronous>, transform_indices = @transform_7, window_bounds = array<i64: 4, 8>}, {pipeline_mode = #tpu.pipeline_mode<synchronous>, transform_indices = @transform_8, window_bounds = array<i64: 4, 8>}, {pipeline_mode = #tpu.pipeline_mode<synchronous>, transform_indices = @transform_9, window_bounds = array<i64: 1, 8>}, {pipeline_mode = #tpu.pipeline_mode<synchronous>, transform_indices = @transform_10, window_bounds = array<i64: 1, 8>}, {transform_indices = @transform_11, window_bounds = array<i64: 1, 16, 16, 8>}]} {
    %c0 = arith.constant 0 : index
    %c0_0 = arith.constant 0 : index
    %c0_1 = arith.constant 0 : index
    %c0_2 = arith.constant 0 : index
    %0 = vector.load %arg1[%c0, %c0_0, %c0_1, %c0_2] : memref<1x18x18x2xf32, #tpu.memory_space<vmem>>, vector<1x18x18x2xf32>
    %1 = vector.shape_cast %0 : vector<1x18x18x2xf32> to vector<18x18x2xf32>
    %cst = arith.constant 0.000000e+00 : f32
    %2 = vector.broadcast %cst : f32 to vector<256x4xf32>
    %3 = vector.extract_strided_slice %1 {offsets = [0, 0, 0], sizes = [16, 16, 2], strides = [1, 1, 1]} : vector<18x18x2xf32> to vector<16x16x2xf32>
    %4 = vector.shape_cast %3 : vector<16x16x2xf32> to vector<256x2xf32>
    %c0_3 = arith.constant 0 : index
    %c0_4 = arith.constant 0 : index
    %c0_5 = arith.constant 0 : index
    %5 = vector.load %arg2[%c0_3, %c0_4, %c0_5] : memref<9x2x4xf32, #tpu.memory_space<vmem>>, vector<1x2x4xf32>
    %6 = vector.shape_cast %5 : vector<1x2x4xf32> to vector<2x4xf32>
    %cst_6 = arith.constant dense<0.000000e+00> : vector<256x4xf32>
    %7 = tpu.matmul %4, %6, %cst_6 {dimension_numbers = #tpu.dot_dimension_numbers<[1], [0], [0], [1], [0, 0, 1, 1], [], []>} : vector<256x2xf32>, vector<2x4xf32>, vector<256x4xf32> -> vector<256x4xf32>
    %8 = arith.addf %2, %7 : vector<256x4xf32>
    %9 = vector.extract_strided_slice %1 {offsets = [0, 1, 0], sizes = [16, 16, 2], strides = [1, 1, 1]} : vector<18x18x2xf32> to vector<16x16x2xf32>
    %10 = vector.shape_cast %9 : vector<16x16x2xf32> to vector<256x2xf32>
    %c1 = arith.constant 1 : index
    %c0_7 = arith.constant 0 : index
    %c0_8 = arith.constant 0 : index
    %11 = vector.load %arg2[%c1, %c0_7, %c0_8] : memref<9x2x4xf32, #tpu.memory_space<vmem>>, vector<1x2x4xf32>
    %12 = vector.shape_cast %11 : vector<1x2x4xf32> to vector<2x4xf32>
    %cst_9 = arith.constant dense<0.000000e+00> : vector<256x4xf32>
    %13 = tpu.matmul %10, %12, %cst_9 {dimension_numbers = #tpu.dot_dimension_numbers<[1], [0], [0], [1], [0, 0, 1, 1], [], []>} : vector<256x2xf32>, vector<2x4xf32>, vector<256x4xf32> -> vector<256x4xf32>
    %14 = arith.addf %8, %13 : vector<256x4xf32>
    %15 = vector.extract_strided_slice %1 {offsets = [0, 2, 0], sizes = [16, 16, 2], strides = [1, 1, 1]} : vector<18x18x2xf32> to vector<16x16x2xf32>
    %16 = vector.shape_cast %15 : vector<16x16x2xf32> to vector<256x2xf32>
    %c2 = arith.constant 2 : index
    %c0_10 = arith.constant 0 : index
    %c0_11 = arith.constant 0 : index
    %17 = vector.load %arg2[%c2, %c0_10, %c0_11] : memref<9x2x4xf32, #tpu.memory_space<vmem>>, vector<1x2x4xf32>
    %18 = vector.shape_cast %17 : vector<1x2x4xf32> to vector<2x4xf32>
    %cst_12 = arith.constant dense<0.000000e+00> : vector<256x4xf32>
    %19 = tpu.matmul %16, %18, %cst_12 {dimension_numbers = #tpu.dot_dimension_numbers<[1], [0], [0], [1], [0, 0, 1, 1], [], []>} : vector<256x2xf32>, vector<2x4xf32>, vector<256x4xf32> -> vector<256x4xf32>
    %20 = arith.addf %14, %19 : vector<256x4xf32>
    %21 = vector.extract_strided_slice %1 {offsets = [1, 0, 0], sizes = [16, 16, 2], strides = [1, 1, 1]} : vector<18x18x2xf32> to vector<16x16x2xf32>
    %22 = vector.shape_cast %21 : vector<16x16x2xf32> to vector<256x2xf32>
    %c3 = arith.constant 3 : index
    %c0_13 = arith.constant 0 : index
    %c0_14 = arith.constant 0 : index
    %23 = vector.load %arg2[%c3, %c0_13, %c0_14] : memref<9x2x4xf32, #tpu.memory_space<vmem>>, vector<1x2x4xf32>
    %24 = vector.shape_cast %23 : vector<1x2x4xf32> to vector<2x4xf32>
    %cst_15 = arith.constant dense<0.000000e+00> : vector<256x4xf32>
    %25 = tpu.matmul %22, %24, %cst_15 {dimension_numbers = #tpu.dot_dimension_numbers<[1], [0], [0], [1], [0, 0, 1, 1], [], []>} : vector<256x2xf32>, vector<2x4xf32>, vector<256x4xf32> -> vector<256x4xf32>
    %26 = arith.addf %20, %25 : vector<256x4xf32>
    %27 = vector.extract_strided_slice %1 {offsets = [1, 1, 0], sizes = [16, 16, 2], strides = [1, 1, 1]} : vector<18x18x2xf32> to vector<16x16x2xf32>
    %28 = vector.shape_cast %27 : vector<16x16x2xf32> to vector<256x2xf32>
    %c4 = arith.constant 4 : index
    %c0_16 = arith.constant 0 : index
    %c0_17 = arith.constant 0 : index
    %29 = vector.load %arg2[%c4, %c0_16, %c0_17] : memref<9x2x4xf32, #tpu.memory_space<vmem>>, vector<1x2x4xf32>
    %30 = vector.shape_cast %29 : vector<1x2x4xf32> to vector<2x4xf32>
    %cst_18 = arith.constant dense<0.000000e+00> : vector<256x4xf32>
    %31 = tpu.matmul %28, %30, %cst_18 {dimension_numbers = #tpu.dot_dimension_numbers<[1], [0], [0], [1], [0, 0, 1, 1], [], []>} : vector<256x2xf32>, vector<2x4xf32>, vector<256x4xf32> -> vector<256x4xf32>
    %32 = arith.addf %26, %31 : vector<256x4xf32>
    %33 = vector.extract_strided_slice %1 {offsets = [1, 2, 0], sizes = [16, 16, 2], strides = [1, 1, 1]} : vector<18x18x2xf32> to vector<16x16x2xf32>
    %34 = vector.shape_cast %33 : vector<16x16x2xf32> to vector<256x2xf32>
    %c5 = arith.constant 5 : index
    %c0_19 = arith.constant 0 : index
    %c0_20 = arith.constant 0 : index
    %35 = vector.load %arg2[%c5, %c0_19, %c0_20] : memref<9x2x4xf32, #tpu.memory_space<vmem>>, vector<1x2x4xf32>
    %36 = vector.shape_cast %35 : vector<1x2x4xf32> to vector<2x4xf32>
    %cst_21 = arith.constant dense<0.000000e+00> : vector<256x4xf32>
    %37 = tpu.matmul %34, %36, %cst_21 {dimension_numbers = #tpu.dot_dimension_numbers<[1], [0], [0], [1], [0, 0, 1, 1], [], []>} : vector<256x2xf32>, vector<2x4xf32>, vector<256x4xf32> -> vector<256x4xf32>
    %38 = arith.addf %32, %37 : vector<256x4xf32>
    %39 = vector.extract_strided_slice %1 {offsets = [2, 0, 0], sizes = [16, 16, 2], strides = [1, 1, 1]} : vector<18x18x2xf32> to vector<16x16x2xf32>
    %40 = vector.shape_cast %39 : vector<16x16x2xf32> to vector<256x2xf32>
    %c6 = arith.constant 6 : index
    %c0_22 = arith.constant 0 : index
    %c0_23 = arith.constant 0 : index
    %41 = vector.load %arg2[%c6, %c0_22, %c0_23] : memref<9x2x4xf32, #tpu.memory_space<vmem>>, vector<1x2x4xf32>
    %42 = vector.shape_cast %41 : vector<1x2x4xf32> to vector<2x4xf32>
    %cst_24 = arith.constant dense<0.000000e+00> : vector<256x4xf32>
    %43 = tpu.matmul %40, %42, %cst_24 {dimension_numbers = #tpu.dot_dimension_numbers<[1], [0], [0], [1], [0, 0, 1, 1], [], []>} : vector<256x2xf32>, vector<2x4xf32>, vector<256x4xf32> -> vector<256x4xf32>
    %44 = arith.addf %38, %43 : vector<256x4xf32>
    %45 = vector.extract_strided_slice %1 {offsets = [2, 1, 0], sizes = [16, 16, 2], strides = [1, 1, 1]} : vector<18x18x2xf32> to vector<16x16x2xf32>
    %46 = vector.shape_cast %45 : vector<16x16x2xf32> to vector<256x2xf32>
    %c7 = arith.constant 7 : index
    %c0_25 = arith.constant 0 : index
    %c0_26 = arith.constant 0 : index
    %47 = vector.load %arg2[%c7, %c0_25, %c0_26] : memref<9x2x4xf32, #tpu.memory_space<vmem>>, vector<1x2x4xf32>
    %48 = vector.shape_cast %47 : vector<1x2x4xf32> to vector<2x4xf32>
    %cst_27 = arith.constant dense<0.000000e+00> : vector<256x4xf32>
    %49 = tpu.matmul %46, %48, %cst_27 {dimension_numbers = #tpu.dot_dimension_numbers<[1], [0], [0], [1], [0, 0, 1, 1], [], []>} : vector<256x2xf32>, vector<2x4xf32>, vector<256x4xf32> -> vector<256x4xf32>
    %50 = arith.addf %44, %49 : vector<256x4xf32>
    %51 = vector.extract_strided_slice %1 {offsets = [2, 2, 0], sizes = [16, 16, 2], strides = [1, 1, 1]} : vector<18x18x2xf32> to vector<16x16x2xf32>
    %52 = vector.shape_cast %51 : vector<16x16x2xf32> to vector<256x2xf32>
    %c8 = arith.constant 8 : index
    %c0_28 = arith.constant 0 : index
    %c0_29 = arith.constant 0 : index
    %53 = vector.load %arg2[%c8, %c0_28, %c0_29] : memref<9x2x4xf32, #tpu.memory_space<vmem>>, vector<1x2x4xf32>
    %54 = vector.shape_cast %53 : vector<1x2x4xf32> to vector<2x4xf32>
    %cst_30 = arith.constant dense<0.000000e+00> : vector<256x4xf32>
    %55 = tpu.matmul %52, %54, %cst_30 {dimension_numbers = #tpu.dot_dimension_numbers<[1], [0], [0], [1], [0, 0, 1, 1], [], []>} : vector<256x2xf32>, vector<2x4xf32>, vector<256x4xf32> -> vector<256x4xf32>
    %56 = arith.addf %50, %55 : vector<256x4xf32>
    %c0_31 = arith.constant 0 : index
    %c0_32 = arith.constant 0 : index
    %57 = vector.load %arg3[%c0_31, %c0_32] : memref<1x4xf32, #tpu.memory_space<vmem>>, vector<1x4xf32>
    %58 = vector.shape_cast %57 : vector<1x4xf32> to vector<4xf32>
    %59 = vector.shape_cast %58 : vector<4xf32> to vector<1x4xf32>
    %60 = vector.broadcast %59 : vector<1x4xf32> to vector<256x4xf32>
    %61 = arith.mulf %56, %60 : vector<256x4xf32>
    %c0_33 = arith.constant 0 : index
    %c0_34 = arith.constant 0 : index
    %62 = vector.load %arg4[%c0_33, %c0_34] : memref<1x4xf32, #tpu.memory_space<vmem>>, vector<1x4xf32>
    %63 = vector.shape_cast %62 : vector<1x4xf32> to vector<4xf32>
    %64 = vector.shape_cast %63 : vector<4xf32> to vector<1x4xf32>
    %65 = vector.broadcast %64 : vector<1x4xf32> to vector<256x4xf32>
    %66 = arith.addf %61, %65 : vector<256x4xf32>
    %cst_35 = arith.constant 0.000000e+00 : f32
    %67 = vector.broadcast %cst_35 : f32 to vector<256x4xf32>
    %68 = arith.maximumf %66, %67 : vector<256x4xf32>
    %69 = math.absf %66 : vector<256x4xf32>
    %cst_36 = arith.constant 0.000000e+00 : f32
    %70 = vector.broadcast %cst_36 : f32 to vector<256x4xf32>
    %71 = arith.subf %70, %69 : vector<256x4xf32>
    %72 = math.exp %71 : vector<256x4xf32>
    %cst_37 = arith.constant 1.000000e+00 : f32
    %73 = vector.broadcast %cst_37 : f32 to vector<256x4xf32>
    %74 = arith.addf %73, %72 : vector<256x4xf32>
    %75 = math.log %74 : vector<256x4xf32>
    %76 = arith.addf %68, %75 : vector<256x4xf32>
    %77 = math.tanh %76 : vector<256x4xf32>
    %78 = arith.mulf %66, %77 : vector<256x4xf32>
    %cst_38 = arith.constant 0.000000e+00 : f32
    %79 = vector.broadcast %cst_38 : f32 to vector<18x18x4xf32>
    %c0_39 = arith.constant 0 : index
    %c0_40 = arith.constant 0 : index
    %c0_41 = arith.constant 0 : index
    %80 = vector.load %arg13[%c0_39, %c0_40, %c0_41] : memref<18x18x4xf32, #tpu.memory_space<vmem>>, vector<18x18x4xf32>
    tpu.vector_store %arg13[%c0_39, %c0_40, %c0_41], %79 {strides = array<i32>} : memref<18x18x4xf32, #tpu.memory_space<vmem>>, vector<18x18x4xf32>,
    %81 = vector.shape_cast %78 : vector<256x4xf32> to vector<16x16x4xf32>
    %c1_42 = arith.constant 1 : index
    %c1_43 = arith.constant 1 : index
    %c0_44 = arith.constant 0 : index
    %82 = vector.load %arg13[%c1_42, %c1_43, %c0_44] : memref<18x18x4xf32, #tpu.memory_space<vmem>>, vector<16x16x4xf32>
    tpu.vector_store %arg13[%c1_42, %c1_43, %c0_44], %81 {strides = array<i32>} : memref<18x18x4xf32, #tpu.memory_space<vmem>>, vector<16x16x4xf32>,
    %c0_45 = arith.constant 0 : index
    %c0_46 = arith.constant 0 : index
    %c0_47 = arith.constant 0 : index
    %83 = vector.load %arg13[%c0_45, %c0_46, %c0_47] : memref<18x18x4xf32, #tpu.memory_space<vmem>>, vector<18x18x4xf32>
    %cst_48 = arith.constant 0.000000e+00 : f32
    %84 = vector.broadcast %cst_48 : f32 to vector<256x4xf32>
    %85 = vector.extract_strided_slice %83 {offsets = [0, 0, 0], sizes = [16, 16, 4], strides = [1, 1, 1]} : vector<18x18x4xf32> to vector<16x16x4xf32>
    %86 = vector.shape_cast %85 : vector<16x16x4xf32> to vector<256x4xf32>
    %c0_49 = arith.constant 0 : index
    %c0_50 = arith.constant 0 : index
    %c0_51 = arith.constant 0 : index
    %87 = vector.load %arg5[%c0_49, %c0_50, %c0_51] : memref<9x4x4xf32, #tpu.memory_space<vmem>>, vector<1x4x4xf32>
    %88 = vector.shape_cast %87 : vector<1x4x4xf32> to vector<4x4xf32>
    %cst_52 = arith.constant dense<0.000000e+00> : vector<256x4xf32>
    %89 = tpu.matmul %86, %88, %cst_52 {dimension_numbers = #tpu.dot_dimension_numbers<[1], [0], [0], [1], [0, 0, 1, 1], [], []>} : vector<256x4xf32>, vector<4x4xf32>, vector<256x4xf32> -> vector<256x4xf32>
    %90 = arith.addf %84, %89 : vector<256x4xf32>
    %91 = vector.extract_strided_slice %83 {offsets = [0, 1, 0], sizes = [16, 16, 4], strides = [1, 1, 1]} : vector<18x18x4xf32> to vector<16x16x4xf32>
    %92 = vector.shape_cast %91 : vector<16x16x4xf32> to vector<256x4xf32>
    %c1_53 = arith.constant 1 : index
    %c0_54 = arith.constant 0 : index
    %c0_55 = arith.constant 0 : index
    %93 = vector.load %arg5[%c1_53, %c0_54, %c0_55] : memref<9x4x4xf32, #tpu.memory_space<vmem>>, vector<1x4x4xf32>
    %94 = vector.shape_cast %93 : vector<1x4x4xf32> to vector<4x4xf32>
    %cst_56 = arith.constant dense<0.000000e+00> : vector<256x4xf32>
    %95 = tpu.matmul %92, %94, %cst_56 {dimension_numbers = #tpu.dot_dimension_numbers<[1], [0], [0], [1], [0, 0, 1, 1], [], []>} : vector<256x4xf32>, vector<4x4xf32>, vector<256x4xf32> -> vector<256x4xf32>
    %96 = arith.addf %90, %95 : vector<256x4xf32>
    %97 = vector.extract_strided_slice %83 {offsets = [0, 2, 0], sizes = [16, 16, 4], strides = [1, 1, 1]} : vector<18x18x4xf32> to vector<16x16x4xf32>
    %98 = vector.shape_cast %97 : vector<16x16x4xf32> to vector<256x4xf32>
    %c2_57 = arith.constant 2 : index
    %c0_58 = arith.constant 0 : index
    %c0_59 = arith.constant 0 : index
    %99 = vector.load %arg5[%c2_57, %c0_58, %c0_59] : memref<9x4x4xf32, #tpu.memory_space<vmem>>, vector<1x4x4xf32>
    %100 = vector.shape_cast %99 : vector<1x4x4xf32> to vector<4x4xf32>
    %cst_60 = arith.constant dense<0.000000e+00> : vector<256x4xf32>
    %101 = tpu.matmul %98, %100, %cst_60 {dimension_numbers = #tpu.dot_dimension_numbers<[1], [0], [0], [1], [0, 0, 1, 1], [], []>} : vector<256x4xf32>, vector<4x4xf32>, vector<256x4xf32> -> vector<256x4xf32>
    %102 = arith.addf %96, %101 : vector<256x4xf32>
    %103 = vector.extract_strided_slice %83 {offsets = [1, 0, 0], sizes = [16, 16, 4], strides = [1, 1, 1]} : vector<18x18x4xf32> to vector<16x16x4xf32>
    %104 = vector.shape_cast %103 : vector<16x16x4xf32> to vector<256x4xf32>
    %c3_61 = arith.constant 3 : index
    %c0_62 = arith.constant 0 : index
    %c0_63 = arith.constant 0 : index
    %105 = vector.load %arg5[%c3_61, %c0_62, %c0_63] : memref<9x4x4xf32, #tpu.memory_space<vmem>>, vector<1x4x4xf32>
    %106 = vector.shape_cast %105 : vector<1x4x4xf32> to vector<4x4xf32>
    %cst_64 = arith.constant dense<0.000000e+00> : vector<256x4xf32>
    %107 = tpu.matmul %104, %106, %cst_64 {dimension_numbers = #tpu.dot_dimension_numbers<[1], [0], [0], [1], [0, 0, 1, 1], [], []>} : vector<256x4xf32>, vector<4x4xf32>, vector<256x4xf32> -> vector<256x4xf32>
    %108 = arith.addf %102, %107 : vector<256x4xf32>
    %109 = vector.extract_strided_slice %83 {offsets = [1, 1, 0], sizes = [16, 16, 4], strides = [1, 1, 1]} : vector<18x18x4xf32> to vector<16x16x4xf32>
    %110 = vector.shape_cast %109 : vector<16x16x4xf32> to vector<256x4xf32>
    %c4_65 = arith.constant 4 : index
    %c0_66 = arith.constant 0 : index
    %c0_67 = arith.constant 0 : index
    %111 = vector.load %arg5[%c4_65, %c0_66, %c0_67] : memref<9x4x4xf32, #tpu.memory_space<vmem>>, vector<1x4x4xf32>
    %112 = vector.shape_cast %111 : vector<1x4x4xf32> to vector<4x4xf32>
    %cst_68 = arith.constant dense<0.000000e+00> : vector<256x4xf32>
    %113 = tpu.matmul %110, %112, %cst_68 {dimension_numbers = #tpu.dot_dimension_numbers<[1], [0], [0], [1], [0, 0, 1, 1], [], []>} : vector<256x4xf32>, vector<4x4xf32>, vector<256x4xf32> -> vector<256x4xf32>
    %114 = arith.addf %108, %113 : vector<256x4xf32>
    %115 = vector.extract_strided_slice %83 {offsets = [1, 2, 0], sizes = [16, 16, 4], strides = [1, 1, 1]} : vector<18x18x4xf32> to vector<16x16x4xf32>
    %116 = vector.shape_cast %115 : vector<16x16x4xf32> to vector<256x4xf32>
    %c5_69 = arith.constant 5 : index
    %c0_70 = arith.constant 0 : index
    %c0_71 = arith.constant 0 : index
    %117 = vector.load %arg5[%c5_69, %c0_70, %c0_71] : memref<9x4x4xf32, #tpu.memory_space<vmem>>, vector<1x4x4xf32>
    %118 = vector.shape_cast %117 : vector<1x4x4xf32> to vector<4x4xf32>
    %cst_72 = arith.constant dense<0.000000e+00> : vector<256x4xf32>
    %119 = tpu.matmul %116, %118, %cst_72 {dimension_numbers = #tpu.dot_dimension_numbers<[1], [0], [0], [1], [0, 0, 1, 1], [], []>} : vector<256x4xf32>, vector<4x4xf32>, vector<256x4xf32> -> vector<256x4xf32>
    %120 = arith.addf %114, %119 : vector<256x4xf32>
    %121 = vector.extract_strided_slice %83 {offsets = [2, 0, 0], sizes = [16, 16, 4], strides = [1, 1, 1]} : vector<18x18x4xf32> to vector<16x16x4xf32>
    %122 = vector.shape_cast %121 : vector<16x16x4xf32> to vector<256x4xf32>
    %c6_73 = arith.constant 6 : index
    %c0_74 = arith.constant 0 : index
    %c0_75 = arith.constant 0 : index
    %123 = vector.load %arg5[%c6_73, %c0_74, %c0_75] : memref<9x4x4xf32, #tpu.memory_space<vmem>>, vector<1x4x4xf32>
    %124 = vector.shape_cast %123 : vector<1x4x4xf32> to vector<4x4xf32>
    %cst_76 = arith.constant dense<0.000000e+00> : vector<256x4xf32>
    %125 = tpu.matmul %122, %124, %cst_76 {dimension_numbers = #tpu.dot_dimension_numbers<[1], [0], [0], [1], [0, 0, 1, 1], [], []>} : vector<256x4xf32>, vector<4x4xf32>, vector<256x4xf32> -> vector<256x4xf32>
    %126 = arith.addf %120, %125 : vector<256x4xf32>
    %127 = vector.extract_strided_slice %83 {offsets = [2, 1, 0], sizes = [16, 16, 4], strides = [1, 1, 1]} : vector<18x18x4xf32> to vector<16x16x4xf32>
    %128 = vector.shape_cast %127 : vector<16x16x4xf32> to vector<256x4xf32>
    %c7_77 = arith.constant 7 : index
    %c0_78 = arith.constant 0 : index
    %c0_79 = arith.constant 0 : index
    %129 = vector.load %arg5[%c7_77, %c0_78, %c0_79] : memref<9x4x4xf32, #tpu.memory_space<vmem>>, vector<1x4x4xf32>
    %130 = vector.shape_cast %129 : vector<1x4x4xf32> to vector<4x4xf32>
    %cst_80 = arith.constant dense<0.000000e+00> : vector<256x4xf32>
    %131 = tpu.matmul %128, %130, %cst_80 {dimension_numbers = #tpu.dot_dimension_numbers<[1], [0], [0], [1], [0, 0, 1, 1], [], []>} : vector<256x4xf32>, vector<4x4xf32>, vector<256x4xf32> -> vector<256x4xf32>
    %132 = arith.addf %126, %131 : vector<256x4xf32>
    %133 = vector.extract_strided_slice %83 {offsets = [2, 2, 0], sizes = [16, 16, 4], strides = [1, 1, 1]} : vector<18x18x4xf32> to vector<16x16x4xf32>
    %134 = vector.shape_cast %133 : vector<16x16x4xf32> to vector<256x4xf32>
    %c8_81 = arith.constant 8 : index
    %c0_82 = arith.constant 0 : index
    %c0_83 = arith.constant 0 : index
    %135 = vector.load %arg5[%c8_81, %c0_82, %c0_83] : memref<9x4x4xf32, #tpu.memory_space<vmem>>, vector<1x4x4xf32>
    %136 = vector.shape_cast %135 : vector<1x4x4xf32> to vector<4x4xf32>
    %cst_84 = arith.constant dense<0.000000e+00> : vector<256x4xf32>
    %137 = tpu.matmul %134, %136, %cst_84 {dimension_numbers = #tpu.dot_dimension_numbers<[1], [0], [0], [1], [0, 0, 1, 1], [], []>} : vector<256x4xf32>, vector<4x4xf32>, vector<256x4xf32> -> vector<256x4xf32>
    %138 = arith.addf %132, %137 : vector<256x4xf32>
    %c0_85 = arith.constant 0 : index
    %c0_86 = arith.constant 0 : index
    %139 = vector.load %arg6[%c0_85, %c0_86] : memref<1x4xf32, #tpu.memory_space<vmem>>, vector<1x4xf32>
    %140 = vector.shape_cast %139 : vector<1x4xf32> to vector<4xf32>
    %141 = vector.shape_cast %140 : vector<4xf32> to vector<1x4xf32>
    %142 = vector.broadcast %141 : vector<1x4xf32> to vector<256x4xf32>
    %143 = arith.mulf %138, %142 : vector<256x4xf32>
    %c0_87 = arith.constant 0 : index
    %c0_88 = arith.constant 0 : index
    %144 = vector.load %arg7[%c0_87, %c0_88] : memref<1x4xf32, #tpu.memory_space<vmem>>, vector<1x4xf32>
    %145 = vector.shape_cast %144 : vector<1x4xf32> to vector<4xf32>
    %146 = vector.shape_cast %145 : vector<4xf32> to vector<1x4xf32>
    %147 = vector.broadcast %146 : vector<1x4xf32> to vector<256x4xf32>
    %148 = arith.addf %143, %147 : vector<256x4xf32>
    %cst_89 = arith.constant 0.000000e+00 : f32
    %149 = vector.broadcast %cst_89 : f32 to vector<256x4xf32>
    %150 = arith.maximumf %148, %149 : vector<256x4xf32>
    %151 = math.absf %148 : vector<256x4xf32>
    %cst_90 = arith.constant 0.000000e+00 : f32
    %152 = vector.broadcast %cst_90 : f32 to vector<256x4xf32>
    %153 = arith.subf %152, %151 : vector<256x4xf32>
    %154 = math.exp %153 : vector<256x4xf32>
    %cst_91 = arith.constant 1.000000e+00 : f32
    %155 = vector.broadcast %cst_91 : f32 to vector<256x4xf32>
    %156 = arith.addf %155, %154 : vector<256x4xf32>
    %157 = math.log %156 : vector<256x4xf32>
    %158 = arith.addf %150, %157 : vector<256x4xf32>
    %159 = math.tanh %158 : vector<256x4xf32>
    %160 = arith.mulf %148, %159 : vector<256x4xf32>
    %c0_92 = arith.constant 0 : index
    %c0_93 = arith.constant 0 : index
    %161 = vector.load %arg8[%c0_92, %c0_93] : memref<4x8xf32, #tpu.memory_space<vmem>>, vector<4x8xf32>
    %cst_94 = arith.constant dense<0.000000e+00> : vector<256x8xf32>
    %162 = tpu.matmul %78, %161, %cst_94 {dimension_numbers = #tpu.dot_dimension_numbers<[1], [0], [0], [1], [0, 0, 1, 1], [], []>} : vector<256x4xf32>, vector<4x8xf32>, vector<256x8xf32> -> vector<256x8xf32>
    %c0_95 = arith.constant 0 : index
    %c0_96 = arith.constant 0 : index
    %163 = vector.load %arg9[%c0_95, %c0_96] : memref<4x8xf32, #tpu.memory_space<vmem>>, vector<4x8xf32>
    %cst_97 = arith.constant dense<0.000000e+00> : vector<256x8xf32>
    %164 = tpu.matmul %160, %163, %cst_97 {dimension_numbers = #tpu.dot_dimension_numbers<[1], [0], [0], [1], [0, 0, 1, 1], [], []>} : vector<256x4xf32>, vector<4x8xf32>, vector<256x8xf32> -> vector<256x8xf32>
    %165 = arith.addf %162, %164 : vector<256x8xf32>
    %c0_98 = arith.constant 0 : index
    %c0_99 = arith.constant 0 : index
    %166 = vector.load %arg10[%c0_98, %c0_99] : memref<1x8xf32, #tpu.memory_space<vmem>>, vector<1x8xf32>
    %167 = vector.shape_cast %166 : vector<1x8xf32> to vector<8xf32>
    %168 = vector.shape_cast %167 : vector<8xf32> to vector<1x8xf32>
    %169 = vector.broadcast %168 : vector<1x8xf32> to vector<256x8xf32>
    %170 = arith.mulf %165, %169 : vector<256x8xf32>
    %c0_100 = arith.constant 0 : index
    %c0_101 = arith.constant 0 : index
    %171 = vector.load %arg11[%c0_100, %c0_101] : memref<1x8xf32, #tpu.memory_space<vmem>>, vector<1x8xf32>
    %172 = vector.shape_cast %171 : vector<1x8xf32> to vector<8xf32>
    %173 = vector.shape_cast %172 : vector<8xf32> to vector<1x8xf32>
    %174 = vector.broadcast %173 : vector<1x8xf32> to vector<256x8xf32>
    %175 = arith.addf %170, %174 : vector<256x8xf32>
    %cst_102 = arith.constant 0.000000e+00 : f32
    %176 = vector.broadcast %cst_102 : f32 to vector<256x8xf32>
    %177 = arith.maximumf %175, %176 : vector<256x8xf32>
    %178 = math.absf %175 : vector<256x8xf32>
    %cst_103 = arith.constant 0.000000e+00 : f32
    %179 = vector.broadcast %cst_103 : f32 to vector<256x8xf32>
    %180 = arith.subf %179, %178 : vector<256x8xf32>
    %181 = math.exp %180 : vector<256x8xf32>
    %cst_104 = arith.constant 1.000000e+00 : f32
    %182 = vector.broadcast %cst_104 : f32 to vector<256x8xf32>
    %183 = arith.addf %182, %181 : vector<256x8xf32>
    %184 = math.log %183 : vector<256x8xf32>
    %185 = arith.addf %177, %184 : vector<256x8xf32>
    %186 = math.tanh %185 : vector<256x8xf32>
    %187 = arith.mulf %175, %186 : vector<256x8xf32>
    %188 = vector.shape_cast %187 : vector<256x8xf32> to vector<16x16x8xf32>
    %c0_105 = arith.constant 0 : index
    %c0_106 = arith.constant 0 : index
    %c0_107 = arith.constant 0 : index
    %c0_108 = arith.constant 0 : index
    %189 = vector.load %arg12[%c0_105, %c0_106, %c0_107, %c0_108] : memref<1x16x16x8xf32, #tpu.memory_space<vmem>>, vector<1x16x16x8xf32>
    %190 = vector.shape_cast %189 : vector<1x16x16x8xf32> to vector<16x16x8xf32>
    %191 = vector.shape_cast %188 : vector<16x16x8xf32> to vector<1x16x16x8xf32>
    tpu.vector_store %arg12[%c0_105, %c0_106, %c0_107, %c0_108], %191 {strides = array<i32>} : memref<1x16x16x8xf32, #tpu.memory_space<vmem>>, vector<1x16x16x8xf32>,
    return
  }
  func.func @transform_0(%arg0: i32) -> (i32, i32, i32, i32) {
    %c0_i32 = arith.constant 0 : i32
    %c0_i32_0 = arith.constant 0 : i32
    %c0_i32_1 = arith.constant 0 : i32
    %c0_i32_2 = arith.constant 0 : i32
    return %arg0, %c0_i32, %c0_i32_0, %c0_i32_1 : i32, i32, i32, i32
  }
  func.func @transform_1(%arg0: i32) -> (i32, i32, i32) {
    %c0_i32 = arith.constant 0 : i32
    %c0_i32_0 = arith.constant 0 : i32
    %c0_i32_1 = arith.constant 0 : i32
    %c0_i32_2 = arith.constant 0 : i32
    return %c0_i32, %c0_i32_0, %c0_i32_1 : i32, i32, i32
  }
  func.func @transform_2(%arg0: i32) -> (i32, i32) {
    %c0_i32 = arith.constant 0 : i32
    %c0_i32_0 = arith.constant 0 : i32
    %c0_i32_1 = arith.constant 0 : i32
    return %c0_i32, %c0_i32_0 : i32, i32
  }
  func.func @transform_3(%arg0: i32) -> (i32, i32) {
    %c0_i32 = arith.constant 0 : i32
    %c0_i32_0 = arith.constant 0 : i32
    %c0_i32_1 = arith.constant 0 : i32
    return %c0_i32, %c0_i32_0 : i32, i32
  }
  func.func @transform_4(%arg0: i32) -> (i32, i32, i32) {
    %c0_i32 = arith.constant 0 : i32
    %c0_i32_0 = arith.constant 0 : i32
    %c0_i32_1 = arith.constant 0 : i32
    %c0_i32_2 = arith.constant 0 : i32
    return %c0_i32, %c0_i32_0, %c0_i32_1 : i32, i32, i32
  }
  func.func @transform_5(%arg0: i32) -> (i32, i32) {
    %c0_i32 = arith.constant 0 : i32
    %c0_i32_0 = arith.constant 0 : i32
    %c0_i32_1 = arith.constant 0 : i32
    return %c0_i32, %c0_i32_0 : i32, i32
  }
  func.func @transform_6(%arg0: i32) -> (i32, i32) {
    %c0_i32 = arith.constant 0 : i32
    %c0_i32_0 = arith.constant 0 : i32
    %c0_i32_1 = arith.constant 0 : i32
    return %c0_i32, %c0_i32_0 : i32, i32
  }
  func.func @transform_7(%arg0: i32) -> (i32, i32) {
    %c0_i32 = arith.constant 0 : i32
    %c0_i32_0 = arith.constant 0 : i32
    %c0_i32_1 = arith.constant 0 : i32
    return %c0_i32, %c0_i32_0 : i32, i32
  }
  func.func @transform_8(%arg0: i32) -> (i32, i32) {
    %c0_i32 = arith.constant 0 : i32
    %c0_i32_0 = arith.constant 0 : i32
    %c0_i32_1 = arith.constant 0 : i32
    return %c0_i32, %c0_i32_0 : i32, i32
  }
  func.func @transform_9(%arg0: i32) -> (i32, i32) {
    %c0_i32 = arith.constant 0 : i32
    %c0_i32_0 = arith.constant 0 : i32
    %c0_i32_1 = arith.constant 0 : i32
    return %c0_i32, %c0_i32_0 : i32, i32
  }
  func.func @transform_10(%arg0: i32) -> (i32, i32) {
    %c0_i32 = arith.constant 0 : i32
    %c0_i32_0 = arith.constant 0 : i32
    %c0_i32_1 = arith.constant 0 : i32
    return %c0_i32, %c0_i32_0 : i32, i32
  }
  func.func @transform_11(%arg0: i32) -> (i32, i32, i32, i32) {
    %c0_i32 = arith.constant 0 : i32
    %c0_i32_0 = arith.constant 0 : i32
    %c0_i32_1 = arith.constant 0 : i32
    %c0_i32_2 = arith.constant 0 : i32
    return %arg0, %c0_i32, %c0_i32_0, %c0_i32_1 : i32, i32, i32, i32
  }
}

</mosaic_0001>

<bundles_post_ra>
// kernel: tpu_custom_call.1
= control target key start
LH: loop header
LB: loop body
LE: loop exit
PB: predicated region body
PF: predicated region fallthrough
CT: control target
= control target key end

     0   :  { %s11661_s17 = smov 0   ;;  %s15103_s0 = inlined_call_operand.vmem [shape: f32[2,18,18,2], index: 0, kind: input, shape index: {}]   ;;  %s15104_s1 = inlined_call_operand.vmem [shape: f32[9,2,4], index: 1, kind: input, shape index: {}]   ;;  %s15105_s2 = inlined_call_operand.vmem [shape: f32[1,4], index: 2, kind: input, shape index: {}]   ;;  %s15106_s3 = inlined_call_operand.vmem [shape: f32[1,4], index: 3, kind: input, shape index: {}]   ;;  %s15107_s4 = inlined_call_operand.vmem [shape: f32[9,4,4], index: 4, kind: input, shape index: {}]   ;;  %s15108_s5 = inlined_call_operand.vmem [shape: f32[1,4], index: 5, kind: input, shape index: {}]   ;;  %s15109_s6 = inlined_call_operand.vmem [shape: f32[1,4], index: 6, kind: input, shape index: {}]   ;;  %s15110_s7 = inlined_call_operand.vmem [shape: f32[4,8], index: 7, kind: input, shape index: {}]   ;;  %s15111_s8 = inlined_call_operand.vmem [shape: f32[4,8], index: 8, kind: input, shape index: {}]   ;;  %s15112_s9 = inlined_call_operand.vmem [shape: f32[1,8], index: 9, kind: input, shape index: {}]   ;;  %s15113_s10 = inlined_call_operand.vmem [shape: f32[1,8], index: 10, kind: input, shape index: {}]   ;;  %s15114_s11 = inlined_call_operand.vmem [shape: f32[2,16,16,8], index: 11, kind: output, shape index: {}]  }
   0x1 LB: > { %s8103_s18 = sadd.s32 4294967295, %s11598_s17   ;;  %p8107_p0 = scmp.ge.s32.totalorder %s11598_s17, 1  ;;  %s11598_s17 = sphi %s11661_s17, %s21_s17  }
   0x2   : > { %p337_p1 = scmp.lt.s32.totalorder %s11598_s17, 3 }
   0x4   : > { %p338_p2 = pnand %p8107_p0, %p337_p1 }
   0x6   : > { %341 = sbr.rel (%p338_p2) target bundleno = 2012 (0x7dc), region = 64 }
   0xd   : > { %v441_v0 = vld [vmem:[%s15104_s1] sm:$0x3]  ;;  %vm638_vm0 = vcmask 1041408   ;;  %p377_p3 = scmp.lt.s32.totalorder %s8103_s18, 1  ;;  %v8178_v1 = vld [vmem:[%s15104_s1 + $0x4] sm:$0x3] }
   0xe   : > { %9506 = vmatprep.subr.msk.mxu0 %vm638_vm0, %v441_v0  ;;  %vm573_vm1 = vcmask 15360   ;;  %v11700_v5 = vld [vmem:[%s15104_s1 + $0x6] sm:$0x3]  ;;  %vm1159_vm2 = vcmask 1045504   ;;  %v11880_v49 = vld [vmem:[%s15104_s1 + $0x8] sm:$0x3] }
   0xf   : > { %9507 = vmatpush3.msk.msra.mxu0 %vm638_vm0, %v441_v0  ;;  %s15571_s18 = smov (!%p377_p3, %s8103_s18), 1  ;;  %vm490_vm3 = vcmask 1046528   ;;  %vm3956_vm4 = vcmask 1043456   ;;  %vm3618_vm5 = vcmask 31744   ;;  %vm3621_vm6 = vcmask 25600  }
  0x10   : > { %9556 = vmatprep.subr.msk.mxu0 %vm638_vm0, %v8178_v1  ;;  %s11000_s23 = smul.u32 432, %s15571_s18  ;;  %vm8015_vm7 = vcmask 64512  }
  0x12   : > { %s11684_s26 = scalar_lea.vmem %s15103_s0, %s11000_s23 }
  0x13   : > { %v11687_v2 = vld [vmem:[%s11684_s26] sm:$0xff]  ;;  %v11690_v3 = vld [vmem:[%s11684_s26 + $0x8] sm:$0xff]  ;;  %v11693_v4 = vld [vmem:[%s11684_s26 + $0x18] sm:$0xff] }
  0x14   : > { %15294 = vst [vmem:[#allocation3_spill] sm:$0xff] %v11687_v2  ;;  %15295 = vst [vmem:[#allocation4_spill] sm:$0xff] %v11690_v3  ;;  %9508 = vmatprep.mubr.msk.f32.mxu0 %vm573_vm1, %v11687_v2  ;;  %v11708_v6 = vld [vmem:[%s11684_s26 + $0x20] sm:$0xff]  ;;  %v11711_v7 = vld [vmem:[%s11684_s26 + $0x30] sm:$0xff]  ;;  %v1160_v33 = vrot.slane %v11687_v2, 2  ;;  %v1161_v34 = vrot.slane %v11690_v3, 2 }
  0x15   : > { %9509 = vmatmul.mubr.msk.f32.vlgmr.msra.gmra.mrb[0].mxu0 %vm573_vm1, %v11690_v3  ;;  %15296 = vst [vmem:[#allocation5_spill] sm:$0xff] %v11711_v7  ;;  %v11720_v8 = vld [vmem:[%s11684_s26 + $0x38] sm:$0xff]  ;;  %v11723_v9 = vld [vmem:[%s11684_s26 + $0x48] sm:$0xff]  ;;  %v11730_v10 = vld [vmem:[%s11684_s26 + $0x50] sm:$0xff]  ;;  %v1165_v39 = vrot.slane %v11693_v4, 2  ;;  %v1166_v40 = vrot.slane %v11708_v6, 2 }
  0x16   : > { %9557 = vmatpush3.msk.msra.mxu0 %vm638_vm0, %v8178_v1  ;;  %9511 = vmatprep.mubr.msk.f32.mxu0 %vm573_vm1, %v11693_v4  ;;  %15297 = vst [vmem:[#allocation6_spill] sm:$0xff] %v11720_v8  ;;  %15298 = vst [vmem:[#allocation7_spill] sm:$0xff] %v11730_v10  ;;  %v11733_v11 = vld [vmem:[%s11684_s26 + $0x60] sm:$0xff]  ;;  %v11740_v12 = vld [vmem:[%s11684_s26 + $0x68] sm:$0xff]  ;;  %v1162_v41 = vsel %vm1159_vm2, %v1160_v33, %v1161_v34  ;;  %v1170_v46 = vrot.slane %v11711_v7, 2  ;;  %v1171_v47 = vrot.slane %v11720_v8, 2 }
  0x17   : > { %9606 = vmatprep.subr.msk.mxu0 %vm638_vm0, %v11700_v5  ;;  %v11743_v13 = vld [vmem:[%s11684_s26 + $0x78] sm:$0xff]  ;;  %v11750_v14 = vld [vmem:[%s11684_s26 + $0x80] sm:$0xff]  ;;  %v11753_v15 = vld [vmem:[%s11684_s26 + $0x90] sm:$0xff]  ;;  %v11870_v45 = vsel %vm1159_vm2, %v1165_v39, %v1166_v40  ;;  %v1175_v53 = vrot.slane %v11723_v9, 2  ;;  %v1176_v54 = vrot.slane %v11730_v10, 2  ;;  %v1180_v59 = vrot.slane %v11733_v11, 2 }
  0x18   : > { %v11760_v16 = vld [vmem:[%s11684_s26 + $0x98] sm:$0xff]  ;;  %v11763_v17 = vld [vmem:[%s11684_s26 + $0xa8] sm:$0xff]  ;;  %v11770_v18 = vld [vmem:[%s11684_s26 + $0xb0] sm:$0xff]  ;;  %v11892_v52 = vsel %vm1159_vm2, %v1170_v46, %v1171_v47  ;;  %v1181_v60 = vrot.slane %v11740_v12, 2  ;;  %v1185_v1 = vrot.slane %v11743_v13, 2 }
  0x19   : > { %9512 = vmatmul.mubr.msk.f32.gmra.mrb[2].mxu0 %vm573_vm1, %v11708_v6  ;;  %v11773_v19 = vld [vmem:[%s11684_s26 + $0xc0] sm:$0xff]  ;;  %v11780_v20 = vld [vmem:[%s11684_s26 + $0xc8] sm:$0xff]  ;;  %v11783_v21 = vld [vmem:[%s11684_s26 + $0xd8] sm:$0xff]  ;;  %v11910_v58 = vsel %vm1159_vm2, %v1175_v53, %v1176_v54  ;;  %v1196_v53 = vrot.slane %v11770_v18, 2 }
  0x1a   : > { %9514 = vmatprep.mubr.msk.f32.mxu0 %vm573_vm1, %v11711_v7  ;;  %v11790_v22 = vld [vmem:[%s11684_s26 + $0xe0] sm:$0xff]  ;;  %v11793_v23 = vld [vmem:[%s11684_s26 + $0xf0] sm:$0xff]  ;;  %v11800_v24 = vld [vmem:[%s11684_s26 + $0xf8] sm:$0xff]  ;;  %v11926_v0 = vsel %vm1159_vm2, %v1180_v59, %v1181_v60 }
  0x1b   : > { %v11803_v25 = vld [vmem:[%s11684_s26 + $0x108] sm:$0xff]  ;;  %v11810_v26 = vld [vmem:[%s11684_s26 + $0x110] sm:$0xff]  ;;  %v11813_v27 = vld [vmem:[%s11684_s26 + $0x120] sm:$0xff]  ;;  %v1210_v3 = vrot.slane %v11793_v23, 2  ;;  %v1211_v2 = vrot.slane %v11800_v24, 2 }
  0x1c   : > { %v11820_v28 = vld [vmem:[%s11684_s26 + $0x128] sm:$0xff]  ;;  %v11823_v29 = vld [vmem:[%s11684_s26 + $0x138] sm:$0xff]  ;;  %v11830_v30 = vld [vmem:[%s11684_s26 + $0x140] sm:$0xff] }
  0x1d   : > { %9515 = vmatmul.mubr.msk.f32.gmra.mrb[4].mxu0 %vm573_vm1, %v11720_v8  ;;  %v11833_v31 = vld [vmem:[%s11684_s26 + $0x150] sm:$0xff]  ;;  %v11840_v32 = vld [vmem:[%s11684_s26 + $0x158] sm:$0xff]  ;;  %v11845_v35 = vld [vmem:[%s11684_s26 + $0x168] sm:$0xff] }
  0x1e   : > { %9517 = vmatprep.mubr.msk.f32.mxu0 %vm573_vm1, %v11723_v9  ;;  %15299 = vst [vmem:[#allocation8_spill] sm:$0xff] %v11845_v35  ;;  %v11848_v36 = vld [vmem:[%s11684_s26 + $0x10] sm:$0x3]  ;;  %v11862_v42 = vld [vmem:[%s11684_s26 + $0x28] sm:$0x3] }
  0x1f   : > { %15300 = vst [vmem:[#allocation9_spill] sm:$0xff] %v11848_v36  ;;  %v11855_v37 = vld [vmem:[%s11684_s26 + $0x170] sm:$0xff]  ;;  %v1163_v38 = vrot.slane %v11848_v36, 2  ;;  %v1168_v44 = vrot.slane %v11862_v42, 2  ;;  %v11875_v48 = vld [vmem:[%s11684_s26 + $0x40] sm:$0x3] }
  0x20   : > { %v1173_v51 = vrot.slane %v11875_v48, 2  ;;  %v11897_v55 = vld [vmem:[%s11684_s26 + $0x58] sm:$0x3]  ;;  %v11915_v61 = vld [vmem:[%s11684_s26 + $0x70] sm:$0x3] }
  0x21   : > { %9518 = vmatmul.mubr.msk.f32.gmra.mrb[6].mxu0 %vm573_vm1, %v11730_v10  ;;  %v1164_v43 = vsel %vm1159_vm2, %v1161_v34, %v1163_v38  ;;  %v11888_v50 = vsel %vm1159_vm2, %v1166_v40, %v1168_v44  ;;  %v1178_v57 = vrot.slane %v11897_v55, 2  ;;  %v1183_v63 = vrot.slane %v11915_v61, 2  ;;  %v11931_v33 = vld [vmem:[%s11684_s26 + $0x88] sm:$0x3] }
  0x22   : > { %9520 = vmatprep.mubr.msk.f32.mxu0 %vm573_vm1, %v11733_v11  ;;  %v11906_v56 = vsel %vm1159_vm2, %v1171_v47, %v1173_v51  ;;  %v1188_v38 = vrot.slane %v11931_v33, 2  ;;  %v1190_v40 = vrot.slane %v11753_v15, 2  ;;  %v1195_v51 = vrot.slane %v11763_v17, 2  ;;  %v11995_v36 = vld [vmem:[%s11684_s26 + $0xe8] sm:$0x3] }
  0x23   : > { %v11922_v62 = vsel %vm1159_vm2, %v1176_v54, %v1178_v57  ;;  %v11938_v34 = vsel %vm1159_vm2, %v1181_v60, %v1183_v63  ;;  %v11963_v54 = vld [vmem:[%s11684_s26 + $0xb8] sm:$0x3]  ;;  %v1200_v63 = vrot.slane %v11773_v19, 2 }
  0x24   : > { %15301 = vst [vmem:[#allocation10_spill] sm:$0xff] %v11938_v34  ;;  %v1198_v59 = vrot.slane %v11963_v54, 2  ;;  %v11974_v60 = vsel %vm1159_vm2, %v1195_v51, %v1196_v53  ;;  %v1206_v51 = vrot.slane %v11790_v22, 2 }
  0x25   : > { %9521 = vmatmul.mubr.msk.f32.gmra.mrb[8].mxu0 %vm573_vm1, %v11740_v12  ;;  %15306 = vst [vmem:[#allocation15_spill] sm:$0xff] %v11974_v60 }
  0x26   : > { %9523 = vmatprep.mubr.msk.f32.mxu0 %vm573_vm1, %v11743_v13 }
  0x29   : > { %9524 = vmatmul.mubr.msk.f32.gmra.mrb[10].mxu0 %vm573_vm1, %v11750_v14 }
  0x2a   : > { %9526 = vmatprep.mubr.msk.f32.mxu0 %vm573_vm1, %v11753_v15 }
  0x2d   : > { %9527 = vmatmul.mubr.msk.f32.gmra.mrb[12].mxu0 %vm573_vm1, %v11760_v16 }
  0x2e   : > { %9529 = vmatprep.mubr.msk.f32.mxu0 %vm573_vm1, %v11763_v17 }
  0x31   : > { %9530 = vmatmul.mubr.msk.f32.gmra.mrb[14].mxu0 %vm573_vm1, %v11770_v18 }
  0x32   : > { %9532 = vmatprep.mubr.msk.f32.mxu0 %vm573_vm1, %v11773_v19 }
  0x35   : > { %9533 = vmatmul.mubr.msk.f32.gmra.mrb[16].mxu0 %vm573_vm1, %v11780_v20 }
  0x36   : > { %9535 = vmatprep.mubr.msk.f32.mxu0 %vm573_vm1, %v11783_v21 }
  0x39   : > { %9536 = vmatmul.mubr.msk.f32.gmra.mrb[18].mxu0 %vm573_vm1, %v11790_v22 }
  0x3a   : > { %9538 = vmatprep.mubr.msk.f32.mxu0 %vm573_vm1, %v11793_v23 }
  0x3d   : > { %9539 = vmatmul.mubr.msk.f32.gmra.mrb[20].mxu0 %vm573_vm1, %v11800_v24 }
  0x3e   : > { %9541 = vmatprep.mubr.msk.f32.mxu0 %vm573_vm1, %v11803_v25 }
  0x41   : > { %9542 = vmatmul.mubr.msk.f32.gmra.mrb[22].mxu0 %vm573_vm1, %v11810_v26 }
  0x42   : > { %9544 = vmatprep.mubr.msk.f32.mxu0 %vm573_vm1, %v11813_v27 }
  0x45   : > { %9545 = vmatmul.mubr.msk.f32.gmra.mrb[24].mxu0 %vm573_vm1, %v11820_v28 }
  0x46   : > { %9547 = vmatprep.mubr.msk.f32.mxu0 %vm573_vm1, %v11823_v29 }
  0x49   : > { %9548 = vmatmul.mubr.msk.f32.gmra.mrb[26].mxu0 %vm573_vm1, %v11830_v30 }
  0x4a   : > { %9550 = vmatprep.mubr.msk.f32.mxu0 %vm573_vm1, %v11833_v31 }
  0x4d   : > { %9551 = vmatmul.mubr.msk.f32.gmra.mrb[28].mxu0 %vm573_vm1, %v11840_v32 }
  0x4e   : > { %9553 = vmatprep.mubr.msk.f32.mxu0 %vm573_vm1, %v11845_v35 }
  0x51   : > { %9554 = vmatmul.mubr.msk.f32.gmra.mrb[30].mxu0 %vm573_vm1, %v11855_v37 }
  0x52   : > { %9558 = vmatprep.mubr.msk.f32.mxu0 %vm573_vm1, %v1162_v41  ;;  %v1191_v41 = vrot.slane %v11760_v16, 2 }
  0x54   : > { %v11958_v47 = vsel %vm1159_vm2, %v1190_v40, %v1191_v41 }
  0x55   : > { %9559 = vmatmul.mubr.msk.f32.vlgmr.msra.gmra.mrb[0].mxu0 %vm573_vm1, %v1164_v43  ;;  %v11947_v43 = vld [vmem:[%s11684_s26 + $0xa0] sm:$0x3]  ;;  %15304 = vst [vmem:[#allocation13_spill] sm:$0xff] %v11958_v47 }
  0x56   : > { %9607 = vmatpush3.msk.msra.mxu0 %vm638_vm0, %v11700_v5  ;;  %9561 = vmatprep.mubr.msk.f32.mxu0 %vm573_vm1, %v11870_v45  ;;  %v1186_v5 = vrot.slane %v11750_v14, 2  ;;  %v1193_v46 = vrot.slane %v11947_v43, 2 }
  0x57   : > { %9656 = vmatprep.subr.msk.mxu0 %vm638_vm0, %v11880_v49 }
  0x58   : > { %v11942_v39 = vsel %vm1159_vm2, %v1185_v1, %v1186_v5  ;;  %v11954_v44 = vsel %vm1159_vm2, %v1186_v5, %v1188_v38  ;;  %v11970_v57 = vsel %vm1159_vm2, %v1191_v41, %v1193_v46  ;;  %v1201_v1 = vrot.slane %v11780_v20, 2  ;;  %v11979_v5 = vld [vmem:[%s11684_s26 + $0xd0] sm:$0x3] }
  0x59   : > { %9562 = vmatmul.mubr.msk.f32.gmra.mrb[2].mxu0 %vm573_vm1, %v11888_v50  ;;  %15302 = vst [vmem:[#allocation11_spill] sm:$0xff] %v11942_v39  ;;  %15303 = vst [vmem:[#allocation12_spill] sm:$0xff] %v11954_v44  ;;  %v11986_v38 = vsel %vm1159_vm2, %v1196_v53, %v1198_v59  ;;  %v1203_v40 = vrot.slane %v11979_v5, 2  ;;  %v1205_v46 = vrot.slane %v11783_v21, 2  ;;  %v1208_v59 = vrot.slane %v11995_v36, 2 }
  0x5a   : > { %9564 = vmatprep.mubr.msk.f32.mxu0 %vm573_vm1, %v11892_v52  ;;  %15305 = vst [vmem:[#allocation14_spill] sm:$0xff] %v11970_v57  ;;  %15307 = vst [vmem:[#allocation16_spill] sm:$0xff] %v11986_v38  ;;  %v11990_v41 = vsel %vm1159_vm2, %v1200_v63, %v1201_v1 }
  0x5b   : > { %15308 = vst [vmem:[#allocation17_spill] sm:$0xff] %v11990_v41  ;;  %v12002_v53 = vsel %vm1159_vm2, %v1201_v1, %v1203_v40  ;;  %v12006_v63 = vsel %vm1159_vm2, %v1205_v46, %v1206_v51  ;;  %v12018_v1 = vsel %vm1159_vm2, %v1206_v51, %v1208_v59  ;;  %v12022_v46 = vsel %vm1159_vm2, %v1210_v3, %v1211_v2 }
  0x5c   : > { %15309 = vst [vmem:[#allocation18_spill] sm:$0xff] %v12002_v53  ;;  %15310 = vst [vmem:[#allocation19_spill] sm:$0xff] %v12006_v63 }
  0x5d   : > { %9565 = vmatmul.mubr.msk.f32.gmra.mrb[4].mxu0 %vm573_vm1, %v11906_v56  ;;  %15311 = vst [vmem:[#allocation20_spill] sm:$0xff] %v12018_v1  ;;  %15312 = vst [vmem:[#allocation21_spill] sm:$0xff] %v12022_v46 }
  0x5e   : > { %9567 = vmatprep.mubr.msk.f32.mxu0 %vm573_vm1, %v11910_v58 }
  0x61   : > { %9568 = vmatmul.mubr.msk.f32.gmra.mrb[6].mxu0 %vm573_vm1, %v11922_v62 }
  0x62   : > { %9570 = vmatprep.mubr.msk.f32.mxu0 %vm573_vm1, %v11926_v0 }
  0x65   : > { %9571 = vmatmul.mubr.msk.f32.gmra.mrb[8].mxu0 %vm573_vm1, %v11938_v34  ;;  %v12091_v34 = vld [vmem:[%s11684_s26 + $0x178] sm:$0x3] }
  0x66   : > { %9573 = vmatprep.mubr.msk.f32.mxu0 %vm573_vm1, %v11942_v39  ;;  %v12075_v39 = vld [vmem:[%s11684_s26 + $0x160] sm:$0x3] }
  0x69   : > { %9574 = vmatmul.mubr.msk.f32.gmra.mrb[10].mxu0 %vm573_vm1, %v11954_v44  ;;  %v12059_v44 = vld [vmem:[%s11684_s26 + $0x148] sm:$0x3] }
  0x6a   : > { %9576 = vmatprep.mubr.msk.f32.mxu0 %vm573_vm1, %v11958_v47  ;;  %v12043_v47 = vld [vmem:[%s11684_s26 + $0x130] sm:$0x3] }
  0x6d   : > { %9577 = vmatmul.mubr.msk.f32.gmra.mrb[12].mxu0 %vm573_vm1, %v11970_v57  ;;  %v12027_v57 = vld [vmem:[%s11684_s26 + $0x118] sm:$0x3] }
  0x6e   : > { %9579 = vmatprep.mubr.msk.f32.mxu0 %vm573_vm1, %v11974_v60  ;;  %v12011_v60 = vld [vmem:[%s11684_s26 + $0x100] sm:$0x3]  ;;  %v1218_v59 = vrot.slane %v12027_v57, 2 }
  0x6f   : > { %v1213_v40 = vrot.slane %v12011_v60, 2 }
  0x71   : > { %9580 = vmatmul.mubr.msk.f32.gmra.mrb[14].mxu0 %vm573_vm1, %v11986_v38  ;;  %v1216_v38 = vrot.slane %v11810_v26, 2  ;;  %v12034_v51 = vsel %vm1159_vm2, %v1211_v2, %v1213_v40  ;;  %v1223_v40 = vrot.slane %v12043_v47, 2 }
  0x72   : > { %9582 = vmatprep.mubr.msk.f32.mxu0 %vm573_vm1, %v11990_v41  ;;  %v1215_v41 = vrot.slane %v11803_v25, 2  ;;  %15313 = vst [vmem:[#allocation22_spill] sm:$0xff] %v12034_v51 }
  0x73   : > { %v12050_v2 = vsel %vm1159_vm2, %v1216_v38, %v1218_v59  ;;  %v1228_v59 = vrot.slane %v12059_v44, 2 }
  0x74   : > { %v12038_v3 = vsel %vm1159_vm2, %v1215_v41, %v1216_v38  ;;  %15315 = vst [vmem:[#allocation24_spill] sm:$0xff] %v12050_v2 }
  0x75   : > { %9583 = vmatmul.mubr.msk.f32.gmra.mrb[16].mxu0 %vm573_vm1, %v12002_v53  ;;  %15314 = vst [vmem:[#allocation23_spill] sm:$0xff] %v12038_v3  ;;  %v1221_v53 = vrot.slane %v11820_v28, 2 }
  0x76   : > { %9585 = vmatprep.mubr.msk.f32.mxu0 %vm573_vm1, %v12006_v63  ;;  %v1220_v63 = vrot.slane %v11813_v27, 2 }
  0x77   : > { %v12066_v38 = vsel %vm1159_vm2, %v1221_v53, %v1223_v40  ;;  %v1233_v40 = vrot.slane %v12075_v39, 2 }
  0x78   : > { %v12054_v41 = vsel %vm1159_vm2, %v1220_v63, %v1221_v53  ;;  %15317 = vst [vmem:[#allocation26_spill] sm:$0xff] %v12066_v38 }
  0x79   : > { %9586 = vmatmul.mubr.msk.f32.gmra.mrb[18].mxu0 %vm573_vm1, %v12018_v1  ;;  %15316 = vst [vmem:[#allocation25_spill] sm:$0xff] %v12054_v41  ;;  %v1226_v1 = vrot.slane %v11830_v30, 2 }
  0x7a   : > { %9588 = vmatprep.mubr.msk.f32.mxu0 %vm573_vm1, %v12022_v46  ;;  %v1225_v46 = vrot.slane %v11823_v29, 2 }
  0x7b   : > { %v12082_v53 = vsel %vm1159_vm2, %v1226_v1, %v1228_v59  ;;  %v1238_v59 = vrot.slane %v12091_v34, 2 }
  0x7c   : > { %v12070_v63 = vsel %vm1159_vm2, %v1225_v46, %v1226_v1  ;;  %15319 = vst [vmem:[#allocation28_spill] sm:$0xff] %v12082_v53 }
  0x7d   : > { %9589 = vmatmul.mubr.msk.f32.gmra.mrb[20].mxu0 %vm573_vm1, %v12034_v51  ;;  %15318 = vst [vmem:[#allocation27_spill] sm:$0xff] %v12070_v63  ;;  %v1231_v51 = vrot.slane %v11840_v32, 2 }
  0x7e   : > { %9591 = vmatprep.mubr.msk.f32.mxu0 %vm573_vm1, %v12038_v3  ;;  %v1230_v3 = vrot.slane %v11833_v31, 2 }
  0x7f   : > { %v12098_v1 = vsel %vm1159_vm2, %v1231_v51, %v1233_v40  ;;  %v499_v40 = vrot.slane %v11862_v42, 1 }
  0x80   : > { %v12086_v46 = vsel %vm1159_vm2, %v1230_v3, %v1231_v51  ;;  %15321 = vst [vmem:[#allocation30_spill] sm:$0xff] %v12098_v1  ;;  %v8280_v51 = vld [vmem:[%s15104_s1 + $0xa] sm:$0x3] }
  0x81   : > { %9592 = vmatmul.mubr.msk.f32.gmra.mrb[22].mxu0 %vm573_vm1, %v12050_v2  ;;  %15320 = vst [vmem:[#allocation29_spill] sm:$0xff] %v12086_v46  ;;  %v1236_v2 = vrot.slane %v11855_v37, 2 }
  0x82   : > { %9594 = vmatprep.mubr.msk.f32.mxu0 %vm573_vm1, %v12054_v41  ;;  %v1235_v41 = vrot.slane %v11845_v35, 2 }
  0x84   : > { %v12102_v3 = vsel %vm1159_vm2, %v1235_v41, %v1236_v2  ;;  %v12180_v41 = vld [vmem:[%s11684_s26 + $0x180] sm:$0xff] }
  0x85   : > { %9595 = vmatmul.mubr.msk.f32.gmra.mrb[24].mxu0 %vm573_vm1, %v12066_v38  ;;  %15322 = vst [vmem:[#allocation31_spill] sm:$0xff] %v12102_v3 }
  0x86   : > { %9597 = vmatprep.mubr.msk.f32.mxu0 %vm573_vm1, %v12070_v63  ;;  %v12109_v63 = vsel %vm1159_vm2, %v1236_v2, %v1238_v59  ;;  %v497_v2 = vrot.slane %v11708_v6, 1  ;;  %v12188_v59 = vld [vmem:[%s11684_s26 + $0x188] sm:$0xff] }
  0x87   : > { %15323 = vst [vmem:[#allocation32_spill] sm:$0xff] %v12109_v63 }
  0x88   : > { %v12200_v42 = vsel %vm490_vm3, %v497_v2, %v499_v40 }
  0x89   : > { %9598 = vmatmul.mubr.msk.f32.gmra.mrb[26].mxu0 %vm573_vm1, %v12082_v53 }
  0x8a   : > { %9600 = vmatprep.mubr.msk.f32.mxu0 %vm573_vm1, %v12086_v46 }
  0x8d   : > { %9601 = vmatmul.mubr.msk.f32.gmra.mrb[28].mxu0 %vm573_vm1, %v12098_v1 }
  0x8e   : > { %9603 = vmatprep.mubr.msk.f32.mxu0 %vm573_vm1, %v12102_v3  ;;  %v504_v3 = vrot.slane %v11875_v48, 1 }
  0x91   : > { %9604 = vmatmul.mubr.msk.f32.gmra.mrb[30].mxu0 %vm573_vm1, %v12109_v63 }
  0x92   : > { %9608 = vmatprep.mubr.msk.f32.mxu0 %vm573_vm1, %v11693_v4 }
  0x95   : > { %9609 = vmatmul.mubr.msk.f32.vlgmr.msra.gmra.mrb[0].mxu0 %vm573_vm1, %v11708_v6  ;;  %v502_v6 = vrot.slane %v11720_v8, 1 }
  0x96   : > { %9657 = vmatpush3.msk.msra.mxu0 %vm638_vm0, %v11880_v49  ;;  %9611 = vmatprep.mubr.msk.f32.mxu0 %vm573_vm1, %v11711_v7  ;;  %v496_v49 = vrot.slane %v11693_v4, 1  ;;  %v501_v4 = vrot.slane %v11711_v7, 1  ;;  %v507_v7 = vrot.slane %v11730_v10, 1 }
  0x97   : > { %9706 = vmatprep.subr.msk.mxu0 %vm638_vm0, %v8280_v51  ;;  %v12219_v48 = vsel %vm490_vm3, %v502_v6, %v504_v3 }
  0x98   : > { %v12191_v63 = vsel %vm490_vm3, %v496_v49, %v497_v2  ;;  %v12204_v1 = vsel %vm490_vm3, %v501_v4, %v502_v6  ;;  %v506_v49 = vrot.slane %v11723_v9, 1  ;;  %v509_v2 = vrot.slane %v11897_v55, 1 }
  0x99   : > { %9612 = vmatmul.mubr.msk.f32.gmra.mrb[2].mxu0 %vm573_vm1, %v11720_v8  ;;  %v12211_v8 = vld [vmem:[%s15104_s1 + $0xc] sm:$0x3]  ;;  %v511_v4 = vrot.slane %v11733_v11, 1  ;;  %v514_v55 = vrot.slane %v11915_v61, 1  ;;  %v516_v6 = vrot.slane %v11743_v13, 1 }
  0x9a   : > { %9614 = vmatprep.mubr.msk.f32.mxu0 %vm573_vm1, %v11723_v9  ;;  %v12223_v40 = vsel %vm490_vm3, %v506_v49, %v507_v7  ;;  %v12234_v3 = vsel %vm490_vm3, %v507_v7, %v509_v2  ;;  %v517_v49 = vrot.slane %v11750_v14, 1  ;;  %v519_v7 = vrot.slane %v11931_v33, 1 }
  0x9b   : > { %15324 = vst [vmem:[#allocation33_spill] sm:$0xff] %v12223_v40  ;;  %v521_v2 = vrot.slane %v11753_v15, 1 }
  0x9c   : > { %v12251_v61 = vsel %vm490_vm3, %v516_v6, %v517_v49  ;;  %v527_v6 = vrot.slane %v11770_v18, 1 }
  0x9d   : > { %9615 = vmatmul.mubr.msk.f32.gmra.mrb[4].mxu0 %vm573_vm1, %v11730_v10  ;;  %v512_v10 = vrot.slane %v11740_v12, 1  ;;  %15326 = vst [vmem:[#allocation35_spill] sm:$0xff] %v12251_v61 }
  0x9e   : > { %9617 = vmatprep.mubr.msk.f32.mxu0 %vm573_vm1, %v11733_v11 }
  0xa1   : > { %9618 = vmatmul.mubr.msk.f32.gmra.mrb[6].mxu0 %vm573_vm1, %v11740_v12 }
  0xa2   : > { %9620 = vmatprep.mubr.msk.f32.mxu0 %vm573_vm1, %v11743_v13 }
  0xa5   : > { %9621 = vmatmul.mubr.msk.f32.gmra.mrb[8].mxu0 %vm573_vm1, %v11750_v14 }
  0xa6   : > { %9623 = vmatprep.mubr.msk.f32.mxu0 %vm573_vm1, %v11753_v15 }
  0xa9   : > { %9624 = vmatmul.mubr.msk.f32.gmra.mrb[10].mxu0 %vm573_vm1, %v11760_v16 }
  0xaa   : > { %9626 = vmatprep.mubr.msk.f32.mxu0 %vm573_vm1, %v11763_v17 }
  0xad   : > { %9627 = vmatmul.mubr.msk.f32.gmra.mrb[12].mxu0 %vm573_vm1, %v11770_v18 }
  0xae   : > { %9629 = vmatprep.mubr.msk.f32.mxu0 %vm573_vm1, %v11773_v19 }
  0xb1   : > { %9630 = vmatmul.mubr.msk.f32.gmra.mrb[14].mxu0 %vm573_vm1, %v11780_v20 }
  0xb2   : > { %9632 = vmatprep.mubr.msk.f32.mxu0 %vm573_vm1, %v11783_v21 }
  0xb5   : > { %9633 = vmatmul.mubr.msk.f32.gmra.mrb[16].mxu0 %vm573_vm1, %v11790_v22 }
  0xb6   : > { %9635 = vmatprep.mubr.msk.f32.mxu0 %vm573_vm1, %v11793_v23 }
  0xb9   : > { %9636 = vmatmul.mubr.msk.f32.gmra.mrb[18].mxu0 %vm573_vm1, %v11800_v24 }
  0xba   : > { %9638 = vmatprep.mubr.msk.f32.mxu0 %vm573_vm1, %v11803_v25 }
  0xbd   : > { %9639 = vmatmul.mubr.msk.f32.gmra.mrb[20].mxu0 %vm573_vm1, %v11810_v26 }
  0xbe   : > { %9641 = vmatprep.mubr.msk.f32.mxu0 %vm573_vm1, %v11813_v27 }
  0xc1   : > { %9642 = vmatmul.mubr.msk.f32.gmra.mrb[22].mxu0 %vm573_vm1, %v11820_v28 }
  0xc2   : > { %9644 = vmatprep.mubr.msk.f32.mxu0 %vm573_vm1, %v11823_v29 }
  0xc5   : > { %9645 = vmatmul.mubr.msk.f32.gmra.mrb[24].mxu0 %vm573_vm1, %v11830_v30 }
  0xc6   : > { %9647 = vmatprep.mubr.msk.f32.mxu0 %vm573_vm1, %v11833_v31 }
  0xc9   : > { %9648 = vmatmul.mubr.msk.f32.gmra.mrb[26].mxu0 %vm573_vm1, %v11840_v32 }
  0xca   : > { %9650 = vmatprep.mubr.msk.f32.mxu0 %vm573_vm1, %v11845_v35 }
  0xcd   : > { %9651 = vmatmul.mubr.msk.f32.gmra.mrb[28].mxu0 %vm573_vm1, %v11855_v37 }
  0xce   : > { %9653 = vmatprep.mubr.msk.f32.mxu0 %vm573_vm1, %v12180_v41 }
  0xd1   : > { %9654 = vmatmul.mubr.msk.f32.gmra.mrb[30].mxu0 %vm573_vm1, %v12188_v59 }
  0xd2   : > { %9658 = vmatprep.mubr.msk.f32.mxu0 %vm573_vm1, %v12191_v63 }
  0xd5   : > { %9659 = vmatmul.mubr.msk.f32.vlgmr.msra.gmra.mrb[0].mxu0 %vm573_vm1, %v12200_v42 }
  0xd6   : > { %9707 = vmatpush3.msk.msra.mxu0 %vm638_vm0, %v8280_v51  ;;  %9661 = vmatprep.mubr.msk.f32.mxu0 %vm573_vm1, %v12204_v1  ;;  %v12238_v51 = vsel %vm490_vm3, %v511_v4, %v512_v10  ;;  %v522_v4 = vrot.slane %v11760_v16, 1 }
  0xd7   : > { %9756 = vmatprep.subr.msk.mxu0 %vm638_vm0, %v12211_v8  ;;  %15325 = vst [vmem:[#allocation34_spill] sm:$0xff] %v12238_v51 }
  0xd8   : > { %v12264_v33 = vsel %vm490_vm3, %v521_v2, %v522_v4  ;;  %v532_v2 = vrot.slane %v11780_v20, 1 }
  0xd9   : > { %9662 = vmatmul.mubr.msk.f32.gmra.mrb[2].mxu0 %vm573_vm1, %v12219_v48  ;;  %15327 = vst [vmem:[#allocation36_spill] sm:$0xff] %v12264_v33 }
  0xda   : > { %9664 = vmatprep.mubr.msk.f32.mxu0 %vm573_vm1, %v12223_v40  ;;  %v12247_v40 = vsel %vm490_vm3, %v512_v10, %v514_v55  ;;  %v524_v10 = vrot.slane %v11947_v43, 1  ;;  %v526_v55 = vrot.slane %v11763_v17, 1 }
  0xdc   : > { %v12277_v43 = vsel %vm490_vm3, %v526_v55, %v527_v6  ;;  %v537_v55 = vrot.slane %v11790_v22, 1 }
  0xdd   : > { %9665 = vmatmul.mubr.msk.f32.gmra.mrb[4].mxu0 %vm573_vm1, %v12234_v3  ;;  %15328 = vst [vmem:[#allocation37_spill] sm:$0xff] %v12277_v43 }
  0xde   : > { %9667 = vmatprep.mubr.msk.f32.mxu0 %vm573_vm1, %v12238_v51  ;;  %v12260_v51 = vsel %vm490_vm3, %v517_v49, %v519_v7  ;;  %v529_v49 = vrot.slane %v11963_v54, 1  ;;  %v531_v7 = vrot.slane %v11773_v19, 1 }
  0xe0   : > { %v12290_v54 = vsel %vm490_vm3, %v531_v7, %v532_v2  ;;  %v542_v7 = vrot.slane %v11800_v24, 1 }
  0xe1   : > { %9668 = vmatmul.mubr.msk.f32.gmra.mrb[6].mxu0 %vm573_vm1, %v12247_v40  ;;  %15329 = vst [vmem:[#allocation38_spill] sm:$0xff] %v12290_v54 }
  0xe2   : > { %9670 = vmatprep.mubr.msk.f32.mxu0 %vm573_vm1, %v12251_v61  ;;  %v12273_v61 = vsel %vm490_vm3, %v522_v4, %v524_v10  ;;  %v534_v4 = vrot.slane %v11979_v5, 1  ;;  %v536_v10 = vrot.slane %v11783_v21, 1 }
  0xe4   : > { %v12303_v5 = vsel %vm490_vm3, %v536_v10, %v537_v55  ;;  %v547_v10 = vrot.slane %v11810_v26, 1 }
  0xe5   : > { %9671 = vmatmul.mubr.msk.f32.gmra.mrb[8].mxu0 %vm573_vm1, %v12260_v51  ;;  %15330 = vst [vmem:[#allocation39_spill] sm:$0xff] %v12303_v5 }
  0xe6   : > { %9673 = vmatprep.mubr.msk.f32.mxu0 %vm573_vm1, %v12264_v33  ;;  %v12286_v33 = vsel %vm490_vm3, %v527_v6, %v529_v49  ;;  %v539_v6 = vrot.slane %v11995_v36, 1  ;;  %v541_v49 = vrot.slane %v11793_v23, 1 }
  0xe8   : > { %v12316_v36 = vsel %vm490_vm3, %v541_v49, %v542_v7  ;;  %v552_v49 = vrot.slane %v11820_v28, 1 }
  0xe9   : > { %9674 = vmatmul.mubr.msk.f32.gmra.mrb[10].mxu0 %vm573_vm1, %v12273_v61  ;;  %15331 = vst [vmem:[#allocation40_spill] sm:$0xff] %v12316_v36 }
  0xea   : > { %9676 = vmatprep.mubr.msk.f32.mxu0 %vm573_vm1, %v12277_v43  ;;  %v12299_v43 = vsel %vm490_vm3, %v532_v2, %v534_v4  ;;  %v544_v2 = vrot.slane %v12011_v60, 1  ;;  %v546_v4 = vrot.slane %v11803_v25, 1 }
  0xec   : > { %v12329_v60 = vsel %vm490_vm3, %v546_v4, %v547_v10  ;;  %v557_v4 = vrot.slane %v11830_v30, 1 }
  0xed   : > { %9677 = vmatmul.mubr.msk.f32.gmra.mrb[12].mxu0 %vm573_vm1, %v12286_v33  ;;  %15332 = vst [vmem:[#allocation41_spill] sm:$0xff] %v12329_v60 }
  0xee   : > { %9679 = vmatprep.mubr.msk.f32.mxu0 %vm573_vm1, %v12290_v54  ;;  %v12312_v54 = vsel %vm490_vm3, %v537_v55, %v539_v6  ;;  %v549_v55 = vrot.slane %v12027_v57, 1  ;;  %v551_v6 = vrot.slane %v11813_v27, 1 }
  0xf0   : > { %v12342_v57 = vsel %vm490_vm3, %v551_v6, %v552_v49  ;;  %v562_v6 = vrot.slane %v11840_v32, 1 }
  0xf1   : > { %9680 = vmatmul.mubr.msk.f32.gmra.mrb[14].mxu0 %vm573_vm1, %v12299_v43  ;;  %15333 = vst [vmem:[#allocation42_spill] sm:$0xff] %v12342_v57 }
  0xf2   : > { %9682 = vmatprep.mubr.msk.f32.mxu0 %vm573_vm1, %v12303_v5  ;;  %v12325_v5 = vsel %vm490_vm3, %v542_v7, %v544_v2  ;;  %v554_v7 = vrot.slane %v12043_v47, 1  ;;  %v556_v2 = vrot.slane %v11823_v29, 1 }
  0xf4   : > { %v12355_v47 = vsel %vm490_vm3, %v556_v2, %v557_v4  ;;  %v567_v2 = vrot.slane %v11855_v37, 1 }
  0xf5   : > { %9683 = vmatmul.mubr.msk.f32.gmra.mrb[16].mxu0 %vm573_vm1, %v12312_v54  ;;  %15334 = vst [vmem:[#allocation43_spill] sm:$0xff] %v12355_v47 }
  0xf6   : > { %9685 = vmatprep.mubr.msk.f32.mxu0 %vm573_vm1, %v12316_v36  ;;  %v12338_v36 = vsel %vm490_vm3, %v547_v10, %v549_v55  ;;  %v559_v10 = vrot.slane %v12059_v44, 1  ;;  %v561_v55 = vrot.slane %v11833_v31, 1 }
  0xf8   : > { %v12368_v44 = vsel %vm490_vm3, %v561_v55, %v562_v6 }
  0xf9   : > { %9686 = vmatmul.mubr.msk.f32.gmra.mrb[18].mxu0 %vm573_vm1, %v12325_v5  ;;  %15335 = vst [vmem:[#allocation44_spill] sm:$0xff] %v12368_v44 }
  0xfa   : > { %9688 = vmatprep.mubr.msk.f32.mxu0 %vm573_vm1, %v12329_v60  ;;  %v12351_v60 = vsel %vm490_vm3, %v552_v49, %v554_v7  ;;  %v564_v49 = vrot.slane %v12075_v39, 1  ;;  %v566_v7 = vrot.slane %v11845_v35, 1  ;;  %v1835_v39 = vrot.slane %v12180_v41, 1  ;;  %v437_v35 = vld [vmem:[%s11684_s26 + $0x190] sm:$0x3] }
  0xfc   : > { %v12383_v55 = vsel %vm490_vm3, %v566_v7, %v567_v2  ;;  %v8348_v7 = vld [vmem:[%s15104_s1 + $0xe] sm:$0x3] }
  0xfd   : > { %9689 = vmatmul.mubr.msk.f32.gmra.mrb[20].mxu0 %vm573_vm1, %v12338_v36 }
  0xfe   : > { %9691 = vmatprep.mubr.msk.f32.mxu0 %vm573_vm1, %v12342_v57  ;;  %v12364_v57 = vsel %vm490_vm3, %v557_v4, %v559_v10  ;;  %v569_v4 = vrot.slane %v12091_v34, 1  ;;  %v1836_v10 = vrot.slane %v12188_v59, 1 }
 0x100   : > { %v12394_v34 = vsel %vm490_vm3, %v1835_v39, %v1836_v10  ;;  %v15341_v39 = vld [vmem:[#allocation15_spill] sm:$0xff] }
 0x101   : > { %9692 = vmatmul.mubr.msk.f32.gmra.mrb[22].mxu0 %vm573_vm1, %v12351_v60 }
 0x102   : > { %9694 = vmatprep.mubr.msk.f32.mxu0 %vm573_vm1, %v12355_v47  ;;  %v12377_v47 = vsel %vm490_vm3, %v562_v6, %v564_v49  ;;  %v1838_v6 = vrot.slane %v437_v35, 1 }
 0x104   : > { %v12401_v49 = vsel %vm490_vm3, %v1836_v10, %v1838_v6  ;;  %v15342_v10 = vld [vmem:[#allocation16_spill] sm:$0xff]  ;;  %v15343_v6 = vld [vmem:[#allocation17_spill] sm:$0xff] }
 0x105   : > { %9695 = vmatmul.mubr.msk.f32.gmra.mrb[24].mxu0 %vm573_vm1, %v12364_v57 }
 0x106   : > { %9697 = vmatprep.mubr.msk.f32.mxu0 %vm573_vm1, %v12368_v44  ;;  %v12391_v44 = vsel %vm490_vm3, %v567_v2, %v569_v4  ;;  %v15339_v2 = vld [vmem:[#allocation13_spill] sm:$0xff]  ;;  %v15340_v4 = vld [vmem:[#allocation14_spill] sm:$0xff] }
 0x109   : > { %9698 = vmatmul.mubr.msk.f32.gmra.mrb[26].mxu0 %vm573_vm1, %v12377_v47 }
 0x10a   : > { %9700 = vmatprep.mubr.msk.f32.mxu0 %vm573_vm1, %v12383_v55 }
 0x10d   : > { %9701 = vmatmul.mubr.msk.f32.gmra.mrb[28].mxu0 %vm573_vm1, %v12391_v44 }
 0x10e   : > { %9703 = vmatprep.mubr.msk.f32.mxu0 %vm573_vm1, %v12394_v34 }
 0x111   : > { %9704 = vmatmul.mubr.msk.f32.gmra.mrb[30].mxu0 %vm573_vm1, %v12401_v49 }
 0x112   : > { %9708 = vmatprep.mubr.msk.f32.mxu0 %vm573_vm1, %v11870_v45  ;;  %v15336_v45 = vld [vmem:[#allocation10_spill] sm:$0xff] }
 0x115   : > { %9709 = vmatmul.mubr.msk.f32.vlgmr.msra.gmra.mrb[0].mxu0 %vm573_vm1, %v11888_v50  ;;  %v15338_v50 = vld [vmem:[#allocation12_spill] sm:$0xff] }
 0x116   : > { %9757 = vmatpush3.msk.msra.mxu0 %vm638_vm0, %v12211_v8  ;;  %9711 = vmatprep.mubr.msk.f32.mxu0 %vm573_vm1, %v11892_v52  ;;  %v15337_v8 = vld [vmem:[#allocation11_spill] sm:$0xff] }
 0x117   : > { %9806 = vmatprep.subr.msk.mxu0 %vm638_vm0, %v8348_v7 }
 0x119   : > { %9712 = vmatmul.mubr.msk.f32.gmra.mrb[2].mxu0 %vm573_vm1, %v11906_v56 }
 0x11a   : > { %9714 = vmatprep.mubr.msk.f32.mxu0 %vm573_vm1, %v11910_v58 }
 0x11d   : > { %9715 = vmatmul.mubr.msk.f32.gmra.mrb[4].mxu0 %vm573_vm1, %v11922_v62 }
 0x11e   : > { %9717 = vmatprep.mubr.msk.f32.mxu0 %vm573_vm1, %v11926_v0 }
 0x121   : > { %9718 = vmatmul.mubr.msk.f32.gmra.mrb[6].mxu0 %vm573_vm1, %v15336_v45  ;;  %v15344_v45 = vld [vmem:[#allocation18_spill] sm:$0xff] }
 0x122   : > { %9720 = vmatprep.mubr.msk.f32.mxu0 %vm573_vm1, %v15337_v8  ;;  %v15345_v8 = vld [vmem:[#allocation19_spill] sm:$0xff] }
 0x125   : > { %9721 = vmatmul.mubr.msk.f32.gmra.mrb[8].mxu0 %vm573_vm1, %v15338_v50  ;;  %v15346_v50 = vld [vmem:[#allocation20_spill] sm:$0xff] }
 0x126   : > { %9723 = vmatprep.mubr.msk.f32.mxu0 %vm573_vm1, %v15339_v2  ;;  %v15347_v2 = vld [vmem:[#allocation21_spill] sm:$0xff] }
 0x129   : > { %9724 = vmatmul.mubr.msk.f32.gmra.mrb[10].mxu0 %vm573_vm1, %v15340_v4  ;;  %v15348_v4 = vld [vmem:[#allocation22_spill] sm:$0xff] }
 0x12a   : > { %9726 = vmatprep.mubr.msk.f32.mxu0 %vm573_vm1, %v15341_v39  ;;  %v15349_v39 = vld [vmem:[#allocation23_spill] sm:$0xff] }
 0x12d   : > { %9727 = vmatmul.mubr.msk.f32.gmra.mrb[12].mxu0 %vm573_vm1, %v15342_v10  ;;  %v15350_v10 = vld [vmem:[#allocation24_spill] sm:$0xff] }
 0x12e   : > { %9729 = vmatprep.mubr.msk.f32.mxu0 %vm573_vm1, %v15343_v6  ;;  %v15351_v6 = vld [vmem:[#allocation25_spill] sm:$0xff] }
 0x131   : > { %9730 = vmatmul.mubr.msk.f32.gmra.mrb[14].mxu0 %vm573_vm1, %v15344_v45  ;;  %v15357_v45 = vld [vmem:[#allocation4_spill] sm:$0xff] }
 0x132   : > { %9732 = vmatprep.mubr.msk.f32.mxu0 %vm573_vm1, %v15345_v8  ;;  %v15352_v8 = vld [vmem:[#allocation27_spill] sm:$0xff] }
 0x135   : > { %9733 = vmatmul.mubr.msk.f32.gmra.mrb[16].mxu0 %vm573_vm1, %v15346_v50 }
 0x136   : > { %9735 = vmatprep.mubr.msk.f32.mxu0 %vm573_vm1, %v15347_v2 }
 0x139   : > { %9736 = vmatmul.mubr.msk.f32.gmra.mrb[18].mxu0 %vm573_vm1, %v15348_v4  ;;  %v2107_v4 = vrot.slane %v12188_v59, 2 }
 0x13a   : > { %9738 = vmatprep.mubr.msk.f32.mxu0 %vm573_vm1, %v15349_v39  ;;  %v2106_v39 = vrot.slane %v12180_v41, 2 }
 0x13c   : > { %v12472_v2 = vsel %vm1159_vm2, %v2106_v39, %v2107_v4  ;;  %v15358_v39 = vld [vmem:[#allocation9_spill] sm:$0xff] }
 0x13d   : > { %9739 = vmatmul.mubr.msk.f32.gmra.mrb[20].mxu0 %vm573_vm1, %v15350_v10  ;;  %v15353_v10 = vld [vmem:[#allocation30_spill] sm:$0xff] }
 0x13e   : > { %9741 = vmatprep.mubr.msk.f32.mxu0 %vm573_vm1, %v15351_v6  ;;  %v15354_v6 = vld [vmem:[#allocation31_spill] sm:$0xff] }
 0x141   : > { %9742 = vmatmul.mubr.msk.f32.gmra.mrb[22].mxu0 %vm573_vm1, %v12066_v38  ;;  %v2109_v38 = vrot.slane %v437_v35, 2  ;;  %v8111_v35 = vld [vmem:[%s15104_s1 + $0x2] sm:$0x3] }
 0x142   : > { %9744 = vmatprep.mubr.msk.f32.mxu0 %vm573_vm1, %v15352_v8  ;;  %v15355_v8 = vld [vmem:[#allocation32_spill] sm:$0xff]  ;;  %9456 = vmatprep.subr.msk.mxu1 %vm638_vm0, %v8111_v35 }
 0x143   : > { %9457 = vmatpush3.msk.msra.mxu1 %vm638_vm0, %v8111_v35 }
 0x145   : > { %9745 = vmatmul.mubr.msk.f32.gmra.mrb[24].mxu0 %vm573_vm1, %v12082_v53  ;;  %v15356_v53 = vld [vmem:[#allocation3_spill] sm:$0xff] }
 0x146   : > { %9747 = vmatprep.mubr.msk.f32.mxu0 %vm573_vm1, %v12086_v46  ;;  %v491_v50 = vrot.slane %v15356_v53, 1  ;;  %v12480_v46 = vsel %vm1159_vm2, %v2107_v4, %v2109_v38  ;;  %v15360_v4 = vld [vmem:[#allocation6_spill] sm:$0xff] }
 0x149   : > { %9748 = vmatmul.mubr.msk.f32.gmra.mrb[26].mxu0 %vm573_vm1, %v15353_v10  ;;  %v492_v10 = vrot.slane %v15357_v45, 1  ;;  %v12499_v45 = vld [vmem:[%s15104_s1 + $0x10] sm:$0x3] }
 0x14a   : > { %9750 = vmatprep.mubr.msk.f32.mxu0 %vm573_vm1, %v15354_v6  ;;  %v494_v6 = vrot.slane %v15358_v39, 1 }
 0x14b   : > { %v493_v53 = vsel %vm490_vm3, %v491_v50, %v492_v10 }
 0x14c   : > { %9458 = vmatprep.mubr.msk.f32.mxu1 %vm573_vm1, %v493_v53  ;;  %v495_v38 = vsel %vm490_vm3, %v492_v10, %v494_v6 }
 0x14d   : > { %9751 = vmatmul.mubr.msk.f32.gmra.mrb[28].mxu0 %vm573_vm1, %v15355_v8  ;;  %v15359_v8 = vld [vmem:[#allocation5_spill] sm:$0xff]  ;;  %9459 = vmatmul.mubr.msk.f32.vlgmr.msra.gmra.mrb[0].mxu1 %vm573_vm1, %v495_v38 }
 0x14e   : > { %9753 = vmatprep.mubr.msk.f32.mxu0 %vm573_vm1, %v12472_v2  ;;  %9461 = vmatprep.mubr.msk.f32.mxu1 %vm573_vm1, %v12191_v63  ;;  %v15363_v63 = vld [vmem:[#allocation34_spill] sm:$0xff] }
 0x151   : > { %9754 = vmatmul.mubr.msk.f32.gmra.mrb[30].mxu0 %vm573_vm1, %v12480_v46  ;;  %9462 = vmatmul.mubr.msk.f32.gmra.mrb[2].mxu1 %vm573_vm1, %v12200_v42  ;;  %v15386_v42 = vld [vmem:[#allocation21_spill] sm:$0xff] }
 0x152   : > { %9758 = vmatprep.mubr.msk.f32.mxu0 %vm573_vm1, %v15359_v8  ;;  %v15361_v8 = vld [vmem:[#allocation7_spill] sm:$0xff]  ;;  %9464 = vmatprep.mubr.msk.f32.mxu1 %vm573_vm1, %v12204_v1 }
 0x155   : > { %9759 = vmatmul.mubr.msk.f32.vlgmr.msra.gmra.mrb[0].mxu0 %vm573_vm1, %v15360_v4  ;;  %9465 = vmatmul.mubr.msk.f32.gmra.mrb[4].mxu1 %vm573_vm1, %v12219_v48 }
 0x156   : > { %9807 = vmatpush3.msk.msra.mxu0 %vm638_vm0, %v8348_v7  ;;  %9761 = vmatprep.mubr.msk.f32.mxu0 %vm573_vm1, %v11723_v9  ;;  %v15362_v9 = vld [vmem:[#allocation33_spill] sm:$0xff] }
 0x157   : > { %9856 = vmatprep.subr.msk.mxu0 %vm638_vm0, %v12499_v45  ;;  %9467 = vmatprep.mubr.msk.f32.mxu1 %vm573_vm1, %v15362_v9 }
 0x159   : > { %9762 = vmatmul.mubr.msk.f32.gmra.mrb[2].mxu0 %vm573_vm1, %v15361_v8  ;;  %9468 = vmatmul.mubr.msk.f32.gmra.mrb[6].mxu1 %vm573_vm1, %v12234_v3 }
 0x15a   : > { %9764 = vmatprep.mubr.msk.f32.mxu0 %vm573_vm1, %v11733_v11  ;;  %9470 = vmatprep.mubr.msk.f32.mxu1 %vm573_vm1, %v15363_v63  ;;  %v15364_v11 = vld [vmem:[#allocation35_spill] sm:$0xff] }
 0x15d   : > { %9765 = vmatmul.mubr.msk.f32.gmra.mrb[4].mxu0 %vm573_vm1, %v11740_v12  ;;  %9471 = vmatmul.mubr.msk.f32.gmra.mrb[8].mxu1 %vm573_vm1, %v12247_v40  ;;  %v15365_v12 = vld [vmem:[#allocation36_spill] sm:$0xff] }
 0x15e   : > { %9767 = vmatprep.mubr.msk.f32.mxu0 %vm573_vm1, %v11743_v13  ;;  %9473 = vmatprep.mubr.msk.f32.mxu1 %vm573_vm1, %v15364_v11  ;;  %v15366_v13 = vld [vmem:[#allocation37_spill] sm:$0xff] }
 0x161   : > { %9768 = vmatmul.mubr.msk.f32.gmra.mrb[6].mxu0 %vm573_vm1, %v11750_v14  ;;  %9474 = vmatmul.mubr.msk.f32.gmra.mrb[10].mxu1 %vm573_vm1, %v12260_v51  ;;  %v15367_v14 = vld [vmem:[#allocation38_spill] sm:$0xff] }
 0x162   : > { %9770 = vmatprep.mubr.msk.f32.mxu0 %vm573_vm1, %v11753_v15  ;;  %9476 = vmatprep.mubr.msk.f32.mxu1 %vm573_vm1, %v15365_v12  ;;  %v15368_v15 = vld [vmem:[#allocation39_spill] sm:$0xff] }
 0x165   : > { %9771 = vmatmul.mubr.msk.f32.gmra.mrb[8].mxu0 %vm573_vm1, %v11760_v16  ;;  %9477 = vmatmul.mubr.msk.f32.gmra.mrb[12].mxu1 %vm573_vm1, %v12273_v61  ;;  %v15369_v16 = vld [vmem:[#allocation40_spill] sm:$0xff] }
 0x166   : > { %9773 = vmatprep.mubr.msk.f32.mxu0 %vm573_vm1, %v11763_v17  ;;  %9479 = vmatprep.mubr.msk.f32.mxu1 %vm573_vm1, %v15366_v13  ;;  %v15370_v17 = vld [vmem:[#allocation41_spill] sm:$0xff] }
 0x169   : > { %9774 = vmatmul.mubr.msk.f32.gmra.mrb[10].mxu0 %vm573_vm1, %v11770_v18  ;;  %9480 = vmatmul.mubr.msk.f32.gmra.mrb[14].mxu1 %vm573_vm1, %v12286_v33  ;;  %v15371_v18 = vld [vmem:[#allocation42_spill] sm:$0xff] }
 0x16a   : > { %9776 = vmatprep.mubr.msk.f32.mxu0 %vm573_vm1, %v11773_v19  ;;  %9482 = vmatprep.mubr.msk.f32.mxu1 %vm573_vm1, %v15367_v14  ;;  %v15372_v19 = vld [vmem:[#allocation43_spill] sm:$0xff] }
 0x16d   : > { %9777 = vmatmul.mubr.msk.f32.gmra.mrb[12].mxu0 %vm573_vm1, %v11780_v20  ;;  %9483 = vmatmul.mubr.msk.f32.gmra.mrb[16].mxu1 %vm573_vm1, %v12299_v43  ;;  %v15373_v20 = vld [vmem:[#allocation8_spill] sm:$0xff] }
 0x16e   : > { %9779 = vmatprep.mubr.msk.f32.mxu0 %vm573_vm1, %v11783_v21  ;;  %9485 = vmatprep.mubr.msk.f32.mxu1 %vm573_vm1, %v15368_v15  ;;  %v15374_v21 = vld [vmem:[#allocation44_spill] sm:$0xff] }
 0x171   : > { %9780 = vmatmul.mubr.msk.f32.gmra.mrb[14].mxu0 %vm573_vm1, %v11790_v22  ;;  %9486 = vmatmul.mubr.msk.f32.gmra.mrb[18].mxu1 %vm573_vm1, %v12312_v54  ;;  %v12616_v22 = vld [vmem:[%s11684_s26 + $0x198] sm:$0xff] }
 0x172   : > { %9782 = vmatprep.mubr.msk.f32.mxu0 %vm573_vm1, %v11793_v23  ;;  %9488 = vmatprep.mubr.msk.f32.mxu1 %vm573_vm1, %v15369_v16  ;;  %v12627_v23 = vld [vmem:[%s11684_s26 + $0x1a0] sm:$0xff] }
 0x175   : > { %9783 = vmatmul.mubr.msk.f32.gmra.mrb[16].mxu0 %vm573_vm1, %v11800_v24  ;;  %9489 = vmatmul.mubr.msk.f32.gmra.mrb[20].mxu1 %vm573_vm1, %v12325_v5  ;;  %v8418_v24 = vld [vmem:[%s15107_s4 + $0x4] sm:$0xf] }
 0x176   : > { %9785 = vmatprep.mubr.msk.f32.mxu0 %vm573_vm1, %v11803_v25  ;;  %9491 = vmatprep.mubr.msk.f32.mxu1 %vm573_vm1, %v15370_v17  ;;  %v2646_v25 = vrot.slane %v12616_v22, 1 }
 0x177   : > { %9906 = vmatprep.subr.msk.mxu1 %vm3956_vm4, %v8418_v24 }
 0x178   : > { %9907 = vmatpush3.msk.msra.mxu1 %vm3956_vm4, %v8418_v24 }
 0x179   : > { %9786 = vmatmul.mubr.msk.f32.gmra.mrb[18].mxu0 %vm573_vm1, %v11810_v26  ;;  %9492 = vmatmul.mubr.msk.f32.gmra.mrb[22].mxu1 %vm573_vm1, %v12338_v36  ;;  %v2647_v26 = vrot.slane %v12627_v23, 1 }
 0x17a   : > { %9788 = vmatprep.mubr.msk.f32.mxu0 %vm573_vm1, %v11813_v27  ;;  %9494 = vmatprep.mubr.msk.f32.mxu1 %vm573_vm1, %v15371_v18  ;;  %v440_v27 = vld [vmem:[%s11684_s26 + $0x1a8] sm:$0x3]  ;;  %s8795_s26 = sshll.u32 %s15571_s18, 8 }
 0x17b   : > { %s14883_s28 = scalar_lea.vmem %s15114_s11, %s8795_s26 }
 0x17d   : > { %9789 = vmatmul.mubr.msk.f32.gmra.mrb[20].mxu0 %vm573_vm1, %v11820_v28  ;;  %9495 = vmatmul.mubr.msk.f32.gmra.mrb[24].mxu1 %vm573_vm1, %v12351_v60  ;;  %v2649_v28 = vrot.slane %v440_v27, 1 }
 0x17e   : > { %9791 = vmatprep.mubr.msk.f32.mxu0 %vm573_vm1, %v11823_v29  ;;  %9497 = vmatprep.mubr.msk.f32.mxu1 %vm573_vm1, %v15372_v19  ;;  %v2648_v29 = vsel %vm490_vm3, %v2646_v25, %v2647_v26 }
 0x181   : > { %9792 = vmatmul.mubr.msk.f32.gmra.mrb[22].mxu0 %vm573_vm1, %v11830_v30  ;;  %9498 = vmatmul.mubr.msk.f32.gmra.mrb[26].mxu1 %vm573_vm1, %v12364_v57  ;;  %v2650_v30 = vsel %vm490_vm3, %v2647_v26, %v2649_v28 }
 0x182   : > { %9794 = vmatprep.mubr.msk.f32.mxu0 %vm573_vm1, %v11833_v31  ;;  %9500 = vmatprep.mubr.msk.f32.mxu1 %vm573_vm1, %v15374_v21  ;;  %v15375_v31 = vld [vmem:[#allocation10_spill] sm:$0xff] }
 0x185   : > { %9795 = vmatmul.mubr.msk.f32.gmra.mrb[24].mxu0 %vm573_vm1, %v11840_v32  ;;  %9501 = vmatmul.mubr.msk.f32.gmra.mrb[28].mxu1 %vm573_vm1, %v12377_v47  ;;  %v15376_v32 = vld [vmem:[#allocation11_spill] sm:$0xff] }
 0x186   : > { %9797 = vmatprep.mubr.msk.f32.mxu0 %vm573_vm1, %v15373_v20  ;;  %9503 = vmatprep.mubr.msk.f32.mxu1 %vm573_vm1, %v12383_v55 }
 0x189   : > { %9798 = vmatmul.mubr.msk.f32.gmra.mrb[26].mxu0 %vm573_vm1, %v11855_v37  ;;  %9504 = vmatmul.mubr.msk.f32.gmra.mrb[30].mxu1 %vm573_vm1, %v12391_v44  ;;  %v15377_v37 = vld [vmem:[#allocation12_spill] sm:$0xff] }
 0x18a   : > { %9800 = vmatprep.mubr.msk.f32.mxu0 %vm573_vm1, %v12180_v41  ;;  %v15384_v41 = vld [vmem:[#allocation19_spill] sm:$0xff] }
 0x18d   : > { %9801 = vmatmul.mubr.msk.f32.gmra.mrb[28].mxu0 %vm573_vm1, %v12188_v59  ;;  %v15385_v59 = vld [vmem:[#allocation20_spill] sm:$0xff] }
 0x18e   : > { %9803 = vmatprep.mubr.msk.f32.mxu0 %vm573_vm1, %v12616_v22 }
 0x191   : > { %9804 = vmatmul.mubr.msk.f32.gmra.mrb[30].mxu0 %vm573_vm1, %v12627_v23 }
 0x192   : > { %9808 = vmatprep.mubr.msk.f32.mxu0 %vm573_vm1, %v12204_v1  ;;  %v15383_v1 = vld [vmem:[#allocation18_spill] sm:$0xff] }
 0x195   : > { %9809 = vmatmul.mubr.msk.f32.vlgmr.msra.gmra.mrb[0].mxu0 %vm573_vm1, %v12219_v48  ;;  %v15387_v48 = vld [vmem:[#allocation22_spill] sm:$0xff] }
 0x196   : > { %9857 = vmatpush3.msk.msra.mxu0 %vm638_vm0, %v12499_v45  ;;  %9811 = vmatprep.mubr.msk.f32.mxu0 %vm573_vm1, %v15362_v9 }
 0x199   : > { %9812 = vmatmul.mubr.msk.f32.gmra.mrb[2].mxu0 %vm573_vm1, %v12234_v3  ;;  %v15389_v3 = vld [vmem:[#allocation24_spill] sm:$0xff] }
 0x19a   : > { %9814 = vmatprep.mubr.msk.f32.mxu0 %vm573_vm1, %v15363_v63 }
 0x19d   : > { %9815 = vmatmul.mubr.msk.f32.gmra.mrb[4].mxu0 %vm573_vm1, %v12247_v40  ;;  %v15388_v40 = vld [vmem:[#allocation23_spill] sm:$0xff] }
 0x19e   : > { %9817 = vmatprep.mubr.msk.f32.mxu0 %vm573_vm1, %v15364_v11 }
 0x1a1   : > { %9818 = vmatmul.mubr.msk.f32.gmra.mrb[6].mxu0 %vm573_vm1, %v12260_v51  ;;  %v15390_v51 = vld [vmem:[#allocation25_spill] sm:$0xff] }
 0x1a2   : > { %9820 = vmatprep.mubr.msk.f32.mxu0 %vm573_vm1, %v15365_v12 }
 0x1a5   : > { %9821 = vmatmul.mubr.msk.f32.gmra.mrb[8].mxu0 %vm573_vm1, %v12273_v61  ;;  %v15391_v61 = vld [vmem:[#allocation26_spill] sm:$0xff] }
 0x1a6   : > { %9823 = vmatprep.mubr.msk.f32.mxu0 %vm573_vm1, %v15366_v13  ;;  %v11600_v13 = vmov 0.0  }
 0x1a7   : > { %3624 = vst.msk [vmem:[#allocation2 + $0x20] sm:$0xff] %vm3618_vm5, %v11600_v13  ;;  %3619 = vst.msk [vmem:[#allocation2] sm:$0xff] %vm3618_vm5, %v11600_v13 }
 0x1a8   : > { %3620 = vst.msk [vmem:[#allocation2 + $0x8] sm:$0xff] %vm3618_vm5, %v11600_v13  ;;  %3623 = vst.msk [vmem:[#allocation2 + $0x18] sm:$0xff] %vm3618_vm5, %v11600_v13 }
 0x1a9   : > { %9824 = vmatmul.mubr.msk.f32.gmra.mrb[10].mxu0 %vm573_vm1, %v12286_v33  ;;  %v15392_v33 = vld [vmem:[#allocation27_spill] sm:$0xff]  ;;  %3626 = vst.msk [vmem:[#allocation2 + $0x30] sm:$0xff] %vm3618_vm5, %v11600_v13  ;;  %3627 = vst.msk [vmem:[#allocation2 + $0x38] sm:$0xff] %vm3618_vm5, %v11600_v13 }
 0x1aa   : > { %9826 = vmatprep.mubr.msk.f32.mxu0 %vm573_vm1, %v15367_v14  ;;  %3629 = vst.msk [vmem:[#allocation2 + $0x48] sm:$0xff] %vm3618_vm5, %v11600_v13  ;;  %3630 = vst.msk [vmem:[#allocation2 + $0x50] sm:$0xff] %vm3618_vm5, %v11600_v13 }
 0x1ab   : > { %3632 = vst.msk [vmem:[#allocation2 + $0x60] sm:$0xff] %vm3618_vm5, %v11600_v13  ;;  %3633 = vst.msk [vmem:[#allocation2 + $0x68] sm:$0xff] %vm3618_vm5, %v11600_v13 }
 0x1ac   : > { %3635 = vst.msk [vmem:[#allocation2 + $0x78] sm:$0xff] %vm3618_vm5, %v11600_v13  ;;  %3636 = vst.msk [vmem:[#allocation2 + $0x80] sm:$0xff] %vm3618_vm5, %v11600_v13 }
 0x1ad   : > { %9827 = vmatmul.mubr.msk.f32.gmra.mrb[12].mxu0 %vm573_vm1, %v12299_v43  ;;  %v15393_v43 = vld [vmem:[#allocation28_spill] sm:$0xff]  ;;  %3638 = vst.msk [vmem:[#allocation2 + $0x90] sm:$0xff] %vm3618_vm5, %v11600_v13  ;;  %3639 = vst.msk [vmem:[#allocation2 + $0x98] sm:$0xff] %vm3618_vm5, %v11600_v13 }
 0x1ae   : > { %9829 = vmatprep.mubr.msk.f32.mxu0 %vm573_vm1, %v15368_v15  ;;  %3641 = vst.msk [vmem:[#allocation2 + $0xa8] sm:$0xff] %vm3618_vm5, %v11600_v13  ;;  %3642 = vst.msk [vmem:[#allocation2 + $0xb0] sm:$0xff] %vm3618_vm5, %v11600_v13 }
 0x1af   : > { %3644 = vst.msk [vmem:[#allocation2 + $0xc0] sm:$0xff] %vm3618_vm5, %v11600_v13  ;;  %3645 = vst.msk [vmem:[#allocation2 + $0xc8] sm:$0xff] %vm3618_vm5, %v11600_v13  ;;  %v3708_v28 = vld [vmem:[#allocation2 + $0x8] sm:$0xff] }
 0x1b0   : > { %3647 = vst.msk [vmem:[#allocation2 + $0xd8] sm:$0xff] %vm3618_vm5, %v11600_v13  ;;  %3648 = vst.msk [vmem:[#allocation2 + $0xe0] sm:$0xff] %vm3618_vm5, %v11600_v13 }
 0x1b1   : > { %9830 = vmatmul.mubr.msk.f32.gmra.mrb[14].mxu0 %vm573_vm1, %v12312_v54  ;;  %v15394_v54 = vld [vmem:[#allocation29_spill] sm:$0xff]  ;;  %3650 = vst.msk [vmem:[#allocation2 + $0xf0] sm:$0xff] %vm3618_vm5, %v11600_v13  ;;  %3651 = vst.msk [vmem:[#allocation2 + $0xf8] sm:$0xff] %vm3618_vm5, %v11600_v13 }
 0x1b2   : > { %9832 = vmatprep.mubr.msk.f32.mxu0 %vm573_vm1, %v15369_v16  ;;  %3653 = vst.msk [vmem:[#allocation2 + $0x108] sm:$0xff] %vm3618_vm5, %v11600_v13  ;;  %3654 = vst.msk [vmem:[#allocation2 + $0x110] sm:$0xff] %vm3618_vm5, %v11600_v13 }
 0x1b3   : > { %3656 = vst.msk [vmem:[#allocation2 + $0x120] sm:$0xff] %vm3618_vm5, %v11600_v13  ;;  %3657 = vst.msk [vmem:[#allocation2 + $0x128] sm:$0xff] %vm3618_vm5, %v11600_v13 }
 0x1b4   : > { %3659 = vst.msk [vmem:[#allocation2 + $0x138] sm:$0xff] %vm3618_vm5, %v11600_v13  ;;  %3660 = vst.msk [vmem:[#allocation2 + $0x140] sm:$0xff] %vm3618_vm5, %v11600_v13 }
 0x1b5   : > { %9833 = vmatmul.mubr.msk.f32.gmra.mrb[16].mxu0 %vm573_vm1, %v12325_v5  ;;  %v15395_v5 = vld [vmem:[#allocation30_spill] sm:$0xff]  ;;  %3662 = vst.msk [vmem:[#allocation2 + $0x150] sm:$0xff] %vm3618_vm5, %v11600_v13  ;;  %3663 = vst.msk [vmem:[#allocation2 + $0x158] sm:$0xff] %vm3618_vm5, %v11600_v13 }
 0x1b6   : > { %9835 = vmatprep.mubr.msk.f32.mxu0 %vm573_vm1, %v15370_v17  ;;  %3665 = vst.msk [vmem:[#allocation2 + $0x168] sm:$0xff] %vm3618_vm5, %v11600_v13  ;;  %3666 = vst.msk [vmem:[#allocation2 + $0x170] sm:$0xff] %vm3618_vm5, %v11600_v13 }
 0x1b7   : > { %3668 = vst.msk [vmem:[#allocation2 + $0x180] sm:$0xff] %vm3618_vm5, %v11600_v13  ;;  %3669 = vst.msk [vmem:[#allocation2 + $0x188] sm:$0xff] %vm3618_vm5, %v11600_v13 }
 0x1b8   : > { %3671 = vst.msk [vmem:[#allocation2 + $0x198] sm:$0xff] %vm3618_vm5, %v11600_v13  ;;  %3672 = vst.msk [vmem:[#allocation2 + $0x1a0] sm:$0xff] %vm3618_vm5, %v11600_v13 }
 0x1b9   : > { %9836 = vmatmul.mubr.msk.f32.gmra.mrb[18].mxu0 %vm573_vm1, %v12338_v36  ;;  %v15396_v36 = vld [vmem:[#allocation31_spill] sm:$0xff]  ;;  %3625 = vst.msk [vmem:[#allocation2 + $0x28] sm:$0x3] %vm3621_vm6, %v11600_v13  ;;  %3622 = vst.msk [vmem:[#allocation2 + $0x10] sm:$0x3] %vm3621_vm6, %v11600_v13 }
 0x1ba   : > { %9838 = vmatprep.mubr.msk.f32.mxu0 %vm573_vm1, %v15371_v18  ;;  %3628 = vst.msk [vmem:[#allocation2 + $0x40] sm:$0x3] %vm3621_vm6, %v11600_v13  ;;  %3631 = vst.msk [vmem:[#allocation2 + $0x58] sm:$0x3] %vm3621_vm6, %v11600_v13 }
 0x1bb   : > { %3634 = vst.msk [vmem:[#allocation2 + $0x70] sm:$0x3] %vm3621_vm6, %v11600_v13  ;;  %3637 = vst.msk [vmem:[#allocation2 + $0x88] sm:$0x3] %vm3621_vm6, %v11600_v13 }
 0x1bc   : > { %3640 = vst.msk [vmem:[#allocation2 + $0xa0] sm:$0x3] %vm3621_vm6, %v11600_v13  ;;  %3643 = vst.msk [vmem:[#allocation2 + $0xb8] sm:$0x3] %vm3621_vm6, %v11600_v13 }
 0x1bd   : > { %9839 = vmatmul.mubr.msk.f32.gmra.mrb[20].mxu0 %vm573_vm1, %v12351_v60  ;;  %v2917_v60 = vrot.slane %v12616_v22, 2  ;;  %3646 = vst.msk [vmem:[#allocation2 + $0xd0] sm:$0x3] %vm3621_vm6, %v11600_v13  ;;  %3649 = vst.msk [vmem:[#allocation2 + $0xe8] sm:$0x3] %vm3621_vm6, %v11600_v13 }
 0x1be   : > { %9841 = vmatprep.mubr.msk.f32.mxu0 %vm573_vm1, %v15372_v19  ;;  %3652 = vst.msk [vmem:[#allocation2 + $0x100] sm:$0x3] %vm3621_vm6, %v11600_v13  ;;  %3655 = vst.msk [vmem:[#allocation2 + $0x118] sm:$0x3] %vm3621_vm6, %v11600_v13 }
 0x1bf   : > { %3658 = vst.msk [vmem:[#allocation2 + $0x130] sm:$0x3] %vm3621_vm6, %v11600_v13  ;;  %3661 = vst.msk [vmem:[#allocation2 + $0x148] sm:$0x3] %vm3621_vm6, %v11600_v13 }
 0x1c0   : > { %3664 = vst.msk [vmem:[#allocation2 + $0x160] sm:$0x3] %vm3621_vm6, %v11600_v13  ;;  %3667 = vst.msk [vmem:[#allocation2 + $0x178] sm:$0x3] %vm3621_vm6, %v11600_v13 }
 0x1c1   : > { %9842 = vmatmul.mubr.msk.f32.gmra.mrb[22].mxu0 %vm573_vm1, %v12364_v57  ;;  %v2918_v57 = vrot.slane %v12627_v23, 2  ;;  %3670 = vst.msk [vmem:[#allocation2 + $0x190] sm:$0x3] %vm3621_vm6, %v11600_v13  ;;  %3673 = vst.msk [vmem:[#allocation2 + $0x1a8] sm:$0x3] %vm3621_vm6, %v11600_v13 }
 0x1c2   : > { %9844 = vmatprep.mubr.msk.f32.mxu0 %vm573_vm1, %v15374_v21 }
 0x1c5   : > { %9845 = vmatmul.mubr.msk.f32.gmra.mrb[24].mxu0 %vm573_vm1, %v12377_v47  ;;  %v15397_v47 = vld [vmem:[#allocation32_spill] sm:$0xff] }
 0x1c6   : > { %9847 = vmatprep.mubr.msk.f32.mxu0 %vm573_vm1, %v12383_v55  ;;  %v2919_v55 = vsel %vm1159_vm2, %v2917_v60, %v2918_v57 }
 0x1c9   : > { %9848 = vmatmul.mubr.msk.f32.gmra.mrb[26].mxu0 %vm573_vm1, %v12391_v44  ;;  %v2920_v44 = vrot.slane %v440_v27, 2  ;;  %v3707_v27 = vld [vmem:[#allocation2] sm:$0xff] }
 0x1ca   : > { %9850 = vmatprep.mubr.msk.f32.mxu0 %vm573_vm1, %v12394_v34 }
 0x1cb   : > { %v2921_v34 = vsel %vm1159_vm2, %v2918_v57, %v2920_v44 }
 0x1cd   : > { %9851 = vmatmul.mubr.msk.f32.gmra.mrb[28].mxu0 %vm573_vm1, %v12401_v49 }
 0x1ce   : > { %9853 = vmatprep.mubr.msk.f32.mxu0 %vm573_vm1, %v2648_v29  ;;  %v3810_v29 = vrot.slane %v3707_v27, 1 }
 0x1d1   : > { %9854 = vmatmul.mubr.msk.f32.gmra.mrb[30].mxu0 %vm573_vm1, %v2650_v30  ;;  %v3811_v30 = vrot.slane %v3708_v28, 1 }
 0x1d2   : > { %9858 = vmatprep.mubr.msk.f32.mxu0 %vm573_vm1, %v11892_v52  ;;  %v15378_v52 = vld [vmem:[#allocation13_spill] sm:$0xff] }
 0x1d5   : > { %9859 = vmatmul.mubr.msk.f32.vlgmr.msra.gmra.mrb[0].mxu0 %vm573_vm1, %v11906_v56  ;;  %v15379_v56 = vld [vmem:[#allocation14_spill] sm:$0xff] }
 0x1d6   : > { %9861 = vmatprep.mubr.msk.f32.mxu0 %vm573_vm1, %v11910_v58  ;;  %v15380_v58 = vld [vmem:[#allocation15_spill] sm:$0xff] }
 0x1d9   : > { %9862 = vmatmul.mubr.msk.f32.gmra.mrb[2].mxu0 %vm573_vm1, %v11922_v62  ;;  %v15381_v62 = vld [vmem:[#allocation16_spill] sm:$0xff] }
 0x1da   : > { %9864 = vmatprep.mubr.msk.f32.mxu0 %vm573_vm1, %v11926_v0  ;;  %v15382_v0 = vld [vmem:[#allocation17_spill] sm:$0xff] }
 0x1dd   : > { %9865 = vmatmul.mubr.msk.f32.gmra.mrb[4].mxu0 %vm573_vm1, %v15375_v31  ;;  %v3709_v31 = vld [vmem:[#allocation2 + $0x10] sm:$0x3] }
 0x1de   : > { %9867 = vmatprep.mubr.msk.f32.mxu0 %vm573_vm1, %v15376_v32 }
 0x1e1   : > { %9868 = vmatmul.mubr.msk.f32.gmra.mrb[6].mxu0 %vm573_vm1, %v15377_v37  ;;  %v3813_v37 = vrot.slane %v3709_v31, 1 }
 0x1e2   : > { %9870 = vmatprep.mubr.msk.f32.mxu0 %vm573_vm1, %v15378_v52  ;;  %v3812_v52 = vsel %vm490_vm3, %v3810_v29, %v3811_v30 }
 0x1e3   : > { %9908 = vmatprep.mubr.msk.f32.mxu1 %vm3618_vm5, %v3812_v52 }
 0x1e5   : > { %9871 = vmatmul.mubr.msk.f32.gmra.mrb[8].mxu0 %vm573_vm1, %v15379_v56  ;;  %v3814_v56 = vsel %vm490_vm3, %v3811_v30, %v3813_v37 }
 0x1e6   : > { %9873 = vmatprep.mubr.msk.f32.mxu0 %vm573_vm1, %v15380_v58  ;;  %9909 = vmatmul.mubr.msk.f32.vlgmr.msra.gmra.mrb[32].mxu1 %vm3618_vm5, %v3814_v56 }
 0x1e9   : > { %9874 = vmatmul.mubr.msk.f32.gmra.mrb[10].mxu0 %vm573_vm1, %v15381_v62  ;;  %v12898_v62 = vld [vmem:[%s15105_s2] ss:$0 sm:$0xff] }
 0x1ea   : > { %9876 = vmatprep.mubr.msk.f32.mxu0 %vm573_vm1, %v15382_v0 }
 0x1ed   : > { %9877 = vmatmul.mubr.msk.f32.gmra.mrb[12].mxu0 %vm573_vm1, %v15383_v1 }
 0x1ee   : > { %9879 = vmatprep.mubr.msk.f32.mxu0 %vm573_vm1, %v15384_v41  ;;  %v12904_v41 = vld [vmem:[%s15106_s3] ss:$0 sm:$0xff] }
 0x1f1   : > { %9880 = vmatmul.mubr.msk.f32.gmra.mrb[14].mxu0 %vm573_vm1, %v15385_v59 }
 0x1f2   : > { %9882 = vmatprep.mubr.msk.f32.mxu0 %vm573_vm1, %v15386_v42 }
 0x1f5   : > { %9883 = vmatmul.mubr.msk.f32.gmra.mrb[16].mxu0 %vm573_vm1, %v15387_v48 }
 0x1f6   : > { %9885 = vmatprep.mubr.msk.f32.mxu0 %vm573_vm1, %v15388_v40 }
 0x1f9   : > { %9886 = vmatmul.mubr.msk.f32.gmra.mrb[18].mxu0 %vm573_vm1, %v15389_v3 }
 0x1fa   : > { %9888 = vmatprep.mubr.msk.f32.mxu0 %vm573_vm1, %v15390_v51 }
 0x1fd   : > { %9889 = vmatmul.mubr.msk.f32.gmra.mrb[20].mxu0 %vm573_vm1, %v15391_v61 }
 0x1fe   : > { %9891 = vmatprep.mubr.msk.f32.mxu0 %vm573_vm1, %v15392_v33 }
 0x201   : > { %9892 = vmatmul.mubr.msk.f32.gmra.mrb[22].mxu0 %vm573_vm1, %v15393_v43 }
 0x202   : > { %9894 = vmatprep.mubr.msk.f32.mxu0 %vm573_vm1, %v15394_v54 }
 0x205   : > { %9895 = vmatmul.mubr.msk.f32.gmra.mrb[24].mxu0 %vm573_vm1, %v15395_v5 }
 0x206   : > { %9897 = vmatprep.mubr.msk.f32.mxu0 %vm573_vm1, %v15396_v36 }
 0x209   : > { %9898 = vmatmul.mubr.msk.f32.gmra.mrb[26].mxu0 %vm573_vm1, %v15397_v47 }
 0x20a   : > { %9900 = vmatprep.mubr.msk.f32.mxu0 %vm573_vm1, %v12472_v2 }
 0x20d   : > { %9901 = vmatmul.mubr.msk.f32.gmra.mrb[28].mxu0 %vm573_vm1, %v12480_v46 }
 0x20e   : > { %9903 = vmatprep.mubr.msk.f32.mxu0 %vm573_vm1, %v2919_v55 }
 0x211   : > { %9904 = vmatmul.mubr.msk.f32.gmra.mrb[30].mxu0 %vm573_vm1, %v2921_v34 }
 0x220   : > { %v12773_v49 = vpop.f32.mrb[0].mxu1 }
 0x221   : > { %v12775_v7 = vpop.f32.mrb[1].mxu1 }
 0x224   : > { %v12777_v50 = vpop.f32.mrb[2].mxu1 }
 0x225   : > { %v12779_v10 = vpop.f32.mrb[3].mxu1 }
 0x228   : > { %v12781_v2 = vpop.f32.mrb[4].mxu1 }
 0x229   : > { %v12783_v6 = vpop.f32.mrb[5].mxu1 }
 0x22c   : > { %v12785_v35 = vpop.f32.mrb[6].mxu1 }
 0x22d   : > { %v12787_v46 = vpop.f32.mrb[7].mxu1 }
 0x230   : > { %v12789_v39 = vpop.f32.mrb[8].mxu1 }
 0x231   : > { %v12791_v53 = vpop.f32.mrb[9].mxu1 }
 0x234   : > { %v12793_v38 = vpop.f32.mrb[10].mxu1 }
 0x235   : > { %v12795_v45 = vpop.f32.mrb[11].mxu1 }
 0x238   : > { %v12797_v4 = vpop.f32.mrb[12].mxu1 }
 0x239   : > { %v12799_v8 = vpop.f32.mrb[13].mxu1 }
 0x23c   : > { %v12801_v9 = vpop.f32.mrb[14].mxu1 }
 0x23d   : > { %v12803_v63 = vpop.f32.mrb[15].mxu1 }
 0x240   : > { %v12805_v11 = vpop.f32.mrb[16].mxu1 }
 0x241   : > { %v12807_v12 = vpop.f32.mrb[17].mxu1 }
 0x244   : > { %v12863_v14 = vpop.f32.mrb[18].mxu1 }
 0x245   : > { %v12865_v15 = vpop.f32.mrb[19].mxu1 }
 0x248   : > { %v12867_v16 = vpop.f32.mrb[20].mxu1 }
 0x249   : > { %v12869_v17 = vpop.f32.mrb[21].mxu1 }
 0x24c   : > { %v12871_v18 = vpop.f32.mrb[22].mxu1 }
 0x24d   : > { %v12873_v19 = vpop.f32.mrb[23].mxu1 }
 0x250   : > { %v12875_v20 = vpop.f32.mrb[24].mxu1 }
 0x251   : > { %v12877_v21 = vpop.f32.mrb[25].mxu1 }
 0x254   : > { %v12879_v22 = vpop.f32.mrb[26].mxu1 }
 0x255   : > { %v12881_v23 = vpop.f32.mrb[27].mxu1 }
 0x258   : > { %v12883_v24 = vpop.f32.mrb[28].mxu1 }
 0x259   : > { %v12885_v25 = vpop.f32.mrb[29].mxu1 }
 0x25c   : > { %v12887_v26 = vpop.f32.mrb[30].mxu1 }
 0x25d   : > { %v12889_v32 = vpop.f32.mrb[31].mxu1 }
 0x2a8   : > { %v9860_v58 = vpop.f32.mrb[0].mxu0 }
 0x2a9   : > { %v10456_v0 = vadd.f32 %v9860_v58, %v12773_v49  ;;  %v2997_v1 = vpop.f32.mrb[1].mxu0 }
 0x2aa   : > { %v10457_v59 = vadd.f32 %v2997_v1, %v12775_v7 }
 0x2ab   : > { %v3196_v42 = vmul.f32 %v10456_v0, %v12898_v62 }
 0x2ac   : > { %v3195_v48 = vmul.f32 %v10457_v59, %v12898_v62  ;;  %v9863_v40 = vpop.f32.mrb[2].mxu0 }
 0x2ad   : > { %v12910_v3 = vadd.f32 %v12904_v41, %v3196_v42  ;;  %v10458_v51 = vadd.f32 %v9863_v40, %v12777_v50  ;;  %v3007_v61 = vpop.f32.mrb[3].mxu0 }
 0x2ae   : > { %v12914_v33 = vadd.f32 %v12904_v41, %v3195_v48  ;;  %v10459_v43 = vadd.f32 %v3007_v61, %v12779_v10 }
 0x2af   : > { %v3299_v54 = vand.u32 2147483647, %v12910_v3  ;;  %v3198_v5 = vmul.f32 %v10458_v51, %v12898_v62 }
 0x2b0   : > { %v3298_v36 = vand.u32 2147483647, %v12914_v33  ;;  %v3197_v60 = vmul.f32 %v10459_v43, %v12898_v62  ;;  %v9866_v57 = vpop.f32.mrb[4].mxu0 }
 0x2b1   : > { %v3331_v47 = vsub.f32 0.0, %v3299_v54  ;;  %v12922_v44 = vadd.f32 %v12904_v41, %v3198_v5  ;;  %v10460_v55 = vadd.f32 %v9866_v57, %v12781_v2  ;;  %v3017_v34 = vpop.f32.mrb[5].mxu0 }
 0x2b2   : > { %v3330_v49 = vsub.f32 0.0, %v3298_v36  ;;  %v12926_v7 = vadd.f32 %v12904_v41, %v3197_v60  ;;  %v10461_v50 = vadd.f32 %v3017_v34, %v12783_v6  ;;  %v3267_v34 = vmax.f32 %v12910_v3, 0.0 }
 0x2b3   : > { %v3364_v10 = vmul.f32 1.442695, %v3331_v47  ;;  %v3301_v13 = vand.u32 2147483647, %v12922_v44  ;;  %v3200_v27 = vmul.f32 %v10460_v55, %v12898_v62 }
 0x2b4   : > { %v3362_v28 = vmul.f32 1.442695, %v3330_v49  ;;  %v3300_v29 = vand.u32 2147483647, %v12926_v7  ;;  %v3199_v30 = vmul.f32 %v10461_v50, %v12898_v62  ;;  %v9869_v31 = vpop.f32.mrb[6].mxu0 }
 0x2b5   : > { %11010 = vpow2.f32 %v3364_v10  ;;  %v3333_v2 = vsub.f32 0.0, %v3301_v13  ;;  %v12934_v37 = vadd.f32 %v12904_v41, %v3200_v27  ;;  %v10462_v52 = vadd.f32 %v9869_v31, %v12785_v35  ;;  %v3027_v56 = vpop.f32.mrb[7].mxu0 }
 0x2b6   : > { %11012 = vpow2.f32 %v3362_v28  ;;  %v3332_v6 = vsub.f32 0.0, %v3300_v29  ;;  %v12938_v58 = vadd.f32 %v12904_v41, %v3199_v30  ;;  %v10463_v0 = vadd.f32 %v3027_v56, %v12787_v46 }
 0x2b7   : > { %v3368_v1 = vmul.f32 1.442695, %v3333_v2  ;;  %v3303_v59 = vand.u32 2147483647, %v12934_v37  ;;  %v3202_v42 = vmul.f32 %v10462_v52, %v12898_v62  ;;  %v3761_v2 = vld [vmem:[%s15107_s4] sm:$0xf] }
 0x2b8   : > { %v3366_v48 = vmul.f32 1.442695, %v3332_v6  ;;  %v3302_v40 = vand.u32 2147483647, %v12938_v58  ;;  %v3201_v51 = vmul.f32 %v10463_v0, %v12898_v62  ;;  %v9872_v61 = vpop.f32.mrb[8].mxu0  ;;  %v3266_v56 = vmax.f32 %v12914_v33, 0.0  ;;  %9956 = vmatprep.subr.msk.mxu1 %vm3956_vm4, %v3761_v2 }
 0x2b9   : > { %11014 = vpow2.f32 %v3368_v1  ;;  %v3335_v35 = vsub.f32 0.0, %v3303_v59  ;;  %v12946_v43 = vadd.f32 %v12904_v41, %v3202_v42  ;;  %v10464_v54 = vadd.f32 %v9872_v61, %v12789_v39  ;;  %v3037_v5 = vpop.f32.mrb[9].mxu0  ;;  %9957 = vmatpush3.msk.msra.mxu1 %vm3956_vm4, %v3761_v2 }
 0x2ba   : > { %11016 = vpow2.f32 %v3366_v48  ;;  %v3334_v46 = vsub.f32 0.0, %v3302_v40  ;;  %v12950_v36 = vadd.f32 %v12904_v41, %v3201_v51  ;;  %v10465_v60 = vadd.f32 %v3037_v5, %v12791_v53 }
 0x2bb   : > { %v3372_v57 = vmul.f32 1.442695, %v3335_v35  ;;  %v3305_v47 = vand.u32 2147483647, %v12946_v43  ;;  %v3204_v55 = vmul.f32 %v10464_v54, %v12898_v62  ;;  %v3269_v42 = vmax.f32 %v12922_v44, 0.0 }
 0x2bc   : > { %v3370_v49 = vmul.f32 1.442695, %v3334_v46  ;;  %v3304_v50 = vand.u32 2147483647, %v12950_v36  ;;  %v3203_v39 = vmul.f32 %v10465_v60, %v12898_v62  ;;  %v9875_v10 = vpop.f32.mrb[10].mxu0  ;;  %v3271_v2 = vmax.f32 %v12934_v37, 0.0 }
 0x2bd   : > { %11018 = vpow2.f32 %v3372_v57  ;;  %v3337_v13 = vsub.f32 0.0, %v3305_v47  ;;  %v12959_v27 = vadd.f32 %v12904_v41, %v3204_v55  ;;  %v10466_v53 = vadd.f32 %v9875_v10, %v12793_v38  ;;  %v3047_v28 = vpop.f32.mrb[11].mxu0 }
 0x2be   : > { %11020 = vpow2.f32 %v3370_v49  ;;  %v3336_v29 = vsub.f32 0.0, %v3304_v50  ;;  %v12963_v30 = vadd.f32 %v12904_v41, %v3203_v39  ;;  %v10467_v31 = vadd.f32 %v3047_v28, %v12795_v45 }
 0x2bf   : > { %v11011_v52 = vpop.eup %11010  ;;  %v3376_v6 = vmul.f32 1.442695, %v3337_v13  ;;  %v3307_v0 = vand.u32 2147483647, %v12959_v27  ;;  %v3206_v38 = vmul.f32 %v10466_v53, %v12898_v62  ;;  %v3268_v47 = vmax.f32 %v12926_v7, 0.0 }
 0x2c0   : > { %v11013_v1 = vpop.eup %11012  ;;  %v3427_v59 = vadd.f32 1.0, %v11011_v52  ;;  %v3374_v48 = vmul.f32 1.442695, %v3336_v29  ;;  %v3306_v45 = vand.u32 2147483647, %v12963_v30  ;;  %v9878_v35 = vpop.f32.mrb[12].mxu0  ;;  %v3205_v5 = vmul.f32 %v10467_v31, %v12898_v62 }
 0x2c1   : > { %v3426_v40 = vadd.f32 1.0, %v11013_v1  ;;  %11022 = vpow2.f32 %v3376_v6  ;;  %v3339_v51 = vsub.f32 0.0, %v3307_v0  ;;  %v12977_v61 = vadd.f32 %v12904_v41, %v3206_v38  ;;  %v3057_v60 = vpop.f32.mrb[13].mxu0 }
 0x2c2   : > { %11024 = vlog2.f32 %v3427_v59  ;;  %v3338_v54 = vsub.f32 0.0, %v3306_v45  ;;  %v10468_v46 = vadd.f32 %v9878_v35, %v12797_v4  ;;  %v12984_v13 = vadd.f32 %v12904_v41, %v3205_v5 }
 0x2c3   : > { %v11015_v57 = vpop.eup %11014  ;;  %11026 = vlog2.f32 %v3426_v40  ;;  %v3380_v55 = vmul.f32 1.442695, %v3339_v51  ;;  %v3309_v49 = vand.u32 2147483647, %v12977_v61  ;;  %v10469_v6 = vadd.f32 %v3057_v60, %v12799_v8 }
 0x2c4   : > { %v11017_v50 = vpop.eup %11016  ;;  %v3429_v39 = vadd.f32 1.0, %v11015_v57  ;;  %11028 = vpow2.f32 %v3374_v48  ;;  %v3378_v10 = vmul.f32 1.442695, %v3338_v54  ;;  %v9881_v53 = vpop.f32.mrb[14].mxu0  ;;  %v3208_v4 = vmul.f32 %v10468_v46, %v12898_v62 }
 0x2c5   : > { %v3428_v28 = vadd.f32 1.0, %v11017_v50  ;;  %11030 = vpow2.f32 %v3380_v55  ;;  %v3341_v29 = vsub.f32 0.0, %v3309_v49  ;;  %v3067_v31 = vpop.f32.mrb[15].mxu0  ;;  %v3308_v52 = vand.u32 2147483647, %v12984_v13 }
 0x2c6   : > { %11032 = vlog2.f32 %v3429_v39  ;;  %v12991_v1 = vadd.f32 %v12904_v41, %v3208_v4  ;;  %v10470_v59 = vadd.f32 %v9881_v53, %v12801_v9  ;;  %v3207_v51 = vmul.f32 %v10469_v6, %v12898_v62 }
 0x2c7   : > { %v11019_v0 = vpop.eup %11018  ;;  %11034 = vlog2.f32 %v3428_v28  ;;  %v3384_v38 = vmul.f32 1.442695, %v3341_v29  ;;  %v3340_v40 = vsub.f32 0.0, %v3308_v52  ;;  %v3270_v54 = vmax.f32 %v12938_v58, 0.0 }
 0x2c8   : > { %v11021_v48 = vpop.eup %11020  ;;  %v3431_v45 = vadd.f32 1.0, %v11019_v0  ;;  %11036 = vpow2.f32 %v3378_v10  ;;  %v9884_v35 = vpop.f32.mrb[16].mxu0  ;;  %v3311_v8 = vand.u32 2147483647, %v12991_v1  ;;  %v12998_v57 = vadd.f32 %v12904_v41, %v3207_v51 }
 0x2c9   : > { %v3430_v5 = vadd.f32 1.0, %v11021_v48  ;;  %11038 = vpow2.f32 %v3384_v38  ;;  %v3077_v46 = vpop.f32.mrb[17].mxu0  ;;  %v3382_v60 = vmul.f32 1.442695, %v3340_v40  ;;  %v3210_v9 = vmul.f32 %v10470_v59, %v12898_v62  ;;  %v8485_v40 = vld [vmem:[%s15107_s4 + $0x8] sm:$0xf] }
 0x2ca   : > { %11040 = vlog2.f32 %v3431_v45  ;;  %v3343_v49 = vsub.f32 0.0, %v3311_v8  ;;  %v10471_v50 = vadd.f32 %v3067_v31, %v12803_v63  ;;  %v10472_v39 = vadd.f32 %v9884_v35, %v12805_v11  ;;  %10006 = vmatprep.subr.msk.mxu1 %vm3956_vm4, %v8485_v40 }
 0x2cb   : > { %v11023_v55 = vpop.eup %11022  ;;  %11042 = vlog2.f32 %v3430_v5  ;;  %v3273_v53 = vmax.f32 %v12946_v43, 0.0  ;;  %v3310_v29 = vand.u32 2147483647, %v12998_v57  ;;  %v13008_v38 = vadd.f32 %v12904_v41, %v3210_v9 }
 0x2cc   : > { %v11025_v10 = vpop.eup %11024  ;;  %v3433_v28 = vadd.f32 1.0, %v11023_v55  ;;  %11044 = vpow2.f32 %v3382_v60  ;;  %v13005_v4 = vpop.f32.mrb[18].mxu0  ;;  %v3388_v0 = vmul.f32 1.442695, %v3343_v49  ;;  %v3209_v59 = vmul.f32 %v10471_v50, %v12898_v62 }
 0x2cd   : > { %v11027_v52 = vpop.eup %11026  ;;  %v3461_v6 = vmul.f32 0.6931472, %v11025_v10  ;;  %v13011_v63 = vpop.f32.mrb[19].mxu0  ;;  %v3272_v48 = vmax.f32 %v12950_v36, 0.0  ;;  %v3212_v45 = vmul.f32 %v10472_v39, %v12898_v62  ;;  %v3342_v50 = vsub.f32 0.0, %v3310_v29 }
 0x2ce   : > { %v11029_v11 = vpop.eup %11028  ;;  %v3459_v31 = vmul.f32 0.6931472, %v11027_v52  ;;  %11046 = vlog2.f32 %v3433_v28  ;;  %v13029_v52 = vadd.f32 %v12904_v41, %v3209_v59  ;;  %v10473_v29 = vadd.f32 %v3077_v46, %v12807_v12 }
 0x2cf   : > { %v11031_v51 = vpop.eup %11030  ;;  %v3523_v35 = vadd.f32 %v3461_v6, %v3267_v34  ;;  %v3432_v5 = vadd.f32 1.0, %v11029_v11  ;;  %11048 = vpow2.f32 %v3388_v0  ;;  %v3313_v34 = vand.u32 2147483647, %v13008_v38 }
 0x2d0   : > { %v11033_v60 = vpop.eup %11032  ;;  %v3522_v9 = vadd.f32 %v3459_v31, %v3266_v56  ;;  %v3435_v55 = vadd.f32 1.0, %v11031_v51  ;;  %v13025_v39 = vpop.f32.mrb[20].mxu0  ;;  %v13034_v56 = vadd.f32 %v12904_v41, %v3212_v45  ;;  %v3312_v8 = vand.u32 2147483647, %v13029_v52 }
 0x2d1   : > { %v11035_v10 = vpop.eup %11034  ;;  %11050 = vtanh.f32 %v3523_v35  ;;  %v3465_v28 = vmul.f32 0.6931472, %v11033_v60  ;;  %v13031_v6 = vpop.f32.mrb[21].mxu0  ;;  %v3345_v46 = vsub.f32 0.0, %v3313_v34 }
 0x2d2   : > { %v11037_v0 = vpop.eup %11036  ;;  %11052 = vtanh.f32 %v3522_v9  ;;  %v3463_v11 = vmul.f32 0.6931472, %v11035_v10  ;;  %v3386_v10 = vmul.f32 1.442695, %v3342_v50 }
 0x2d3   : > { %v11039_v31 = vpop.eup %11038  ;;  %v3525_v40 = vadd.f32 %v3465_v28, %v3269_v42  ;;  %11054 = vlog2.f32 %v3432_v5  ;;  %v3434_v51 = vadd.f32 1.0, %v11037_v0  ;;  %v3315_v0 = vand.u32 2147483647, %v13034_v56 }
 0x2d4   : > { %v11041_v59 = vpop.eup %11040  ;;  %v3524_v60 = vadd.f32 %v3463_v11, %v3268_v47  ;;  %11056 = vlog2.f32 %v3435_v55  ;;  %v3437_v9 = vadd.f32 1.0, %v11039_v31  ;;  %v13042_v49 = vpop.f32.mrb[22].mxu0  ;;  %v3211_v47 = vmul.f32 %v10473_v29, %v12898_v62 }
 0x2d5   : > { %v11043_v45 = vpop.eup %11042  ;;  %11058 = vtanh.f32 %v3525_v40  ;;  %v3469_v12 = vmul.f32 0.6931472, %v11041_v59  ;;  %v13045_v42 = vpop.f32.mrb[23].mxu0  ;;  %v3344_v11 = vsub.f32 0.0, %v3312_v8  ;;  %v3347_v40 = vsub.f32 0.0, %v3315_v0 }
 0x2d6   : > { %v11045_v5 = vpop.eup %11044  ;;  %11060 = vtanh.f32 %v3524_v60  ;;  %v3467_v28 = vmul.f32 0.6931472, %v11043_v45  ;;  %v13054_v59 = vadd.f32 %v12904_v41, %v3211_v47  ;;  %v3392_v35 = vmul.f32 1.442695, %v3345_v46 }
 0x2d7   : > { %v3527_v55 = vadd.f32 %v3469_v12, %v3271_v2  ;;  %11062 = vlog2.f32 %v3434_v51  ;;  %v3436_v50 = vadd.f32 1.0, %v11045_v5  ;;  %v10474_v2 = vadd.f32 %v13005_v4, %v12863_v14 }
 0x2d8   : > { %v11047_v31 = vpop.eup %11046  ;;  %v3526_v34 = vadd.f32 %v3467_v28, %v3270_v54  ;;  %11064 = vlog2.f32 %v3437_v9  ;;  %v13056_v60 = vpop.f32.mrb[24].mxu0  ;;  %v3390_v12 = vmul.f32 1.442695, %v3344_v11  ;;  %v3396_v54 = vmul.f32 1.442695, %v3347_v40 }
 0x2d9   : > { %v11049_v45 = vpop.eup %11048  ;;  %11066 = vtanh.f32 %v3527_v55  ;;  %v3473_v29 = vmul.f32 0.6931472, %v11047_v31  ;;  %v13060_v51 = vpop.f32.mrb[25].mxu0  ;;  %v3314_v28 = vand.u32 2147483647, %v13054_v59  ;;  %v3214_v0 = vmul.f32 %v10474_v2, %v12898_v62 }
 0x2da   : > { %11068 = vtanh.f32 %v3526_v34  ;;  %v3439_v8 = vadd.f32 1.0, %v11049_v45  ;;  %v10475_v14 = vadd.f32 %v13011_v63, %v12865_v15  ;;  %v10476_v4 = vadd.f32 %v13025_v39, %v12867_v16 }
 0x2db   : > { %v11051_v9 = vpop.eup %11050  ;;  %v3529_v5 = vadd.f32 %v3473_v29, %v3273_v53  ;;  %11070 = vlog2.f32 %v3436_v50  ;;  %v3346_v50 = vsub.f32 0.0, %v3314_v28  ;;  %v13079_v31 = vadd.f32 %v12904_v41, %v3214_v0 }
 0x2dc   : > { %v11053_v47 = vpop.eup %11052  ;;  %v13067_v46 = vmul.f32 %v11051_v9, %v12910_v3  ;;  %11072 = vlog2.f32 %v3439_v8  ;;  %v13073_v55 = vpop.f32.mrb[26].mxu0  ;;  %v3213_v16 = vmul.f32 %v10475_v14, %v12898_v62  ;;  %v3216_v63 = vmul.f32 %v10476_v4, %v12898_v62 }
 0x2dd   : > { %v11055_v11 = vpop.eup %11054  ;;  %v13076_v53 = vmul.f32 %v11053_v47, %v12914_v33  ;;  %11074 = vtanh.f32 %v3529_v5  ;;  %v13081_v3 = vpop.f32.mrb[27].mxu0  ;;  %v3276_v40 = vmax.f32 %v12984_v13, 0.0  ;;  %v3394_v45 = vmul.f32 1.442695, %v3346_v50 }
 0x2de   : > { %15398 = vst [vmem:[#allocation3_spill] sm:$0xff] %v13067_v46  ;;  %v11057_v34 = vpop.eup %11056  ;;  %3676 = vst.msk [vmem:[#allocation2 + $0x21] sm:$0xff] %vm3618_vm5, %v13067_v46  ;;  %v3471_v15 = vmul.f32 0.6931472, %v11055_v11  ;;  %11076 = vpow2.f32 %v3386_v10  ;;  %v3317_v8 = vand.u32 2147483647, %v13079_v31  ;;  %v13104_v47 = vadd.f32 %v12904_v41, %v3213_v16 }
 0x2df   : > { %15399 = vst [vmem:[#allocation4_spill] sm:$0xff] %v13076_v53  ;;  %v11059_v39 = vpop.eup %11058  ;;  %3675 = vst.msk [vmem:[#allocation2 + $0x19] sm:$0xff] %vm3618_vm5, %v13076_v53  ;;  %v3477_v33 = vmul.f32 0.6931472, %v11057_v34  ;;  %11078 = vpow2.f32 %v3392_v35  ;;  %v15402_v0 = vmax.f32 %v12959_v27, 0.0  ;;  %v13111_v4 = vadd.f32 %v12904_v41, %v3216_v63 }
 0x2e0   : > { %v11061_v29 = vpop.eup %11060  ;;  %v13091_v2 = vmul.f32 %v11059_v39, %v12922_v44  ;;  %v3528_v10 = vadd.f32 %v3471_v15, %v3272_v48  ;;  %11080 = vpow2.f32 %v3390_v12  ;;  %v13096_v9 = vpop.f32.mrb[28].mxu0  ;;  %v3349_v12 = vsub.f32 0.0, %v3317_v8 }
 0x2e1   : > { %v11063_v5 = vpop.eup %11062  ;;  %v13099_v28 = vmul.f32 %v11061_v29, %v12926_v7  ;;  %v3531_v35 = vadd.f32 %v3477_v33, %v15402_v0  ;;  %11082 = vpow2.f32 %v3396_v54  ;;  %v13106_v44 = vpop.f32.mrb[29].mxu0  ;;  %v3279_v11 = vmax.f32 %v12991_v1, 0.0 }
 0x2e2   : > { %15400 = vst [vmem:[#allocation9_spill] sm:$0xff] %v13091_v2  ;;  %v11065_v14 = vpop.eup %11064  ;;  %3678 = vst.msk [vmem:[#allocation2 + $0x39] sm:$0xff] %vm3618_vm5, %v13091_v2  ;;  %11084 = vtanh.f32 %v3528_v10  ;;  %v3475_v48 = vmul.f32 0.6931472, %v11063_v5  ;;  %v3316_v50 = vand.u32 2147483647, %v13104_v47 }
 0x2e3   : > { %15401 = vst [vmem:[#allocation5_spill] sm:$0xff] %v13099_v28  ;;  %v11067_v7 = vpop.eup %11066  ;;  %3677 = vst.msk [vmem:[#allocation2 + $0x31] sm:$0xff] %vm3618_vm5, %v13099_v28  ;;  %11086 = vtanh.f32 %v3531_v35  ;;  %v3481_v54 = vmul.f32 0.6931472, %v11065_v14  ;;  %v15404_v16 = vmax.f32 %v12963_v30, 0.0  ;;  %v15406_v8 = vmax.f32 %v12977_v61, 0.0 }
 0x2e4   : > { %v11069_v34 = vpop.eup %11068  ;;  %v13118_v15 = vmul.f32 %v11067_v7, %v12934_v37  ;;  %11088 = vpow2.f32 %v3394_v45  ;;  %v3400_v63 = vmul.f32 1.442695, %v3349_v12  ;;  %v13122_v33 = vpop.f32.mrb[30].mxu0  ;;  %v3348_v35 = vsub.f32 0.0, %v3316_v50 }
 0x2e5   : > { %v3530_v39 = vadd.f32 %v3475_v48, %v15404_v16  ;;  %v11071_v29 = vpop.eup %11070  ;;  %v13125_v10 = vmul.f32 %v11069_v34, %v12938_v58  ;;  %v3533_v5 = vadd.f32 %v3481_v54, %v15406_v8  ;;  %v13130_v14 = vpop.f32.mrb[31].mxu0  ;;  %v3319_v48 = vand.u32 2147483647, %v13111_v4 }
 0x2e6   : > { %15403 = vst [vmem:[#allocation6_spill] sm:$0xff] %v13118_v15  ;;  %v11073_v37 = vpop.eup %11072  ;;  %3680 = vst.msk [vmem:[#allocation2 + $0x51] sm:$0xff] %vm3618_vm5, %v13118_v15  ;;  %v3479_v45 = vmul.f32 0.6931472, %v11071_v29  ;;  %v10477_v58 = vadd.f32 %v13031_v6, %v12869_v17  ;;  %v3398_v54 = vmul.f32 1.442695, %v3348_v35  ;;  %v10478_v50 = vadd.f32 %v13042_v49, %v12871_v18 }
 0x2e7   : > { %15405 = vst [vmem:[#allocation7_spill] sm:$0xff] %v13125_v10  ;;  %11090 = vtanh.f32 %v3530_v39  ;;  %v11075_v12 = vpop.eup %11074  ;;  %3679 = vst.msk [vmem:[#allocation2 + $0x49] sm:$0xff] %vm3618_vm5, %v13125_v10  ;;  %v3485_v7 = vmul.f32 0.6931472, %v11073_v37  ;;  %v3351_v29 = vsub.f32 0.0, %v3319_v48  ;;  %v10480_v48 = vadd.f32 %v13056_v60, %v12875_v20 }
 0x2e8   : > { %11092 = vtanh.f32 %v3533_v5  ;;  %v11077_v34 = vpop.eup %11076  ;;  %v13142_v16 = vmul.f32 %v11075_v12, %v12946_v43  ;;  %v3532_v39 = vadd.f32 %v3479_v45, %v3276_v40  ;;  %v3215_v6 = vmul.f32 %v10477_v58, %v12898_v62 }
 0x2e9   : > { %11094 = vpow2.f32 %v3400_v63  ;;  %v11079_v8 = vpop.eup %11078  ;;  %v3535_v0 = vadd.f32 %v3485_v7, %v3279_v11  ;;  %v3438_v17 = vadd.f32 1.0, %v11077_v34  ;;  %v3404_v18 = vmul.f32 1.442695, %v3351_v29 }
 0x2ea   : > { %15407 = vst [vmem:[#allocation33_spill] sm:$0xff] %v13142_v16  ;;  %11096 = vpow2.f32 %v3398_v54  ;;  %v11081_v15 = vpop.eup %11080  ;;  %3682 = vst.msk [vmem:[#allocation2 + $0x69] sm:$0xff] %vm3618_vm5, %v13142_v16  ;;  %v3441_v5 = vadd.f32 1.0, %v11079_v8  ;;  %v3218_v49 = vmul.f32 %v10478_v50, %v12898_v62  ;;  %v13149_v63 = vadd.f32 %v12904_v41, %v3215_v6 }
 0x2eb   : > { %11098 = vtanh.f32 %v3532_v39  ;;  %v11083_v43 = vpop.eup %11082  ;;  %v3440_v40 = vadd.f32 1.0, %v11081_v15  ;;  %v10479_v11 = vadd.f32 %v13045_v42, %v12873_v19  ;;  %v3281_v15 = vmax.f32 %v13008_v38, 0.0 }
 0x2ec   : > { %11100 = vtanh.f32 %v3535_v0  ;;  %v11085_v35 = vpop.eup %11084  ;;  %v3443_v37 = vadd.f32 1.0, %v11083_v43  ;;  %v13154_v45 = vadd.f32 %v12904_v41, %v3218_v49  ;;  %v3318_v0 = vand.u32 2147483647, %v13149_v63 }
 0x2ed   : > { %11102 = vlog2.f32 %v3438_v17  ;;  %v11087_v58 = vpop.eup %11086  ;;  %v13159_v12 = vmul.f32 %v11085_v35, %v12950_v36  ;;  %v3280_v42 = vmax.f32 %v13029_v52, 0.0  ;;  %v3217_v60 = vmul.f32 %v10479_v11, %v12898_v62 }
 0x2ee   : > { %11104 = vlog2.f32 %v3441_v5  ;;  %v11089_v7 = vpop.eup %11088  ;;  %v13164_v19 = vmul.f32 %v11087_v58, %v12959_v27  ;;  %v3321_v54 = vand.u32 2147483647, %v13154_v45  ;;  %v3350_v36 = vsub.f32 0.0, %v3318_v0 }
 0x2ef   : > { %15408 = vst [vmem:[#allocation34_spill] sm:$0xff] %v13159_v12  ;;  %11106 = vlog2.f32 %v3440_v40  ;;  %3681 = vst.msk [vmem:[#allocation2 + $0x61] sm:$0xff] %vm3618_vm5, %v13159_v12  ;;  %v3442_v20 = vadd.f32 1.0, %v11089_v7  ;;  %v3220_v34 = vmul.f32 %v10480_v48, %v12898_v62  ;;  %v10481_v39 = vadd.f32 %v13060_v51, %v12877_v21 }
 0x2f0   : > { %15409 = vst [vmem:[#allocation35_spill] sm:$0xff] %v13164_v19  ;;  %11108 = vlog2.f32 %v3443_v37  ;;  %3684 = vst.msk [vmem:[#allocation2 + $0x81] sm:$0xff] %vm3618_vm5, %v13164_v19  ;;  %v3353_v27 = vsub.f32 0.0, %v3321_v54  ;;  %v3402_v17 = vmul.f32 1.442695, %v3350_v36  ;;  %v13180_v6 = vadd.f32 %v12904_v41, %v3217_v60 }
 0x2f1   : > { %v11091_v50 = vpop.eup %11090  ;;  %11110 = vpow2.f32 %v3404_v18  ;;  %v13186_v43 = vadd.f32 %v12904_v41, %v3220_v34  ;;  %v3219_v40 = vmul.f32 %v10481_v39, %v12898_v62  ;;  %v3285_v34 = vmax.f32 %v13079_v31, 0.0 }
 0x2f2   : > { %v11093_v29 = vpop.eup %11092  ;;  %v13177_v8 = vmul.f32 %v11091_v50, %v12963_v30  ;;  %11112 = vlog2.f32 %v3442_v20  ;;  %v3408_v18 = vmul.f32 1.442695, %v3353_v27  ;;  %v3283_v30 = vmax.f32 %v13034_v56, 0.0 }
 0x2f3   : > { %v11095_v5 = vpop.eup %11094  ;;  %v13183_v49 = vmul.f32 %v11093_v29, %v12977_v61  ;;  %11114 = vpow2.f32 %v3402_v17  ;;  %v3320_v11 = vand.u32 2147483647, %v13180_v6  ;;  %v3282_v61 = vmax.f32 %v13054_v59, 0.0 }
 0x2f4   : > { %15410 = vst [vmem:[#allocation36_spill] sm:$0xff] %v13177_v8  ;;  %v11097_v21 = vpop.eup %11096  ;;  %3683 = vst.msk [vmem:[#allocation2 + $0x79] sm:$0xff] %vm3618_vm5, %v13177_v8  ;;  %v3445_v51 = vadd.f32 1.0, %v11095_v5  ;;  %11116 = vpow2.f32 %v3408_v18  ;;  %v3323_v48 = vand.u32 2147483647, %v13186_v43  ;;  %v13201_v54 = vadd.f32 %v12904_v41, %v3219_v40 }
 0x2f5   : > { %15411 = vst [vmem:[#allocation37_spill] sm:$0xff] %v13183_v49  ;;  %v11099_v35 = vpop.eup %11098  ;;  %3686 = vst.msk [vmem:[#allocation2 + $0x99] sm:$0xff] %vm3618_vm5, %v13183_v49  ;;  %v3444_v37 = vadd.f32 1.0, %v11097_v21  ;;  %v3352_v7 = vsub.f32 0.0, %v3320_v11  ;;  %v10482_v50 = vadd.f32 %v13073_v55, %v12879_v22  ;;  %v10483_v29 = vadd.f32 %v13081_v3, %v12881_v23 }
 0x2f6   : > { %v11101_v58 = vpop.eup %11100  ;;  %v13198_v0 = vmul.f32 %v11099_v35, %v12984_v13  ;;  %11118 = vlog2.f32 %v3445_v51  ;;  %v3355_v60 = vsub.f32 0.0, %v3323_v48  ;;  %v3322_v18 = vand.u32 2147483647, %v13201_v54 }
 0x2f7   : > { %v11103_v20 = vpop.eup %11102  ;;  %v13204_v36 = vmul.f32 %v11101_v58, %v12991_v1  ;;  %11120 = vlog2.f32 %v3444_v37  ;;  %v3406_v39 = vmul.f32 1.442695, %v3352_v7  ;;  %v3222_v22 = vmul.f32 %v10482_v50, %v12898_v62 }
 0x2f8   : > { %15412 = vst [vmem:[#allocation38_spill] sm:$0xff] %v13198_v0  ;;  %v11105_v27 = vpop.eup %11104  ;;  %3685 = vst.msk [vmem:[#allocation2 + $0x91] sm:$0xff] %vm3618_vm5, %v13198_v0  ;;  %v3483_v13 = vmul.f32 0.6931472, %v11103_v20  ;;  %v3412_v5 = vmul.f32 1.442695, %v3355_v60  ;;  %v3221_v11 = vmul.f32 %v10483_v29, %v12898_v62 }
 0x2f9   : > { %15413 = vst [vmem:[#allocation39_spill] sm:$0xff] %v13204_v36  ;;  %v11107_v17 = vpop.eup %11106  ;;  %3688 = vst.msk [vmem:[#allocation2 + $0xb1] sm:$0xff] %vm3618_vm5, %v13204_v36  ;;  %v3489_v1 = vmul.f32 0.6931472, %v11105_v27  ;;  %v15414_v40 = vmax.f32 %v12998_v57, 0.0  ;;  %11122 = vpow2.f32 %v3406_v39  ;;  %v3354_v37 = vsub.f32 0.0, %v3322_v18 }
 0x2fa   : > { %v11109_v55 = vpop.eup %11108  ;;  %v3487_v51 = vmul.f32 0.6931472, %v11107_v17  ;;  %11124 = vpow2.f32 %v3412_v5  ;;  %v13225_v20 = vadd.f32 %v12904_v41, %v3222_v22  ;;  %v3284_v27 = vmax.f32 %v13104_v47, 0.0 }
 0x2fb   : > { %v3534_v21 = vadd.f32 %v3483_v13, %v15414_v40  ;;  %v11111_v35 = vpop.eup %11110  ;;  %v3537_v23 = vadd.f32 %v3489_v1, %v3281_v15  ;;  %v3493_v3 = vmul.f32 0.6931472, %v11109_v55  ;;  %v3287_v15 = vmax.f32 %v13111_v4, 0.0 }
 0x2fc   : > { %v11113_v48 = vpop.eup %11112  ;;  %v3536_v58 = vadd.f32 %v3487_v51, %v3280_v42  ;;  %v3447_v7 = vadd.f32 1.0, %v11111_v35  ;;  %v3325_v39 = vand.u32 2147483647, %v13225_v20  ;;  %v13231_v29 = vadd.f32 %v12904_v41, %v3221_v11 }
 0x2fd   : > { %11126 = vtanh.f32 %v3534_v21  ;;  %v3539_v60 = vadd.f32 %v3493_v3, %v3283_v30  ;;  %v3491_v50 = vmul.f32 0.6931472, %v11113_v48  ;;  %v11115_v13 = vpop.eup %11114  ;;  %v10484_v5 = vadd.f32 %v13096_v9, %v12883_v24 }
 0x2fe   : > { %11128 = vtanh.f32 %v3537_v23  ;;  %v11117_v17 = vpop.eup %11116  ;;  %v3446_v1 = vadd.f32 1.0, %v11115_v13  ;;  %v3410_v22 = vmul.f32 1.442695, %v3354_v37  ;;  %v3357_v55 = vsub.f32 0.0, %v3325_v39 }
 0x2ff   : > { %11130 = vtanh.f32 %v3536_v58  ;;  %v3538_v42 = vadd.f32 %v3491_v50, %v3282_v61  ;;  %v3449_v18 = vadd.f32 1.0, %v11117_v17  ;;  %v3324_v51 = vand.u32 2147483647, %v13231_v29 }
 0x300   : > { %11132 = vtanh.f32 %v3539_v60  ;;  %v11119_v30 = vpop.eup %11118  ;;  %v3224_v11 = vmul.f32 %v10484_v5, %v12898_v62  ;;  %v3286_v23 = vmax.f32 %v13149_v63, 0.0  ;;  %v10485_v61 = vadd.f32 %v13106_v44, %v12885_v25 }
 0x301   : > { %11134 = vlog2.f32 %v3447_v7  ;;  %v11121_v40 = vpop.eup %11120  ;;  %v3497_v21 = vmul.f32 0.6931472, %v11119_v30  ;;  %v3356_v9 = vsub.f32 0.0, %v3324_v51  ;;  %v10486_v7 = vadd.f32 %v13122_v33, %v12887_v26  ;;  %v13277_v51 = vld [vmem:[#allocation2 + $0x20] sm:$0xff] }
 0x302   : > { %11136 = vtanh.f32 %v3538_v42  ;;  %v3495_v35 = vmul.f32 0.6931472, %v11121_v40  ;;  %v13241_v3 = vadd.f32 %v12904_v41, %v3224_v11  ;;  %v3223_v58 = vmul.f32 %v10485_v61, %v12898_v62 }
 0x303   : > { %11138 = vlog2.f32 %v3446_v1  ;;  %v3541_v24 = vadd.f32 %v3497_v21, %v3285_v34  ;;  %v11123_v37 = vpop.eup %11122  ;;  %v3416_v13 = vmul.f32 1.442695, %v3357_v55  ;;  %v3414_v39 = vmul.f32 1.442695, %v3356_v9 }
 0x304   : > { %11140 = vlog2.f32 %v3449_v18  ;;  %v3540_v48 = vadd.f32 %v3495_v35, %v3284_v27  ;;  %v11125_v60 = vpop.eup %11124  ;;  %v3448_v50 = vadd.f32 1.0, %v11123_v37  ;;  %v3327_v34 = vand.u32 2147483647, %v13241_v3 }
 0x305   : > { %11142 = vpow2.f32 %v3410_v22  ;;  %v3451_v44 = vadd.f32 1.0, %v11125_v60  ;;  %v13248_v17 = vadd.f32 %v12904_v41, %v3223_v58  ;;  %v3226_v26 = vmul.f32 %v10486_v7, %v12898_v62  ;;  %v13292_v58 = vld [vmem:[#allocation2 + $0x28] sm:$0x3] }
 0x306   : > { %11144 = vtanh.f32 %v3541_v24  ;;  %v10487_v33 = vadd.f32 %v13130_v14, %v12889_v32  ;;  %v3289_v30 = vmax.f32 %v13154_v45, 0.0  ;;  %v3359_v18 = vsub.f32 0.0, %v3327_v34  ;;  %v13269_v14 = vld [vmem:[#allocation2 + $0x18] sm:$0xff] }
 0x307   : > { %v11127_v25 = vpop.eup %11126  ;;  %11146 = vtanh.f32 %v3540_v48  ;;  %v3326_v55 = vand.u32 2147483647, %v13248_v17  ;;  %v13267_v32 = vadd.f32 %v12904_v41, %v3226_v26  ;;  %v3288_v61 = vmax.f32 %v13180_v6, 0.0 }
 0x308   : > { %v11129_v27 = vpop.eup %11128  ;;  %v13251_v42 = vmul.f32 %v11127_v25, %v12998_v57  ;;  %11148 = vlog2.f32 %v3448_v50  ;;  %v3420_v21 = vmul.f32 1.442695, %v3359_v18  ;;  %v3815_v48 = vrot.slane %v13269_v14, 1 }
 0x309   : > { %v11131_v1 = vpop.eup %11130  ;;  %v13257_v5 = vmul.f32 %v11129_v27, %v13008_v38  ;;  %11150 = vlog2.f32 %v3451_v44  ;;  %v3358_v24 = vsub.f32 0.0, %v3326_v55  ;;  %v3329_v9 = vand.u32 2147483647, %v13267_v32 }
 0x30a   : > { %15415 = vst [vmem:[#allocation40_spill] sm:$0xff] %v13251_v42  ;;  %v11133_v22 = vpop.eup %11132  ;;  %3687 = vst.msk [vmem:[#allocation2 + $0xa9] sm:$0xff] %vm3618_vm5, %v13251_v42  ;;  %v13263_v57 = vmul.f32 %v11131_v1, %v13029_v52  ;;  %11152 = vpow2.f32 %v3416_v13  ;;  %v3225_v52 = vmul.f32 %v10487_v33, %v12898_v62  ;;  %v3291_v44 = vmax.f32 %v13186_v43, 0.0  ;;  %v13303_v1 = vld [vmem:[#allocation2 + $0x30] sm:$0xff] }
 0x30b   : > { %15416 = vst [vmem:[#allocation41_spill] sm:$0xff] %v13257_v5  ;;  %v11135_v38 = vpop.eup %11134  ;;  %3690 = vst.msk [vmem:[#allocation2 + $0xc9] sm:$0xff] %vm3618_vm5, %v13257_v5  ;;  %v13274_v40 = vmul.f32 %v11133_v22, %v13034_v56  ;;  %11154 = vpow2.f32 %v3414_v39  ;;  %v3418_v13 = vmul.f32 1.442695, %v3358_v24  ;;  %v3361_v39 = vsub.f32 0.0, %v3329_v9 }
 0x30c   : > { %15417 = vst [vmem:[#allocation42_spill] sm:$0xff] %v13263_v57  ;;  %v11137_v11 = vpop.eup %11136  ;;  %3689 = vst.msk [vmem:[#allocation2 + $0xc1] sm:$0xff] %vm3618_vm5, %v13263_v57  ;;  %v3501_v35 = vmul.f32 0.6931472, %v11135_v38  ;;  %11156 = vpow2.f32 %v3420_v21  ;;  %v13289_v62 = vadd.f32 %v12904_v41, %v3225_v52  ;;  %v3816_v34 = vrot.slane %v13277_v51, 1  ;;  %v13308_v21 = vld [vmem:[#allocation2 + $0x38] sm:$0xff] }
 0x30d   : > { %15418 = vst [vmem:[#allocation43_spill] sm:$0xff] %v13274_v40  ;;  %v11139_v37 = vpop.eup %11138  ;;  %3692 = vst.msk [vmem:[#allocation2 + $0xe1] sm:$0xff] %vm3618_vm5, %v13274_v40  ;;  %v13286_v56 = vmul.f32 %v11137_v11, %v13054_v59  ;;  %v3424_v33 = vmul.f32 1.442695, %v3361_v39  ;;  %v13317_v24 = vld [vmem:[#allocation2 + $0x40] sm:$0x3] }
 0x30e   : > { %v11141_v7 = vpop.eup %11140  ;;  %v3543_v60 = vadd.f32 %v3501_v35, %v3287_v15  ;;  %v3499_v50 = vmul.f32 0.6931472, %v11139_v37  ;;  %v3328_v41 = vand.u32 2147483647, %v13289_v62  ;;  %v3818_v35 = vrot.slane %v13292_v58, 1 }
 0x30f   : > { %15419 = vst [vmem:[#allocation8_spill] sm:$0xff] %v13286_v56  ;;  %v11143_v25 = vpop.eup %11142  ;;  %3691 = vst.msk [vmem:[#allocation2 + $0xd9] sm:$0xff] %vm3618_vm5, %v13286_v56  ;;  %v3505_v59 = vmul.f32 0.6931472, %v11141_v7  ;;  %v3295_v19 = vmax.f32 %v13241_v3, 0.0 }
 0x310   : > { %v11145_v27 = vpop.eup %11144  ;;  %11158 = vtanh.f32 %v3543_v60  ;;  %v3542_v26 = vadd.f32 %v3499_v50, %v3286_v23  ;;  %v3450_v15 = vadd.f32 1.0, %v11143_v25  ;;  %v3360_v38 = vsub.f32 0.0, %v3328_v41  ;;  %v13330_v50 = vld [vmem:[#allocation2 + $0x48] sm:$0xff] }
 0x311   : > { %v11147_v18 = vpop.eup %11146  ;;  %v13306_v22 = vmul.f32 %v11145_v27, %v13079_v31  ;;  %v3545_v55 = vadd.f32 %v3505_v59, %v3289_v30  ;;  %11160 = vpow2.f32 %v3418_v13  ;;  %v13314_v23 = vsel %vm490_vm3, %v3815_v48, %v3816_v34  ;;  %v13332_v13 = vld [vmem:[#allocation2 + $0x50] sm:$0xff]  ;;  %v13337_v27 = vld [vmem:[#allocation2 + $0x58] sm:$0x3] }
 0x312   : > { %v11149_v52 = vpop.eup %11148  ;;  %v13311_v11 = vmul.f32 %v11147_v18, %v13104_v47  ;;  %11162 = vtanh.f32 %v3542_v26  ;;  %v3422_v30 = vmul.f32 1.442695, %v3360_v38  ;;  %9911 = vmatprep.mubr.msk.f32.mxu1 %vm3618_vm5, %v13314_v23  ;;  %v3820_v47 = vrot.slane %v13303_v1, 1  ;;  %v13339_v26 = vld [vmem:[#allocation2 + $0x60] sm:$0xff]  ;;  %v13417_v57 = vld [vmem:[#allocation2 + $0xb0] sm:$0xff] }
 0x313   : > { %15420 = vst [vmem:[#allocation44_spill] sm:$0xff] %v13306_v22  ;;  %v11151_v9 = vpop.eup %11150  ;;  %3694 = vst.msk [vmem:[#allocation2 + $0xf9] sm:$0xff] %vm3618_vm5, %v13306_v22  ;;  %11164 = vtanh.f32 %v3545_v55  ;;  %v3503_v31 = vmul.f32 0.6931472, %v11149_v52  ;;  %v13327_v7 = vsel %vm490_vm3, %v3816_v34, %v3818_v35  ;;  %v3821_v60 = vrot.slane %v13308_v21, 1  ;;  %v13344_v55 = vld [vmem:[#allocation2 + $0x68] sm:$0xff] }
 0x314   : > { %15421 = vst [vmem:[#allocation10_spill] sm:$0xff] %v13311_v11  ;;  %v11153_v37 = vpop.eup %11152  ;;  %3693 = vst.msk [vmem:[#allocation2 + $0xf1] sm:$0xff] %vm3618_vm5, %v13311_v11  ;;  %v3509_v48 = vmul.f32 0.6931472, %v11151_v9  ;;  %11166 = vlog2.f32 %v3450_v15  ;;  %9912 = vmatmul.mubr.msk.f32.gmra.mrb[34].mxu1 %vm3618_vm5, %v13327_v7  ;;  %v3823_v41 = vrot.slane %v13317_v24, 1  ;;  %v3825_v38 = vrot.slane %v13330_v50, 1 }
 0x315   : > { %v11155_v39 = vpop.eup %11154  ;;  %v3544_v25 = vadd.f32 %v3503_v31, %v3288_v61  ;;  %v3453_v59 = vadd.f32 1.0, %v11153_v37  ;;  %11168 = vpow2.f32 %v3424_v33  ;;  %v13342_v18 = vsel %vm490_vm3, %v3820_v47, %v3821_v60  ;;  %v13355_v35 = vld [vmem:[#allocation2 + $0x78] sm:$0xff]  ;;  %v13359_v47 = vld [vmem:[#allocation2 + $0x80] sm:$0xff]  ;;  %v13459_v16 = vld [vmem:[#allocation2 + $0xd0] sm:$0x3] }
 0x316   : > { %v3547_v34 = vadd.f32 %v3509_v48, %v3291_v44  ;;  %v3452_v15 = vadd.f32 1.0, %v11155_v39  ;;  %11170 = vpow2.f32 %v3422_v30  ;;  %v11157_v61 = vpop.eup %11156  ;;  %9914 = vmatprep.mubr.msk.f32.mxu1 %vm3618_vm5, %v13342_v18  ;;  %v13349_v33 = vsel %vm490_vm3, %v3821_v60, %v3823_v41  ;;  %v13353_v44 = vld [vmem:[#allocation2 + $0x70] sm:$0x3]  ;;  %v13443_v0 = vld [vmem:[#allocation2 + $0xc0] sm:$0xff] }
 0x317   : > { %11172 = vtanh.f32 %v3544_v25  ;;  %v3826_v52 = vrot.slane %v13332_v13, 1  ;;  %v3455_v9 = vadd.f32 1.0, %v11157_v61  ;;  %v3828_v31 = vrot.slane %v13337_v27, 1  ;;  %v13468_v2 = vld [vmem:[#allocation2 + $0xe0] sm:$0xff] }
 0x318   : > { %11174 = vtanh.f32 %v3547_v34  ;;  %v3830_v30 = vrot.slane %v13339_v26, 1  ;;  %9915 = vmatmul.mubr.msk.f32.gmra.mrb[36].mxu1 %vm3618_vm5, %v13349_v33  ;;  %v3831_v48 = vrot.slane %v13344_v55, 1  ;;  %v3833_v25 = vrot.slane %v13353_v44, 1 }
 0x319   : > { %11176 = vlog2.f32 %v3453_v59  ;;  %v13364_v37 = vsel %vm490_vm3, %v3825_v38, %v3826_v52  ;;  %v13370_v39 = vsel %vm490_vm3, %v3826_v52, %v3828_v31  ;;  %v3835_v59 = vrot.slane %v13355_v35, 1  ;;  %v13381_v38 = vld [vmem:[#allocation2 + $0x88] sm:$0x3]  ;;  %v13383_v52 = vld [vmem:[#allocation2 + $0x90] sm:$0xff]  ;;  %v13385_v31 = vld [vmem:[#allocation2 + $0x98] sm:$0xff] }
 0x31a   : > { %v11159_v60 = vpop.eup %11158  ;;  %11178 = vlog2.f32 %v3452_v15  ;;  %9917 = vmatprep.mubr.msk.f32.mxu1 %vm3618_vm5, %v13364_v37  ;;  %v13378_v61 = vsel %vm490_vm3, %v3830_v30, %v3831_v48  ;;  %v3836_v15 = vrot.slane %v13359_v47, 1  ;;  %v3850_v12 = vrot.slane %v13443_v0, 1 }
 0x31b   : > { %v11161_v41 = vpop.eup %11160  ;;  %v13375_v34 = vmul.f32 %v11159_v60, %v13111_v4  ;;  %11180 = vlog2.f32 %v3455_v9  ;;  %v3290_v9 = vmax.f32 %v13201_v54, 0.0  ;;  %v13488_v28 = vld [vmem:[#allocation2 + $0xf8] sm:$0xff] }
 0x31c   : > { %v11163_v22 = vpop.eup %11162  ;;  %v3454_v11 = vadd.f32 1.0, %v11161_v41  ;;  %9918 = vmatmul.mubr.msk.f32.gmra.mrb[38].mxu1 %vm3618_vm5, %v13370_v39  ;;  %v13401_v41 = vsel %vm490_vm3, %v3831_v48, %v3833_v25  ;;  %v13409_v5 = vsel %vm490_vm3, %v3835_v59, %v3836_v15 }
 0x31d   : > { %15422 = vst [vmem:[#allocation11_spill] sm:$0xff] %v13375_v34  ;;  %v11165_v40 = vpop.eup %11164  ;;  %3696 = vst.msk [vmem:[#allocation2 + $0x111] sm:$0xff] %vm3618_vm5, %v13375_v34  ;;  %v13390_v4 = vmul.f32 %v11163_v22, %v13149_v63  ;;  %9920 = vmatprep.mubr.msk.f32.mxu1 %vm3618_vm5, %v13378_v61  ;;  %v3838_v34 = vrot.slane %v13381_v38, 1  ;;  %v13404_v63 = vld [vmem:[#allocation2 + $0xa0] sm:$0x3] }
 0x31e   : > { %v11167_v30 = vpop.eup %11166  ;;  %v13396_v60 = vmul.f32 %v11165_v40, %v13154_v45  ;;  %11182 = vlog2.f32 %v3454_v11  ;;  %15425 = vst [vmem:[#allocation14_spill] sm:$0xff] %v13401_v41  ;;  %15426 = vst [vmem:[#allocation15_spill] sm:$0xff] %v13409_v5  ;;  %v3840_v45 = vrot.slane %v13383_v52, 1  ;;  %v3841_v40 = vrot.slane %v13385_v31, 1  ;;  %v13413_v11 = vld [vmem:[#allocation2 + $0xa8] sm:$0xff] }
 0x31f   : > { %15423 = vst [vmem:[#allocation12_spill] sm:$0xff] %v13390_v4  ;;  %v11169_v22 = vpop.eup %11168  ;;  %3695 = vst.msk [vmem:[#allocation2 + $0x109] sm:$0xff] %vm3618_vm5, %v13390_v4  ;;  %v3507_v56 = vmul.f32 0.6931472, %v11167_v30  ;;  %v3843_v59 = vrot.slane %v13404_v63, 1 }
 0x320   : > { %15424 = vst [vmem:[#allocation13_spill] sm:$0xff] %v13396_v60  ;;  %v11171_v48 = vpop.eup %11170  ;;  %3698 = vst.msk [vmem:[#allocation2 + $0x129] sm:$0xff] %vm3618_vm5, %v13396_v60  ;;  %v3457_v25 = vadd.f32 1.0, %v11169_v22  ;;  %9921 = vmatmul.mubr.msk.f32.gmra.mrb[40].mxu1 %vm3618_vm5, %v13401_v41  ;;  %v13428_v22 = vsel %vm490_vm3, %v3836_v15, %v3838_v34  ;;  %v3845_v60 = vrot.slane %v13413_v11, 1  ;;  %v3293_v34 = vmax.f32 %v13225_v20, 0.0 }
 0x321   : > { %v11173_v36 = vpop.eup %11172  ;;  %v3546_v42 = vadd.f32 %v3507_v56, %v3290_v9  ;;  %v3456_v4 = vadd.f32 1.0, %v11171_v48  ;;  %9923 = vmatprep.mubr.msk.f32.mxu1 %vm3618_vm5, %v13409_v5  ;;  %15428 = vst [vmem:[#allocation17_spill] sm:$0xff] %v13428_v22  ;;  %v13435_v48 = vsel %vm490_vm3, %v3840_v45, %v3841_v40  ;;  %v3292_v45 = vmax.f32 %v13231_v29, 0.0 }
 0x322   : > { %v11175_v30 = vpop.eup %11174  ;;  %v13423_v49 = vmul.f32 %v11173_v36, %v13180_v6  ;;  %11184 = vlog2.f32 %v3457_v25  ;;  %15430 = vst [vmem:[#allocation19_spill] sm:$0xff] %v13435_v48  ;;  %v3846_v6 = vrot.slane %v13417_v57, 1  ;;  %v13438_v36 = vld [vmem:[#allocation2 + $0xb8] sm:$0x3]  ;;  %v4488_v41 = vrot.slane %v13308_v21, 2 }
 0x323   : > { %v11177_v56 = vpop.eup %11176  ;;  %v13432_v9 = vmul.f32 %v11175_v30, %v13186_v43  ;;  %11186 = vtanh.f32 %v3546_v42  ;;  %v13445_v43 = vld [vmem:[#allocation2 + $0xc8] sm:$0xff] }
 0x324   : > { %15427 = vst [vmem:[#allocation16_spill] sm:$0xff] %v13423_v49  ;;  %v11179_v25 = vpop.eup %11178  ;;  %3697 = vst.msk [vmem:[#allocation2 + $0x121] sm:$0xff] %vm3618_vm5, %v13423_v49  ;;  %v3513_v15 = vmul.f32 0.6931472, %v11177_v56  ;;  %11188 = vlog2.f32 %v3456_v4  ;;  %9924 = vmatmul.mubr.msk.f32.gmra.mrb[42].mxu1 %vm3618_vm5, %v13428_v22  ;;  %v13456_v4 = vsel %vm490_vm3, %v3841_v40, %v3843_v59  ;;  %v3848_v56 = vrot.slane %v13438_v36, 1 }
 0x325   : > { %15429 = vst [vmem:[#allocation18_spill] sm:$0xff] %v13432_v9  ;;  %v11181_v42 = vpop.eup %11180  ;;  %3700 = vst.msk [vmem:[#allocation2 + $0x141] sm:$0xff] %vm3618_vm5, %v13432_v9  ;;  %v3511_v30 = vmul.f32 0.6931472, %v11179_v25  ;;  %9926 = vmatprep.mubr.msk.f32.mxu1 %vm3618_vm5, %v13435_v48  ;;  %v13462_v25 = vsel %vm490_vm3, %v3845_v60, %v3846_v6  ;;  %v3851_v10 = vrot.slane %v13445_v43, 1  ;;  %v3294_v40 = vmax.f32 %v13248_v17, 0.0 }
 0x326   : > { %v3549_v49 = vadd.f32 %v3513_v15, %v3293_v34  ;;  %v3517_v8 = vmul.f32 0.6931472, %v11181_v42  ;;  %15431 = vst [vmem:[#allocation20_spill] sm:$0xff] %v13456_v4  ;;  %15432 = vst [vmem:[#allocation21_spill] sm:$0xff] %v13462_v25  ;;  %v13466_v42 = vld [vmem:[#allocation2 + $0xd8] sm:$0xff]  ;;  %v3853_v60 = vrot.slane %v13459_v16, 1 }
 0x327   : > { %v3548_v9 = vadd.f32 %v3511_v30, %v3292_v45  ;;  %v3856_v45 = vrot.slane %v13468_v2, 1  ;;  %v13484_v30 = vld [vmem:[#allocation2 + $0xe8] sm:$0x3] }
 0x328   : > { %v11183_v34 = vpop.eup %11182  ;;  %11190 = vtanh.f32 %v3549_v49  ;;  %v3551_v15 = vadd.f32 %v3517_v8, %v3295_v19  ;;  %9927 = vmatmul.mubr.msk.f32.gmra.mrb[44].mxu1 %vm3618_vm5, %v13456_v4  ;;  %v13477_v49 = vsel %vm490_vm3, %v3846_v6, %v3848_v56  ;;  %v13480_v8 = vsel %vm490_vm3, %v3850_v12, %v3851_v10 }
 0x329   : > { %11192 = vtanh.f32 %v3548_v9  ;;  %v3515_v59 = vmul.f32 0.6931472, %v11183_v34  ;;  %9929 = vmatprep.mubr.msk.f32.mxu1 %vm3618_vm5, %v13462_v25  ;;  %15433 = vst [vmem:[#allocation22_spill] sm:$0xff] %v13477_v49  ;;  %15434 = vst [vmem:[#allocation23_spill] sm:$0xff] %v13480_v8  ;;  %v3855_v9 = vrot.slane %v13466_v42, 1  ;;  %v13486_v34 = vld [vmem:[#allocation2 + $0xf0] sm:$0xff]  ;;  %v13494_v12 = vsel %vm490_vm3, %v3851_v10, %v3853_v60 }
 0x32a   : > { %11194 = vtanh.f32 %v3551_v15  ;;  %v3297_v6 = vmax.f32 %v13267_v32, 0.0  ;;  %15435 = vst [vmem:[#allocation24_spill] sm:$0xff] %v13494_v12  ;;  %v3858_v53 = vrot.slane %v13484_v30, 1  ;;  %v3861_v25 = vrot.slane %v13488_v28, 1  ;;  %v13508_v60 = vld [vmem:[#allocation2 + $0x100] sm:$0x3] }
 0x32b   : > { %v3550_v19 = vadd.f32 %v3515_v59, %v3294_v40  ;;  %v3296_v4 = vmax.f32 %v13289_v62, 0.0  ;;  %v13506_v10 = vsel %vm490_vm3, %v3855_v9, %v3856_v45 }
 0x32c   : > { %v11185_v15 = vpop.eup %11184  ;;  %9930 = vmatmul.mubr.msk.f32.gmra.mrb[46].mxu1 %vm3618_vm5, %v13477_v49  ;;  %15437 = vst [vmem:[#allocation26_spill] sm:$0xff] %v13506_v10  ;;  %v13521_v9 = vsel %vm490_vm3, %v3856_v45, %v3858_v53  ;;  %v13537_v45 = vld [vmem:[#allocation2 + $0x120] sm:$0xff] }
 0x32d   : > { %v11187_v46 = vpop.eup %11186  ;;  %11196 = vtanh.f32 %v3550_v19  ;;  %v3521_v56 = vmul.f32 0.6931472, %v11185_v15  ;;  %9932 = vmatprep.mubr.msk.f32.mxu1 %vm3618_vm5, %v13480_v8  ;;  %v3860_v19 = vrot.slane %v13486_v34, 1  ;;  %15438 = vst [vmem:[#allocation27_spill] sm:$0xff] %v13521_v9 }
 0x32e   : > { %v11189_v40 = vpop.eup %11188  ;;  %v13497_v59 = vmul.f32 %v11187_v46, %v13201_v54  ;;  %v13512_v46 = vld [vmem:[#allocation2 + $0x108] sm:$0xff]  ;;  %v13514_v54 = vld [vmem:[#allocation2 + $0x110] sm:$0xff] }
 0x32f   : > { %v3553_v15 = vadd.f32 %v3521_v56, %v3297_v6  ;;  %v3519_v49 = vmul.f32 0.6931472, %v11189_v40  ;;  %v13524_v56 = vsel %vm490_vm3, %v3860_v19, %v3861_v25  ;;  %v3863_v40 = vrot.slane %v13508_v60, 1  ;;  %v13539_v19 = vld [vmem:[#allocation2 + $0x128] sm:$0xff] }
 0x330   : > { %15436 = vst [vmem:[#allocation25_spill] sm:$0xff] %v13497_v59  ;;  %3699 = vst.msk [vmem:[#allocation2 + $0x139] sm:$0xff] %vm3618_vm5, %v13497_v59  ;;  %9933 = vmatmul.mubr.msk.f32.gmra.mrb[48].mxu1 %vm3618_vm5, %v13494_v12 }
 0x331   : > { %11198 = vtanh.f32 %v3553_v15  ;;  %v3552_v8 = vadd.f32 %v3519_v49, %v3296_v4  ;;  %9935 = vmatprep.mubr.msk.f32.mxu1 %vm3618_vm5, %v13506_v10  ;;  %15439 = vst [vmem:[#allocation28_spill] sm:$0xff] %v13524_v56  ;;  %v3865_v4 = vrot.slane %v13512_v46, 1  ;;  %v3866_v49 = vrot.slane %v13514_v54, 1  ;;  %v13532_v15 = vld [vmem:[#allocation2 + $0x118] sm:$0x3] }
 0x332   : > { %v11191_v6 = vpop.eup %11190 }
 0x333   : > { %v11193_v59 = vpop.eup %11192  ;;  %v13528_v48 = vmul.f32 %v11191_v6, %v13225_v20  ;;  %11200 = vtanh.f32 %v3552_v8  ;;  %v3868_v8 = vrot.slane %v13532_v15, 1  ;;  %v3871_v6 = vrot.slane %v13539_v19, 1 }
 0x334   : > { %v11195_v10 = vpop.eup %11194  ;;  %v13535_v53 = vmul.f32 %v11193_v59, %v13231_v29  ;;  %9936 = vmatmul.mubr.msk.f32.gmra.mrb[50].mxu1 %vm3618_vm5, %v13521_v9  ;;  %v13553_v29 = vsel %vm490_vm3, %v3861_v25, %v3863_v40 }
 0x335   : > { %15440 = vst [vmem:[#allocation29_spill] sm:$0xff] %v13528_v48  ;;  %3702 = vst.msk [vmem:[#allocation2 + $0x159] sm:$0xff] %vm3618_vm5, %v13528_v48  ;;  %v13544_v20 = vmul.f32 %v11195_v10, %v13241_v3  ;;  %9938 = vmatprep.mubr.msk.f32.mxu1 %vm3618_vm5, %v13524_v56  ;;  %v13559_v3 = vsel %vm490_vm3, %v3865_v4, %v3866_v49  ;;  %v3870_v10 = vrot.slane %v13537_v45, 1  ;;  %v13563_v48 = vld [vmem:[#allocation2 + $0x130] sm:$0x3] }
 0x336   : > { %15441 = vst [vmem:[#allocation30_spill] sm:$0xff] %v13535_v53  ;;  %3701 = vst.msk [vmem:[#allocation2 + $0x151] sm:$0xff] %vm3618_vm5, %v13535_v53  ;;  %v13579_v4 = vsel %vm490_vm3, %v3866_v49, %v3868_v8 }
 0x337   : > { %15442 = vst [vmem:[#allocation31_spill] sm:$0xff] %v13544_v20  ;;  %15443 = vst [vmem:[#allocation32_spill] sm:$0xff] %v13553_v29  ;;  %v11197_v59 = vpop.eup %11196  ;;  %v13568_v25 = vld [vmem:[#allocation2 + $0x138] sm:$0xff]  ;;  %v13570_v40 = vld [vmem:[#allocation2 + $0x140] sm:$0xff] }
 0x338   : > { %3704 = vst.msk [vmem:[#allocation2 + $0x171] sm:$0xff] %vm3618_vm5, %v13544_v20  ;;  %15444 = vst [vmem:[#allocation45_spill] sm:$0xff] %v13559_v3  ;;  %v13566_v53 = vmul.f32 %v11197_v59, %v13248_v17  ;;  %9939 = vmatmul.mubr.msk.f32.gmra.mrb[52].mxu1 %vm3618_vm5, %v13553_v29  ;;  %v3873_v20 = vrot.slane %v13563_v48, 1  ;;  %v13583_v59 = vsel %vm490_vm3, %v3870_v10, %v3871_v6  ;;  %v3875_v56 = vrot.slane %v13568_v25, 1  ;;  %v13587_v29 = vld [vmem:[#allocation2 + $0x148] sm:$0x3] }
 0x339   : > { %9941 = vmatprep.mubr.msk.f32.mxu1 %vm3618_vm5, %v13559_v3  ;;  %15446 = vst [vmem:[#allocation47_spill] sm:$0xff] %v13579_v4  ;;  %15447 = vst [vmem:[#allocation48_spill] sm:$0xff] %v13583_v59  ;;  %v3876_v9 = vrot.slane %v13570_v40, 1 }
 0x33a   : > { %15445 = vst [vmem:[#allocation46_spill] sm:$0xff] %v13566_v53  ;;  %3703 = vst.msk [vmem:[#allocation2 + $0x169] sm:$0xff] %vm3618_vm5, %v13566_v53 }
 0x33b   : > { %v11199_v17 = vpop.eup %11198 }
 0x33c   : > { %v13590_v53 = vmul.f32 %v11199_v17, %v13267_v32  ;;  %9942 = vmatmul.mubr.msk.f32.gmra.mrb[54].mxu1 %vm3618_vm5, %v13579_v4  ;;  %v13606_v32 = vsel %vm490_vm3, %v3871_v6, %v3873_v20  ;;  %v3878_v17 = vrot.slane %v13587_v29, 1  ;;  %v13610_v4 = vsel %vm490_vm3, %v3875_v56, %v3876_v9  ;;  %v13614_v5 = vld [vmem:[#allocation2 + $0x160] sm:$0x3] }
 0x33d   : > { %v11201_v12 = vpop.eup %11200  ;;  %v13594_v49 = vld [vmem:[#allocation2 + $0x150] sm:$0xff]  ;;  %v13596_v8 = vld [vmem:[#allocation2 + $0x158] sm:$0xff]  ;;  %9944 = vmatprep.mubr.msk.f32.mxu1 %vm3618_vm5, %v13583_v59  ;;  %15450 = vst [vmem:[#allocation51_spill] sm:$0xff] %v13606_v32  ;;  %15451 = vst [vmem:[#allocation52_spill] sm:$0xff] %v13610_v4  ;;  %v3883_v20 = vrot.slane %v13614_v5, 1 }
 0x33e   : > { %15448 = vst [vmem:[#allocation49_spill] sm:$0xff] %v13590_v53  ;;  %3706 = vst.msk [vmem:[#allocation2 + $0x189] sm:$0xff] %vm3618_vm5, %v13590_v53  ;;  %v13601_v10 = vmul.f32 %v11201_v12, %v13289_v62  ;;  %v3880_v3 = vrot.slane %v13594_v49, 1  ;;  %v3881_v22 = vrot.slane %v13596_v8, 1  ;;  %v13627_v56 = vsel %vm490_vm3, %v3876_v9, %v3878_v17  ;;  %v13736_v59 = vld [vmem:[%s15107_s4 + $0x10] sm:$0xf] }
 0x33f   : > { %15452 = vst [vmem:[#allocation53_spill] sm:$0xff] %v13627_v56 }
 0x340   : > { %15449 = vst [vmem:[#allocation50_spill] sm:$0xff] %v13601_v10  ;;  %3705 = vst.msk [vmem:[#allocation2 + $0x181] sm:$0xff] %vm3618_vm5, %v13601_v10  ;;  %9945 = vmatmul.mubr.msk.f32.gmra.mrb[56].mxu1 %vm3618_vm5, %v13606_v32  ;;  %v13631_v6 = vsel %vm490_vm3, %v3880_v3, %v3881_v22  ;;  %v13635_v32 = vld [vmem:[#allocation2 + $0x178] sm:$0x3]  ;;  %v13642_v9 = vsel %vm490_vm3, %v3881_v22, %v3883_v20  ;;  %v8519_v22 = vld [vmem:[%s15107_s4 + $0xc] sm:$0xf] }
 0x341   : > { %v13620_v62 = vld [vmem:[#allocation2 + $0x168] sm:$0xff]  ;;  %v13622_v12 = vld [vmem:[#allocation2 + $0x170] sm:$0xff]  ;;  %9947 = vmatprep.mubr.msk.f32.mxu1 %vm3618_vm5, %v13610_v4  ;;  %15453 = vst [vmem:[#allocation54_spill] sm:$0xff] %v13631_v6  ;;  %15454 = vst [vmem:[#allocation55_spill] sm:$0xff] %v13642_v9  ;;  %v3888_v17 = vrot.slane %v13635_v32, 1 }
 0x342   : > { %v3885_v53 = vrot.slane %v13620_v62, 1  ;;  %v3886_v10 = vrot.slane %v13622_v12, 1  ;;  %v11588_v20 = vld [vmem:[%s15107_s4 + $0x8] sm:$0xf] }
 0x344   : > { %9948 = vmatmul.mubr.msk.f32.gmra.mrb[58].mxu1 %vm3618_vm5, %v13627_v56  ;;  %v13646_v3 = vsel %vm490_vm3, %v3885_v53, %v3886_v10  ;;  %v13653_v4 = vsel %vm490_vm3, %v3886_v10, %v3888_v17  ;;  %v11587_v53 = vld [vmem:[#allocation2 + $0x8] sm:$0xff]  ;;  %v4483_v56 = vrot.slane %v13277_v51, 2 }
 0x345   : > { %9950 = vmatprep.mubr.msk.f32.mxu1 %vm3618_vm5, %v13631_v6  ;;  %15455 = vst [vmem:[#allocation56_spill] sm:$0xff] %v13646_v3  ;;  %15456 = vst [vmem:[#allocation57_spill] sm:$0xff] %v13653_v4  ;;  %v11586_v6 = vld [vmem:[#allocation2] sm:$0xff]  ;;  %v4478_v17 = vrot.slane %v11587_v53, 2 }
 0x346   : > { %v4477_v10 = vrot.slane %v11586_v6, 2 }
 0x348   : > { %9951 = vmatmul.mubr.msk.f32.gmra.mrb[60].mxu1 %vm3618_vm5, %v13642_v9  ;;  %v4482_v9 = vrot.slane %v13269_v14, 2 }
 0x349   : > { %9953 = vmatprep.mubr.msk.f32.mxu1 %vm3618_vm5, %v13646_v3  ;;  %v4479_v3 = vsel %vm1159_vm2, %v4477_v10, %v4478_v17 }
 0x34a   : > { %v13740_v10 = vsel %vm1159_vm2, %v4482_v9, %v4483_v56 }
 0x34c   : > { %9954 = vmatmul.mubr.msk.f32.gmra.mrb[62].mxu1 %vm3618_vm5, %v13653_v4 }
 0x34d   : > { %9958 = vmatprep.mubr.msk.f32.mxu1 %vm3618_vm5, %v11586_v6 }
 0x350   : > { %9959 = vmatmul.mubr.msk.f32.vlgmr.msra.gmra.mrb[32].mxu1 %vm3618_vm5, %v11587_v53  ;;  %v4485_v53 = vrot.slane %v13292_v58, 2 }
 0x351   : > { %10007 = vmatpush3.msk.msra.mxu1 %vm3956_vm4, %v11588_v20  ;;  %9961 = vmatprep.mubr.msk.f32.mxu1 %vm3618_vm5, %v13269_v14  ;;  %v11589_v20 = vld [vmem:[#allocation2 + $0x10] sm:$0x3] }
 0x352   : > { %10056 = vmatprep.subr.msk.mxu1 %vm3956_vm4, %v8519_v22  ;;  %v4480_v4 = vrot.slane %v11589_v20, 2  ;;  %v4487_v20 = vrot.slane %v13303_v1, 2  ;;  %v13750_v58 = vsel %vm1159_vm2, %v4483_v56, %v4485_v53  ;;  %v4495_v56 = vrot.slane %v13337_v27, 2 }
 0x353   : > { %v4498_v53 = vrot.slane %v13344_v55, 2 }
 0x354   : > { %9962 = vmatmul.mubr.msk.f32.gmra.mrb[34].mxu1 %vm3618_vm5, %v13277_v51  ;;  %v4481_v6 = vsel %vm1159_vm2, %v4478_v17, %v4480_v4  ;;  %v4490_v4 = vrot.slane %v13317_v24, 2  ;;  %v13756_v9 = vsel %vm1159_vm2, %v4487_v20, %v4488_v41 }
 0x355   : > { %9964 = vmatprep.mubr.msk.f32.mxu1 %vm3618_vm5, %v13303_v1 }
 0x356   : > { %v13763_v17 = vsel %vm1159_vm2, %v4488_v41, %v4490_v4  ;;  %v4500_v41 = vrot.slane %v13353_v44, 2  ;;  %v4502_v4 = vrot.slane %v13355_v35, 2 }
 0x358   : > { %9965 = vmatmul.mubr.msk.f32.gmra.mrb[36].mxu1 %vm3618_vm5, %v13308_v21 }
 0x359   : > { %9967 = vmatprep.mubr.msk.f32.mxu1 %vm3618_vm5, %v13330_v50 }
 0x35c   : > { %9968 = vmatmul.mubr.msk.f32.gmra.mrb[38].mxu1 %vm3618_vm5, %v13332_v13 }
 0x35d   : > { %9970 = vmatprep.mubr.msk.f32.mxu1 %vm3618_vm5, %v13339_v26 }
 0x360   : > { %9971 = vmatmul.mubr.msk.f32.gmra.mrb[40].mxu1 %vm3618_vm5, %v13344_v55 }
 0x361   : > { %9973 = vmatprep.mubr.msk.f32.mxu1 %vm3618_vm5, %v13355_v35 }
 0x364   : > { %9974 = vmatmul.mubr.msk.f32.gmra.mrb[42].mxu1 %vm3618_vm5, %v13359_v47 }
 0x365   : > { %9976 = vmatprep.mubr.msk.f32.mxu1 %vm3618_vm5, %v13383_v52 }
 0x368   : > { %9977 = vmatmul.mubr.msk.f32.gmra.mrb[44].mxu1 %vm3618_vm5, %v13385_v31 }
 0x369   : > { %9979 = vmatprep.mubr.msk.f32.mxu1 %vm3618_vm5, %v13413_v11 }
 0x36c   : > { %9980 = vmatmul.mubr.msk.f32.gmra.mrb[46].mxu1 %vm3618_vm5, %v13417_v57 }
 0x36d   : > { %9982 = vmatprep.mubr.msk.f32.mxu1 %vm3618_vm5, %v13443_v0 }
 0x370   : > { %9983 = vmatmul.mubr.msk.f32.gmra.mrb[48].mxu1 %vm3618_vm5, %v13445_v43 }
 0x371   : > { %9985 = vmatprep.mubr.msk.f32.mxu1 %vm3618_vm5, %v13466_v42 }
 0x374   : > { %9986 = vmatmul.mubr.msk.f32.gmra.mrb[50].mxu1 %vm3618_vm5, %v13468_v2 }
 0x375   : > { %9988 = vmatprep.mubr.msk.f32.mxu1 %vm3618_vm5, %v13486_v34 }
 0x378   : > { %9989 = vmatmul.mubr.msk.f32.gmra.mrb[52].mxu1 %vm3618_vm5, %v13488_v28 }
 0x379   : > { %9991 = vmatprep.mubr.msk.f32.mxu1 %vm3618_vm5, %v13512_v46 }
 0x37c   : > { %9992 = vmatmul.mubr.msk.f32.gmra.mrb[54].mxu1 %vm3618_vm5, %v13514_v54 }
 0x37d   : > { %9994 = vmatprep.mubr.msk.f32.mxu1 %vm3618_vm5, %v13537_v45 }
 0x380   : > { %9995 = vmatmul.mubr.msk.f32.gmra.mrb[56].mxu1 %vm3618_vm5, %v13539_v19 }
 0x381   : > { %9997 = vmatprep.mubr.msk.f32.mxu1 %vm3618_vm5, %v13568_v25 }
 0x384   : > { %9998 = vmatmul.mubr.msk.f32.gmra.mrb[58].mxu1 %vm3618_vm5, %v13570_v40 }
 0x385   : > { %10000 = vmatprep.mubr.msk.f32.mxu1 %vm3618_vm5, %v13594_v49 }
 0x388   : > { %10001 = vmatmul.mubr.msk.f32.gmra.mrb[60].mxu1 %vm3618_vm5, %v13596_v8 }
 0x389   : > { %10003 = vmatprep.mubr.msk.f32.mxu1 %vm3618_vm5, %v13620_v62 }
 0x38c   : > { %10004 = vmatmul.mubr.msk.f32.gmra.mrb[62].mxu1 %vm3618_vm5, %v13622_v12 }
 0x38d   : > { %10008 = vmatprep.mubr.msk.f32.mxu1 %vm3618_vm5, %v4479_v3  ;;  %v4492_v3 = vrot.slane %v13330_v50, 2 }
 0x390   : > { %10009 = vmatmul.mubr.msk.f32.vlgmr.msra.gmra.mrb[32].mxu1 %vm3618_vm5, %v4481_v6  ;;  %v4497_v6 = vrot.slane %v13339_v26, 2 }
 0x391   : > { %10057 = vmatpush3.msk.msra.mxu1 %vm3956_vm4, %v8519_v22  ;;  %10011 = vmatprep.mubr.msk.f32.mxu1 %vm3618_vm5, %v13740_v10  ;;  %v4493_v22 = vrot.slane %v13332_v13, 2 }
 0x392   : > { %10106 = vmatprep.subr.msk.mxu1 %vm3956_vm4, %v13736_v59  ;;  %v13782_v27 = vsel %vm1159_vm2, %v4497_v6, %v4498_v53  ;;  %v4508_v6 = vrot.slane %v13385_v31, 2 }
 0x393   : > { %v13769_v24 = vsel %vm1159_vm2, %v4492_v3, %v4493_v22  ;;  %v13776_v20 = vsel %vm1159_vm2, %v4493_v22, %v4495_v56  ;;  %15458 = vst [vmem:[#allocation59_spill] sm:$0xff] %v13782_v27  ;;  %v4503_v3 = vrot.slane %v13359_v47, 2  ;;  %v4505_v22 = vrot.slane %v13381_v38, 2 }
 0x394   : > { %10012 = vmatmul.mubr.msk.f32.gmra.mrb[34].mxu1 %vm3618_vm5, %v13750_v58  ;;  %15457 = vst [vmem:[#allocation58_spill] sm:$0xff] %v13769_v24  ;;  %v4507_v56 = vrot.slane %v13383_v52, 2 }
 0x395   : > { %10014 = vmatprep.mubr.msk.f32.mxu1 %vm3618_vm5, %v13756_v9  ;;  %v13795_v44 = vsel %vm1159_vm2, %v4502_v4, %v4503_v3  ;;  %v4513_v4 = vrot.slane %v13417_v57, 2 }
 0x396   : > { %15459 = vst [vmem:[#allocation60_spill] sm:$0xff] %v13795_v44  ;;  %v13808_v38 = vsel %vm1159_vm2, %v4507_v56, %v4508_v6  ;;  %v4518_v56 = vrot.slane %v13445_v43, 2 }
 0x397   : > { %15460 = vst [vmem:[#allocation61_spill] sm:$0xff] %v13808_v38 }
 0x398   : > { %10015 = vmatmul.mubr.msk.f32.gmra.mrb[36].mxu1 %vm3618_vm5, %v13763_v17 }
 0x399   : > { %10017 = vmatprep.mubr.msk.f32.mxu1 %vm3618_vm5, %v13769_v24  ;;  %v13789_v24 = vsel %vm1159_vm2, %v4498_v53, %v4500_v41  ;;  %v4510_v53 = vrot.slane %v13404_v63, 2  ;;  %v4512_v41 = vrot.slane %v13413_v11, 2 }
 0x39b   : > { %v13821_v63 = vsel %vm1159_vm2, %v4512_v41, %v4513_v4  ;;  %v4523_v41 = vrot.slane %v13468_v2, 2 }
 0x39c   : > { %10018 = vmatmul.mubr.msk.f32.gmra.mrb[38].mxu1 %vm3618_vm5, %v13776_v20  ;;  %15461 = vst [vmem:[#allocation62_spill] sm:$0xff] %v13821_v63 }
 0x39d   : > { %10020 = vmatprep.mubr.msk.f32.mxu1 %vm3618_vm5, %v13782_v27  ;;  %v13802_v27 = vsel %vm1159_vm2, %v4503_v3, %v4505_v22  ;;  %v4515_v3 = vrot.slane %v13438_v36, 2  ;;  %v4517_v22 = vrot.slane %v13443_v0, 2 }
 0x39f   : > { %v13834_v36 = vsel %vm1159_vm2, %v4517_v22, %v4518_v56  ;;  %v4528_v22 = vrot.slane %v13488_v28, 2 }
 0x3a0   : > { %10021 = vmatmul.mubr.msk.f32.gmra.mrb[40].mxu1 %vm3618_vm5, %v13789_v24  ;;  %15462 = vst [vmem:[#allocation63_spill] sm:$0xff] %v13834_v36 }
 0x3a1   : > { %10023 = vmatprep.mubr.msk.f32.mxu1 %vm3618_vm5, %v13795_v44  ;;  %v13815_v44 = vsel %vm1159_vm2, %v4508_v6, %v4510_v53  ;;  %v4520_v6 = vrot.slane %v13459_v16, 2  ;;  %v4522_v53 = vrot.slane %v13466_v42, 2 }
 0x3a3   : > { %v13847_v16 = vsel %vm1159_vm2, %v4522_v53, %v4523_v41  ;;  %v4533_v53 = vrot.slane %v13514_v54, 2 }
 0x3a4   : > { %10024 = vmatmul.mubr.msk.f32.gmra.mrb[42].mxu1 %vm3618_vm5, %v13802_v27  ;;  %15463 = vst [vmem:[#allocation64_spill] sm:$0xff] %v13847_v16 }
 0x3a5   : > { %10026 = vmatprep.mubr.msk.f32.mxu1 %vm3618_vm5, %v13808_v38  ;;  %v13828_v38 = vsel %vm1159_vm2, %v4513_v4, %v4515_v3  ;;  %v4525_v4 = vrot.slane %v13484_v30, 2  ;;  %v4527_v3 = vrot.slane %v13486_v34, 2 }
 0x3a7   : > { %v13860_v30 = vsel %vm1159_vm2, %v4527_v3, %v4528_v22  ;;  %v4538_v3 = vrot.slane %v13539_v19, 2 }
 0x3a8   : > { %10027 = vmatmul.mubr.msk.f32.gmra.mrb[44].mxu1 %vm3618_vm5, %v13815_v44  ;;  %15464 = vst [vmem:[#allocation65_spill] sm:$0xff] %v13860_v30 }
 0x3a9   : > { %10029 = vmatprep.mubr.msk.f32.mxu1 %vm3618_vm5, %v13821_v63  ;;  %v13841_v63 = vsel %vm1159_vm2, %v4518_v56, %v4520_v6  ;;  %v4530_v56 = vrot.slane %v13508_v60, 2  ;;  %v4532_v6 = vrot.slane %v13512_v46, 2 }
 0x3ab   : > { %v13873_v60 = vsel %vm1159_vm2, %v4532_v6, %v4533_v53  ;;  %v4543_v6 = vrot.slane %v13570_v40, 2 }
 0x3ac   : > { %10030 = vmatmul.mubr.msk.f32.gmra.mrb[46].mxu1 %vm3618_vm5, %v13828_v38  ;;  %15466 = vst [vmem:[#allocation67_spill] sm:$0xff] %v13873_v60 }
 0x3ad   : > { %10032 = vmatprep.mubr.msk.f32.mxu1 %vm3618_vm5, %v13834_v36  ;;  %v13854_v36 = vsel %vm1159_vm2, %v4523_v41, %v4525_v4  ;;  %v4535_v41 = vrot.slane %v13532_v15, 2  ;;  %v4537_v4 = vrot.slane %v13537_v45, 2 }
 0x3af   : > { %v13886_v15 = vsel %vm1159_vm2, %v4537_v4, %v4538_v3  ;;  %v4548_v4 = vrot.slane %v13596_v8, 2 }
 0x3b0   : > { %10033 = vmatmul.mubr.msk.f32.gmra.mrb[48].mxu1 %vm3618_vm5, %v13841_v63  ;;  %15467 = vst [vmem:[#allocation68_spill] sm:$0xff] %v13886_v15 }
 0x3b1   : > { %10035 = vmatprep.mubr.msk.f32.mxu1 %vm3618_vm5, %v13847_v16  ;;  %v13867_v16 = vsel %vm1159_vm2, %v4528_v22, %v4530_v56  ;;  %v4540_v22 = vrot.slane %v13563_v48, 2  ;;  %v4542_v56 = vrot.slane %v13568_v25, 2 }
 0x3b2   : > { %15465 = vst [vmem:[#allocation66_spill] sm:$0xff] %v13867_v16 }
 0x3b3   : > { %v13899_v48 = vsel %vm1159_vm2, %v4542_v56, %v4543_v6  ;;  %v4553_v56 = vrot.slane %v13622_v12, 2 }
 0x3b4   : > { %10036 = vmatmul.mubr.msk.f32.gmra.mrb[50].mxu1 %vm3618_vm5, %v13854_v36  ;;  %15469 = vst [vmem:[#allocation70_spill] sm:$0xff] %v13899_v48 }
 0x3b5   : > { %10038 = vmatprep.mubr.msk.f32.mxu1 %vm3618_vm5, %v13860_v30  ;;  %v13880_v30 = vsel %vm1159_vm2, %v4533_v53, %v4535_v41  ;;  %v4545_v53 = vrot.slane %v13587_v29, 2  ;;  %v4547_v41 = vrot.slane %v13594_v49, 2 }
 0x3b7   : > { %v13912_v29 = vsel %vm1159_vm2, %v4547_v41, %v4548_v4  ;;  %v15477_v41 = vld [vmem:[#allocation20_spill] sm:$0xff] }
 0x3b8   : > { %10039 = vmatmul.mubr.msk.f32.gmra.mrb[52].mxu1 %vm3618_vm5, %v13867_v16  ;;  %15470 = vst [vmem:[#allocation71_spill] sm:$0xff] %v13912_v29 }
 0x3b9   : > { %10041 = vmatprep.mubr.msk.f32.mxu1 %vm3618_vm5, %v13873_v60  ;;  %v13893_v60 = vsel %vm1159_vm2, %v4538_v3, %v4540_v22  ;;  %v4550_v3 = vrot.slane %v13614_v5, 2  ;;  %v4552_v22 = vrot.slane %v13620_v62, 2 }
 0x3ba   : > { %15468 = vst [vmem:[#allocation69_spill] sm:$0xff] %v13893_v60 }
 0x3bb   : > { %v13925_v5 = vsel %vm1159_vm2, %v4552_v22, %v4553_v56  ;;  %v15480_v22 = vld [vmem:[#allocation23_spill] sm:$0xff] }
 0x3bc   : > { %10042 = vmatmul.mubr.msk.f32.gmra.mrb[54].mxu1 %vm3618_vm5, %v13880_v30 }
 0x3bd   : > { %10044 = vmatprep.mubr.msk.f32.mxu1 %vm3618_vm5, %v13886_v15  ;;  %v13906_v15 = vsel %vm1159_vm2, %v4543_v6, %v4545_v53  ;;  %v4555_v6 = vrot.slane %v13635_v32, 2  ;;  %v8587_v32 = vld [vmem:[%s15107_s4 + $0x14] sm:$0xf] }
 0x3bf   : > { %v13930_v53 = vsel %vm1159_vm2, %v4553_v56, %v4555_v6  ;;  %v15481_v56 = vld [vmem:[#allocation24_spill] sm:$0xff]  ;;  %v15482_v6 = vld [vmem:[#allocation26_spill] sm:$0xff] }
 0x3c0   : > { %10045 = vmatmul.mubr.msk.f32.gmra.mrb[56].mxu1 %vm3618_vm5, %v13893_v60  ;;  %15472 = vst [vmem:[#allocation73_spill] sm:$0xff] %v13930_v53 }
 0x3c1   : > { %10047 = vmatprep.mubr.msk.f32.mxu1 %vm3618_vm5, %v13899_v48  ;;  %v13919_v48 = vsel %vm1159_vm2, %v4548_v4, %v4550_v3  ;;  %v15478_v4 = vld [vmem:[#allocation21_spill] sm:$0xff]  ;;  %v15479_v3 = vld [vmem:[#allocation22_spill] sm:$0xff] }
 0x3c2   : > { %15471 = vst [vmem:[#allocation72_spill] sm:$0xff] %v13919_v48 }
 0x3c4   : > { %10048 = vmatmul.mubr.msk.f32.gmra.mrb[58].mxu1 %vm3618_vm5, %v13906_v15 }
 0x3c5   : > { %10050 = vmatprep.mubr.msk.f32.mxu1 %vm3618_vm5, %v13912_v29 }
 0x3c8   : > { %10051 = vmatmul.mubr.msk.f32.gmra.mrb[60].mxu1 %vm3618_vm5, %v13919_v48 }
 0x3c9   : > { %10053 = vmatprep.mubr.msk.f32.mxu1 %vm3618_vm5, %v13925_v5 }
 0x3cc   : > { %10054 = vmatmul.mubr.msk.f32.gmra.mrb[62].mxu1 %vm3618_vm5, %v13930_v53 }
 0x3cd   : > { %10058 = vmatprep.mubr.msk.f32.mxu1 %vm3618_vm5, %v13269_v14  ;;  %v14000_v14 = vld [vmem:[#allocation2 + $0x180] sm:$0xff] }
 0x3d0   : > { %10059 = vmatmul.mubr.msk.f32.vlgmr.msra.gmra.mrb[32].mxu1 %vm3618_vm5, %v13277_v51  ;;  %v14004_v51 = vld [vmem:[#allocation2 + $0x188] sm:$0xff] }
 0x3d1   : > { %10107 = vmatpush3.msk.msra.mxu1 %vm3956_vm4, %v13736_v59  ;;  %10061 = vmatprep.mubr.msk.f32.mxu1 %vm3618_vm5, %v13303_v1  ;;  %v8621_v1 = vld [vmem:[%s15107_s4 + $0x18] sm:$0xf]  ;;  %v15476_v59 = vld [vmem:[#allocation19_spill] sm:$0xff] }
 0x3d2   : > { %10156 = vmatprep.subr.msk.mxu1 %vm3956_vm4, %v8587_v32 }
 0x3d4   : > { %10062 = vmatmul.mubr.msk.f32.gmra.mrb[34].mxu1 %vm3618_vm5, %v13308_v21  ;;  %v15473_v21 = vld [vmem:[#allocation14_spill] sm:$0xff] }
 0x3d5   : > { %10064 = vmatprep.mubr.msk.f32.mxu1 %vm3618_vm5, %v13330_v50 }
 0x3d8   : > { %10065 = vmatmul.mubr.msk.f32.gmra.mrb[36].mxu1 %vm3618_vm5, %v13332_v13 }
 0x3d9   : > { %10067 = vmatprep.mubr.msk.f32.mxu1 %vm3618_vm5, %v13339_v26 }
 0x3dc   : > { %10068 = vmatmul.mubr.msk.f32.gmra.mrb[38].mxu1 %vm3618_vm5, %v13344_v55 }
 0x3dd   : > { %10070 = vmatprep.mubr.msk.f32.mxu1 %vm3618_vm5, %v13355_v35 }
 0x3e0   : > { %10071 = vmatmul.mubr.msk.f32.gmra.mrb[40].mxu1 %vm3618_vm5, %v13359_v47 }
 0x3e1   : > { %10073 = vmatprep.mubr.msk.f32.mxu1 %vm3618_vm5, %v13383_v52 }
 0x3e4   : > { %10074 = vmatmul.mubr.msk.f32.gmra.mrb[42].mxu1 %vm3618_vm5, %v13385_v31 }
 0x3e5   : > { %10076 = vmatprep.mubr.msk.f32.mxu1 %vm3618_vm5, %v13413_v11 }
 0x3e8   : > { %10077 = vmatmul.mubr.msk.f32.gmra.mrb[44].mxu1 %vm3618_vm5, %v13417_v57 }
 0x3e9   : > { %10079 = vmatprep.mubr.msk.f32.mxu1 %vm3618_vm5, %v13443_v0 }
 0x3ec   : > { %10080 = vmatmul.mubr.msk.f32.gmra.mrb[46].mxu1 %vm3618_vm5, %v13445_v43 }
 0x3ed   : > { %10082 = vmatprep.mubr.msk.f32.mxu1 %vm3618_vm5, %v13466_v42 }
 0x3f0   : > { %10083 = vmatmul.mubr.msk.f32.gmra.mrb[48].mxu1 %vm3618_vm5, %v13468_v2 }
 0x3f1   : > { %10085 = vmatprep.mubr.msk.f32.mxu1 %vm3618_vm5, %v13486_v34 }
 0x3f4   : > { %10086 = vmatmul.mubr.msk.f32.gmra.mrb[50].mxu1 %vm3618_vm5, %v13488_v28 }
 0x3f5   : > { %10088 = vmatprep.mubr.msk.f32.mxu1 %vm3618_vm5, %v13512_v46 }
 0x3f8   : > { %10089 = vmatmul.mubr.msk.f32.gmra.mrb[52].mxu1 %vm3618_vm5, %v13514_v54 }
 0x3f9   : > { %10091 = vmatprep.mubr.msk.f32.mxu1 %vm3618_vm5, %v13537_v45 }
 0x3fc   : > { %10092 = vmatmul.mubr.msk.f32.gmra.mrb[54].mxu1 %vm3618_vm5, %v13539_v19 }
 0x3fd   : > { %10094 = vmatprep.mubr.msk.f32.mxu1 %vm3618_vm5, %v13568_v25 }
 0x400   : > { %10095 = vmatmul.mubr.msk.f32.gmra.mrb[56].mxu1 %vm3618_vm5, %v13570_v40 }
 0x401   : > { %10097 = vmatprep.mubr.msk.f32.mxu1 %vm3618_vm5, %v13594_v49 }
 0x404   : > { %10098 = vmatmul.mubr.msk.f32.gmra.mrb[58].mxu1 %vm3618_vm5, %v13596_v8 }
 0x405   : > { %10100 = vmatprep.mubr.msk.f32.mxu1 %vm3618_vm5, %v13620_v62 }
 0x408   : > { %10101 = vmatmul.mubr.msk.f32.gmra.mrb[60].mxu1 %vm3618_vm5, %v13622_v12 }
 0x409   : > { %10103 = vmatprep.mubr.msk.f32.mxu1 %vm3618_vm5, %v14000_v14 }
 0x40c   : > { %10104 = vmatmul.mubr.msk.f32.gmra.mrb[62].mxu1 %vm3618_vm5, %v14004_v51 }
 0x40d   : > { %10108 = vmatprep.mubr.msk.f32.mxu1 %vm3618_vm5, %v13314_v23  ;;  %v15474_v23 = vld [vmem:[#allocation15_spill] sm:$0xff] }
 0x410   : > { %10109 = vmatmul.mubr.msk.f32.vlgmr.msra.gmra.mrb[32].mxu1 %vm3618_vm5, %v13327_v7  ;;  %v15475_v7 = vld [vmem:[#allocation17_spill] sm:$0xff] }
 0x411   : > { %10157 = vmatpush3.msk.msra.mxu1 %vm3956_vm4, %v8587_v32  ;;  %10111 = vmatprep.mubr.msk.f32.mxu1 %vm3618_vm5, %v13342_v18  ;;  %v15483_v32 = vld [vmem:[#allocation27_spill] sm:$0xff] }
 0x412   : > { %10206 = vmatprep.subr.msk.mxu1 %vm3956_vm4, %v8621_v1 }
 0x414   : > { %10112 = vmatmul.mubr.msk.f32.gmra.mrb[34].mxu1 %vm3618_vm5, %v13349_v33 }
 0x415   : > { %10114 = vmatprep.mubr.msk.f32.mxu1 %vm3618_vm5, %v13364_v37 }
 0x418   : > { %10115 = vmatmul.mubr.msk.f32.gmra.mrb[36].mxu1 %vm3618_vm5, %v13370_v39 }
 0x419   : > { %10117 = vmatprep.mubr.msk.f32.mxu1 %vm3618_vm5, %v13378_v61 }
 0x41c   : > { %10118 = vmatmul.mubr.msk.f32.gmra.mrb[38].mxu1 %vm3618_vm5, %v15473_v21 }
 0x41d   : > { %10120 = vmatprep.mubr.msk.f32.mxu1 %vm3618_vm5, %v15474_v23  ;;  %v15495_v23 = vld [vmem:[#allocation57_spill] sm:$0xff] }
 0x420   : > { %10121 = vmatmul.mubr.msk.f32.gmra.mrb[40].mxu1 %vm3618_vm5, %v15475_v7  ;;  %v15494_v7 = vld [vmem:[#allocation56_spill] sm:$0xff] }
 0x421   : > { %10123 = vmatprep.mubr.msk.f32.mxu1 %vm3618_vm5, %v15476_v59  ;;  %v15484_v59 = vld [vmem:[#allocation28_spill] sm:$0xff] }
 0x424   : > { %10124 = vmatmul.mubr.msk.f32.gmra.mrb[42].mxu1 %vm3618_vm5, %v15477_v41  ;;  %v15485_v41 = vld [vmem:[#allocation32_spill] sm:$0xff] }
 0x425   : > { %10126 = vmatprep.mubr.msk.f32.mxu1 %vm3618_vm5, %v15478_v4  ;;  %v15486_v4 = vld [vmem:[#allocation45_spill] sm:$0xff] }
 0x428   : > { %10127 = vmatmul.mubr.msk.f32.gmra.mrb[44].mxu1 %vm3618_vm5, %v15479_v3  ;;  %v15487_v3 = vld [vmem:[#allocation47_spill] sm:$0xff] }
 0x429   : > { %10129 = vmatprep.mubr.msk.f32.mxu1 %vm3618_vm5, %v15480_v22  ;;  %v15488_v22 = vld [vmem:[#allocation48_spill] sm:$0xff] }
 0x42c   : > { %10130 = vmatmul.mubr.msk.f32.gmra.mrb[46].mxu1 %vm3618_vm5, %v15481_v56  ;;  %v15489_v56 = vld [vmem:[#allocation51_spill] sm:$0xff] }
 0x42d   : > { %10132 = vmatprep.mubr.msk.f32.mxu1 %vm3618_vm5, %v15482_v6  ;;  %v15490_v6 = vld [vmem:[#allocation52_spill] sm:$0xff] }
 0x430   : > { %10133 = vmatmul.mubr.msk.f32.gmra.mrb[48].mxu1 %vm3618_vm5, %v15483_v32  ;;  %v15491_v32 = vld [vmem:[#allocation53_spill] sm:$0xff] }
 0x431   : > { %10135 = vmatprep.mubr.msk.f32.mxu1 %vm3618_vm5, %v15484_v59  ;;  %v15492_v59 = vld [vmem:[#allocation54_spill] sm:$0xff] }
 0x434   : > { %10136 = vmatmul.mubr.msk.f32.gmra.mrb[50].mxu1 %vm3618_vm5, %v15485_v41  ;;  %v5153_v41 = vrot.slane %v14004_v51, 1 }
 0x435   : > { %10138 = vmatprep.mubr.msk.f32.mxu1 %vm3618_vm5, %v15486_v4  ;;  %v5152_v4 = vrot.slane %v14000_v14, 1 }
 0x438   : > { %10139 = vmatmul.mubr.msk.f32.gmra.mrb[52].mxu1 %vm3618_vm5, %v15487_v3  ;;  %v15493_v3 = vld [vmem:[#allocation55_spill] sm:$0xff] }
 0x439   : > { %10141 = vmatprep.mubr.msk.f32.mxu1 %vm3618_vm5, %v15488_v22  ;;  %v3757_v22 = vld [vmem:[#allocation2 + $0x190] sm:$0x3] }
 0x43c   : > { %10142 = vmatmul.mubr.msk.f32.gmra.mrb[54].mxu1 %vm3618_vm5, %v15489_v56  ;;  %v5155_v56 = vrot.slane %v3757_v22, 1 }
 0x43d   : > { %10144 = vmatprep.mubr.msk.f32.mxu1 %vm3618_vm5, %v15490_v6 }
 0x440   : > { %10145 = vmatmul.mubr.msk.f32.gmra.mrb[56].mxu1 %vm3618_vm5, %v15491_v32  ;;  %v14076_v32 = vsel %vm490_vm3, %v5152_v4, %v5153_v41  ;;  %v15500_v4 = vld [vmem:[#allocation62_spill] sm:$0xff] }
 0x441   : > { %10147 = vmatprep.mubr.msk.f32.mxu1 %vm3618_vm5, %v15492_v59  ;;  %v14081_v59 = vsel %vm490_vm3, %v5153_v41, %v5155_v56  ;;  %v15496_v41 = vld [vmem:[#allocation58_spill] sm:$0xff]  ;;  %v15501_v56 = vld [vmem:[#allocation63_spill] sm:$0xff] }
 0x444   : > { %10148 = vmatmul.mubr.msk.f32.gmra.mrb[58].mxu1 %vm3618_vm5, %v15493_v3 }
 0x445   : > { %10150 = vmatprep.mubr.msk.f32.mxu1 %vm3618_vm5, %v15494_v7  ;;  %v8655_v7 = vld [vmem:[%s15107_s4 + $0x1c] sm:$0xf] }
 0x448   : > { %10151 = vmatmul.mubr.msk.f32.gmra.mrb[60].mxu1 %vm3618_vm5, %v15495_v23 }
 0x449   : > { %10153 = vmatprep.mubr.msk.f32.mxu1 %vm3618_vm5, %v14076_v32 }
 0x44c   : > { %10154 = vmatmul.mubr.msk.f32.gmra.mrb[62].mxu1 %vm3618_vm5, %v14081_v59 }
 0x44d   : > { %10158 = vmatprep.mubr.msk.f32.mxu1 %vm3618_vm5, %v13740_v10  ;;  %v15497_v10 = vld [vmem:[#allocation59_spill] sm:$0xff] }
 0x450   : > { %10159 = vmatmul.mubr.msk.f32.vlgmr.msra.gmra.mrb[32].mxu1 %vm3618_vm5, %v13750_v58  ;;  %v15498_v58 = vld [vmem:[#allocation60_spill] sm:$0xff] }
 0x451   : > { %10207 = vmatpush3.msk.msra.mxu1 %vm3956_vm4, %v8621_v1  ;;  %10161 = vmatprep.mubr.msk.f32.mxu1 %vm3618_vm5, %v13756_v9  ;;  %v15499_v1 = vld [vmem:[#allocation61_spill] sm:$0xff] }
 0x452   : > { %10256 = vmatprep.subr.msk.mxu1 %vm3956_vm4, %v8655_v7 }
 0x454   : > { %10162 = vmatmul.mubr.msk.f32.gmra.mrb[34].mxu1 %vm3618_vm5, %v13763_v17 }
 0x455   : > { %10164 = vmatprep.mubr.msk.f32.mxu1 %vm3618_vm5, %v15496_v41 }
 0x458   : > { %10165 = vmatmul.mubr.msk.f32.gmra.mrb[36].mxu1 %vm3618_vm5, %v13776_v20 }
 0x459   : > { %10167 = vmatprep.mubr.msk.f32.mxu1 %vm3618_vm5, %v15497_v10 }
 0x45c   : > { %10168 = vmatmul.mubr.msk.f32.gmra.mrb[38].mxu1 %vm3618_vm5, %v13789_v24 }
 0x45d   : > { %10170 = vmatprep.mubr.msk.f32.mxu1 %vm3618_vm5, %v15498_v58  ;;  %v15502_v58 = vld [vmem:[#allocation64_spill] sm:$0xff] }
 0x460   : > { %10171 = vmatmul.mubr.msk.f32.gmra.mrb[40].mxu1 %vm3618_vm5, %v13802_v27 }
 0x461   : > { %10173 = vmatprep.mubr.msk.f32.mxu1 %vm3618_vm5, %v15499_v1  ;;  %v15503_v1 = vld [vmem:[#allocation65_spill] sm:$0xff] }
 0x464   : > { %10174 = vmatmul.mubr.msk.f32.gmra.mrb[42].mxu1 %vm3618_vm5, %v13815_v44 }
 0x465   : > { %10176 = vmatprep.mubr.msk.f32.mxu1 %vm3618_vm5, %v15500_v4  ;;  %v15504_v4 = vld [vmem:[#allocation67_spill] sm:$0xff] }
 0x468   : > { %10177 = vmatmul.mubr.msk.f32.gmra.mrb[44].mxu1 %vm3618_vm5, %v13828_v38 }
 0x469   : > { %10179 = vmatprep.mubr.msk.f32.mxu1 %vm3618_vm5, %v15501_v56  ;;  %v15505_v56 = vld [vmem:[#allocation68_spill] sm:$0xff] }
 0x46c   : > { %10180 = vmatmul.mubr.msk.f32.gmra.mrb[46].mxu1 %vm3618_vm5, %v13841_v63 }
 0x46d   : > { %10182 = vmatprep.mubr.msk.f32.mxu1 %vm3618_vm5, %v15502_v58  ;;  %v15506_v58 = vld [vmem:[#allocation70_spill] sm:$0xff] }
 0x470   : > { %10183 = vmatmul.mubr.msk.f32.gmra.mrb[48].mxu1 %vm3618_vm5, %v13854_v36 }
 0x471   : > { %10185 = vmatprep.mubr.msk.f32.mxu1 %vm3618_vm5, %v15503_v1 }
 0x474   : > { %10186 = vmatmul.mubr.msk.f32.gmra.mrb[50].mxu1 %vm3618_vm5, %v13867_v16  ;;  %v5424_v16 = vrot.slane %v14004_v51, 2 }
 0x475   : > { %10188 = vmatprep.mubr.msk.f32.mxu1 %vm3618_vm5, %v15504_v4  ;;  %v5423_v4 = vrot.slane %v14000_v14, 2 }
 0x478   : > { %10189 = vmatmul.mubr.msk.f32.gmra.mrb[52].mxu1 %vm3618_vm5, %v13880_v30 }
 0x479   : > { %10191 = vmatprep.mubr.msk.f32.mxu1 %vm3618_vm5, %v15505_v56 }
 0x47c   : > { %10192 = vmatmul.mubr.msk.f32.gmra.mrb[54].mxu1 %vm3618_vm5, %v13893_v60  ;;  %v5426_v60 = vrot.slane %v3757_v22, 2  ;;  %v8689_v22 = vld [vmem:[%s15107_s4 + $0x20] sm:$0xf] }
 0x47d   : > { %10194 = vmatprep.mubr.msk.f32.mxu1 %vm3618_vm5, %v15506_v58  ;;  %v14153_v58 = vsel %vm1159_vm2, %v5423_v4, %v5424_v16 }
 0x480   : > { %10195 = vmatmul.mubr.msk.f32.gmra.mrb[56].mxu1 %vm3618_vm5, %v13906_v15 }
 0x481   : > { %10197 = vmatprep.mubr.msk.f32.mxu1 %vm3618_vm5, %v13912_v29  ;;  %v14158_v29 = vsel %vm1159_vm2, %v5424_v16, %v5426_v60 }
 0x484   : > { %10198 = vmatmul.mubr.msk.f32.gmra.mrb[58].mxu1 %vm3618_vm5, %v13919_v48  ;;  %v11590_v48 = vld [vmem:[#allocation2 + $0x30] sm:$0xff] }
 0x485   : > { %10200 = vmatprep.mubr.msk.f32.mxu1 %vm3618_vm5, %v13925_v5 }
 0x488   : > { %10201 = vmatmul.mubr.msk.f32.gmra.mrb[60].mxu1 %vm3618_vm5, %v13930_v53  ;;  %v11591_v53 = vld [vmem:[#allocation2 + $0x38] sm:$0xff] }
 0x489   : > { %10203 = vmatprep.mubr.msk.f32.mxu1 %vm3618_vm5, %v14153_v58 }
 0x48c   : > { %10204 = vmatmul.mubr.msk.f32.gmra.mrb[62].mxu1 %vm3618_vm5, %v14158_v29 }
 0x48d   : > { %10208 = vmatprep.mubr.msk.f32.mxu1 %vm3618_vm5, %v11590_v48 }
 0x490   : > { %10209 = vmatmul.mubr.msk.f32.vlgmr.msra.gmra.mrb[32].mxu1 %vm3618_vm5, %v11591_v53 }
 0x491   : > { %10257 = vmatpush3.msk.msra.mxu1 %vm3956_vm4, %v8655_v7  ;;  %10211 = vmatprep.mubr.msk.f32.mxu1 %vm3618_vm5, %v13330_v50  ;;  %v15508_v50 = vld [vmem:[#allocation17_spill] sm:$0xff] }
 0x492   : > { %10306 = vmatprep.subr.msk.mxu1 %vm3956_vm4, %v8689_v22 }
 0x494   : > { %10212 = vmatmul.mubr.msk.f32.gmra.mrb[34].mxu1 %vm3618_vm5, %v13332_v13  ;;  %v15509_v13 = vld [vmem:[#allocation19_spill] sm:$0xff] }
 0x495   : > { %10214 = vmatprep.mubr.msk.f32.mxu1 %vm3618_vm5, %v13339_v26  ;;  %v15510_v26 = vld [vmem:[#allocation20_spill] sm:$0xff] }
 0x498   : > { %10215 = vmatmul.mubr.msk.f32.gmra.mrb[36].mxu1 %vm3618_vm5, %v13344_v55  ;;  %v15512_v55 = vld [vmem:[#allocation22_spill] sm:$0xff] }
 0x499   : > { %10217 = vmatprep.mubr.msk.f32.mxu1 %vm3618_vm5, %v13355_v35  ;;  %v15514_v35 = vld [vmem:[#allocation24_spill] sm:$0xff] }
 0x49c   : > { %10218 = vmatmul.mubr.msk.f32.gmra.mrb[38].mxu1 %vm3618_vm5, %v13359_v47  ;;  %v15515_v47 = vld [vmem:[#allocation26_spill] sm:$0xff] }
 0x49d   : > { %10220 = vmatprep.mubr.msk.f32.mxu1 %vm3618_vm5, %v13383_v52  ;;  %v15519_v52 = vld [vmem:[#allocation45_spill] sm:$0xff] }
 0x4a0   : > { %10221 = vmatmul.mubr.msk.f32.gmra.mrb[40].mxu1 %vm3618_vm5, %v13385_v31  ;;  %v15520_v31 = vld [vmem:[#allocation47_spill] sm:$0xff] }
 0x4a1   : > { %10223 = vmatprep.mubr.msk.f32.mxu1 %vm3618_vm5, %v13413_v11  ;;  %v15521_v11 = vld [vmem:[#allocation48_spill] sm:$0xff] }
 0x4a4   : > { %10224 = vmatmul.mubr.msk.f32.gmra.mrb[42].mxu1 %vm3618_vm5, %v13417_v57  ;;  %v15507_v57 = vld [vmem:[#allocation15_spill] sm:$0xff] }
 0x4a5   : > { %10226 = vmatprep.mubr.msk.f32.mxu1 %vm3618_vm5, %v13443_v0  ;;  %v6936_v0 = vld [vmem:[%s15111_s8] sm:$0xf] }
 0x4a6   : > { %10356 = vmatprep.subr.msk.mxu0 %vm3956_vm4, %v6936_v0 }
 0x4a7   : > { %10357 = vmatpush3.msk.msra.mxu0 %vm3956_vm4, %v6936_v0 }
 0x4a8   : > { %10227 = vmatmul.mubr.msk.f32.gmra.mrb[44].mxu1 %vm3618_vm5, %v13445_v43  ;;  %v15522_v43 = vld [vmem:[#allocation51_spill] sm:$0xff] }
 0x4a9   : > { %10229 = vmatprep.mubr.msk.f32.mxu1 %vm3618_vm5, %v13466_v42  ;;  %v15523_v42 = vld [vmem:[#allocation53_spill] sm:$0xff] }
 0x4ac   : > { %10230 = vmatmul.mubr.msk.f32.gmra.mrb[46].mxu1 %vm3618_vm5, %v13468_v2  ;;  %v14223_v2 = vld [vmem:[#allocation2 + $0x198] sm:$0xff] }
 0x4ad   : > { %10232 = vmatprep.mubr.msk.f32.mxu1 %vm3618_vm5, %v13486_v34  ;;  %v15524_v34 = vld [vmem:[#allocation54_spill] sm:$0xff] }
 0x4b0   : > { %10233 = vmatmul.mubr.msk.f32.gmra.mrb[48].mxu1 %vm3618_vm5, %v13488_v28  ;;  %v14229_v28 = vld [vmem:[#allocation2 + $0x1a0] sm:$0xff] }
 0x4b1   : > { %10235 = vmatprep.mubr.msk.f32.mxu1 %vm3618_vm5, %v13512_v46  ;;  %v15525_v46 = vld [vmem:[#allocation56_spill] sm:$0xff]  ;;  %v6235_v16 = vrot.slane %v14229_v28, 2 }
 0x4b4   : > { %10236 = vmatmul.mubr.msk.f32.gmra.mrb[50].mxu1 %vm3618_vm5, %v13514_v54  ;;  %v5963_v54 = vrot.slane %v14223_v2, 1 }
 0x4b5   : > { %10238 = vmatprep.mubr.msk.f32.mxu1 %vm3618_vm5, %v13537_v45  ;;  %v5964_v45 = vrot.slane %v14229_v28, 1 }
 0x4b8   : > { %10239 = vmatmul.mubr.msk.f32.gmra.mrb[52].mxu1 %vm3618_vm5, %v13539_v19  ;;  %v3760_v19 = vld [vmem:[#allocation2 + $0x1a8] sm:$0x3] }
 0x4b9   : > { %10241 = vmatprep.mubr.msk.f32.mxu1 %vm3618_vm5, %v13568_v25  ;;  %v5966_v25 = vrot.slane %v3760_v19, 1  ;;  %v6237_v60 = vrot.slane %v3760_v19, 2 }
 0x4bb   : > { %v6238_v48 = vsel %vm1159_vm2, %v6235_v16, %v6237_v60 }
 0x4bc   : > { %10242 = vmatmul.mubr.msk.f32.gmra.mrb[54].mxu1 %vm3618_vm5, %v13570_v40  ;;  %v5965_v40 = vsel %vm490_vm3, %v5963_v54, %v5964_v45 }
 0x4bd   : > { %10244 = vmatprep.mubr.msk.f32.mxu1 %vm3618_vm5, %v13594_v49  ;;  %v5967_v49 = vsel %vm490_vm3, %v5964_v45, %v5966_v25 }
 0x4c0   : > { %10245 = vmatmul.mubr.msk.f32.gmra.mrb[56].mxu1 %vm3618_vm5, %v13596_v8  ;;  %v15526_v8 = vld [vmem:[#allocation60_spill] sm:$0xff] }
 0x4c1   : > { %10247 = vmatprep.mubr.msk.f32.mxu1 %vm3618_vm5, %v13620_v62  ;;  %v15527_v62 = vld [vmem:[#allocation61_spill] sm:$0xff] }
 0x4c4   : > { %10248 = vmatmul.mubr.msk.f32.gmra.mrb[58].mxu1 %vm3618_vm5, %v13622_v12  ;;  %v15528_v12 = vld [vmem:[#allocation62_spill] sm:$0xff] }
 0x4c5   : > { %10250 = vmatprep.mubr.msk.f32.mxu1 %vm3618_vm5, %v14000_v14  ;;  %v14379_v14 = vld [vmem:[%s15109_s6] ss:$0 sm:$0xff] }
 0x4c8   : > { %10251 = vmatmul.mubr.msk.f32.gmra.mrb[60].mxu1 %vm3618_vm5, %v14004_v51 }
 0x4c9   : > { %10253 = vmatprep.mubr.msk.f32.mxu1 %vm3618_vm5, %v14223_v2 }
 0x4cc   : > { %10254 = vmatmul.mubr.msk.f32.gmra.mrb[62].mxu1 %vm3618_vm5, %v14229_v28 }
 0x4cd   : > { %10258 = vmatprep.mubr.msk.f32.mxu1 %vm3618_vm5, %v13342_v18  ;;  %v15511_v18 = vld [vmem:[#allocation21_spill] sm:$0xff] }
 0x4d0   : > { %10259 = vmatmul.mubr.msk.f32.vlgmr.msra.gmra.mrb[32].mxu1 %vm3618_vm5, %v13349_v33  ;;  %v15513_v33 = vld [vmem:[#allocation23_spill] sm:$0xff] }
 0x4d1   : > { %10307 = vmatpush3.msk.msra.mxu1 %vm3956_vm4, %v8689_v22  ;;  %10261 = vmatprep.mubr.msk.f32.mxu1 %vm3618_vm5, %v13364_v37  ;;  %v15516_v37 = vld [vmem:[#allocation27_spill] sm:$0xff] }
 0x4d4   : > { %10262 = vmatmul.mubr.msk.f32.gmra.mrb[34].mxu1 %vm3618_vm5, %v13370_v39  ;;  %v15517_v39 = vld [vmem:[#allocation28_spill] sm:$0xff] }
 0x4d5   : > { %10264 = vmatprep.mubr.msk.f32.mxu1 %vm3618_vm5, %v13378_v61  ;;  %v15518_v61 = vld [vmem:[#allocation32_spill] sm:$0xff] }
 0x4d8   : > { %10265 = vmatmul.mubr.msk.f32.gmra.mrb[36].mxu1 %vm3618_vm5, %v15473_v21 }
 0x4d9   : > { %10267 = vmatprep.mubr.msk.f32.mxu1 %vm3618_vm5, %v15507_v57 }
 0x4dc   : > { %10268 = vmatmul.mubr.msk.f32.gmra.mrb[38].mxu1 %vm3618_vm5, %v15508_v50 }
 0x4dd   : > { %10270 = vmatprep.mubr.msk.f32.mxu1 %vm3618_vm5, %v15509_v13 }
 0x4e0   : > { %10271 = vmatmul.mubr.msk.f32.gmra.mrb[40].mxu1 %vm3618_vm5, %v15510_v26 }
 0x4e1   : > { %10273 = vmatprep.mubr.msk.f32.mxu1 %vm3618_vm5, %v15511_v18 }
 0x4e4   : > { %10274 = vmatmul.mubr.msk.f32.gmra.mrb[42].mxu1 %vm3618_vm5, %v15512_v55 }
 0x4e5   : > { %10276 = vmatprep.mubr.msk.f32.mxu1 %vm3618_vm5, %v15513_v33 }
 0x4e8   : > { %10277 = vmatmul.mubr.msk.f32.gmra.mrb[44].mxu1 %vm3618_vm5, %v15514_v35 }
 0x4e9   : > { %10279 = vmatprep.mubr.msk.f32.mxu1 %vm3618_vm5, %v15515_v47 }
 0x4ec   : > { %10280 = vmatmul.mubr.msk.f32.gmra.mrb[46].mxu1 %vm3618_vm5, %v15516_v37 }
 0x4ed   : > { %10282 = vmatprep.mubr.msk.f32.mxu1 %vm3618_vm5, %v15517_v39 }
 0x4f0   : > { %10283 = vmatmul.mubr.msk.f32.gmra.mrb[48].mxu1 %vm3618_vm5, %v15518_v61 }
 0x4f1   : > { %10285 = vmatprep.mubr.msk.f32.mxu1 %vm3618_vm5, %v15519_v52 }
 0x4f4   : > { %10286 = vmatmul.mubr.msk.f32.gmra.mrb[50].mxu1 %vm3618_vm5, %v15520_v31 }
 0x4f5   : > { %10288 = vmatprep.mubr.msk.f32.mxu1 %vm3618_vm5, %v15521_v11 }
 0x4f8   : > { %10289 = vmatmul.mubr.msk.f32.gmra.mrb[52].mxu1 %vm3618_vm5, %v15522_v43 }
 0x4f9   : > { %10291 = vmatprep.mubr.msk.f32.mxu1 %vm3618_vm5, %v15490_v6 }
 0x4fc   : > { %10292 = vmatmul.mubr.msk.f32.gmra.mrb[54].mxu1 %vm3618_vm5, %v15523_v42 }
 0x4fd   : > { %10294 = vmatprep.mubr.msk.f32.mxu1 %vm3618_vm5, %v15524_v34 }
 0x500   : > { %10295 = vmatmul.mubr.msk.f32.gmra.mrb[56].mxu1 %vm3618_vm5, %v15493_v3 }
 0x501   : > { %10297 = vmatprep.mubr.msk.f32.mxu1 %vm3618_vm5, %v15525_v46 }
 0x504   : > { %10298 = vmatmul.mubr.msk.f32.gmra.mrb[58].mxu1 %vm3618_vm5, %v15495_v23 }
 0x505   : > { %10300 = vmatprep.mubr.msk.f32.mxu1 %vm3618_vm5, %v14076_v32 }
 0x508   : > { %10301 = vmatmul.mubr.msk.f32.gmra.mrb[60].mxu1 %vm3618_vm5, %v14081_v59 }
 0x509   : > { %10303 = vmatprep.mubr.msk.f32.mxu1 %vm3618_vm5, %v5965_v40 }
 0x50c   : > { %10304 = vmatmul.mubr.msk.f32.gmra.mrb[62].mxu1 %vm3618_vm5, %v5967_v49 }
 0x50d   : > { %10308 = vmatprep.mubr.msk.f32.mxu1 %vm3618_vm5, %v13756_v9  ;;  %v15529_v9 = vld [vmem:[#allocation63_spill] sm:$0xff] }
 0x510   : > { %10309 = vmatmul.mubr.msk.f32.vlgmr.msra.gmra.mrb[32].mxu1 %vm3618_vm5, %v13763_v17  ;;  %v15530_v17 = vld [vmem:[#allocation64_spill] sm:$0xff] }
 0x511   : > { %10311 = vmatprep.mubr.msk.f32.mxu1 %vm3618_vm5, %v15496_v41 }
 0x514   : > { %10312 = vmatmul.mubr.msk.f32.gmra.mrb[34].mxu1 %vm3618_vm5, %v13776_v20  ;;  %v15532_v20 = vld [vmem:[#allocation67_spill] sm:$0xff] }
 0x515   : > { %10314 = vmatprep.mubr.msk.f32.mxu1 %vm3618_vm5, %v15497_v10 }
 0x518   : > { %10315 = vmatmul.mubr.msk.f32.gmra.mrb[36].mxu1 %vm3618_vm5, %v13789_v24  ;;  %v15531_v24 = vld [vmem:[#allocation66_spill] sm:$0xff] }
 0x519   : > { %10317 = vmatprep.mubr.msk.f32.mxu1 %vm3618_vm5, %v15526_v8 }
 0x51c   : > { %10318 = vmatmul.mubr.msk.f32.gmra.mrb[38].mxu1 %vm3618_vm5, %v13802_v27  ;;  %v15533_v27 = vld [vmem:[#allocation69_spill] sm:$0xff] }
 0x51d   : > { %10320 = vmatprep.mubr.msk.f32.mxu1 %vm3618_vm5, %v15527_v62 }
 0x520   : > { %10321 = vmatmul.mubr.msk.f32.gmra.mrb[40].mxu1 %vm3618_vm5, %v13815_v44  ;;  %v15534_v44 = vld [vmem:[#allocation70_spill] sm:$0xff] }
 0x521   : > { %10323 = vmatprep.mubr.msk.f32.mxu1 %vm3618_vm5, %v15528_v12 }
 0x524   : > { %10324 = vmatmul.mubr.msk.f32.gmra.mrb[42].mxu1 %vm3618_vm5, %v13828_v38  ;;  %v15535_v38 = vld [vmem:[#allocation71_spill] sm:$0xff] }
 0x525   : > { %10326 = vmatprep.mubr.msk.f32.mxu1 %vm3618_vm5, %v15529_v9 }
 0x528   : > { %10327 = vmatmul.mubr.msk.f32.gmra.mrb[44].mxu1 %vm3618_vm5, %v13841_v63  ;;  %v15536_v63 = vld [vmem:[#allocation72_spill] sm:$0xff] }
 0x529   : > { %10329 = vmatprep.mubr.msk.f32.mxu1 %vm3618_vm5, %v15530_v17 }
 0x52c   : > { %10330 = vmatmul.mubr.msk.f32.gmra.mrb[46].mxu1 %vm3618_vm5, %v13854_v36  ;;  %v6234_v36 = vrot.slane %v14223_v2, 2  ;;  %v14402_v2 = vld [vmem:[%s15110_s7] sm:$0xf] }
 0x52d   : > { %10332 = vmatprep.mubr.msk.f32.mxu1 %vm3618_vm5, %v15503_v1  ;;  %10406 = vmatprep.subr.msk.mxu0 %vm3956_vm4, %v14402_v2 }
 0x530   : > { %10333 = vmatmul.mubr.msk.f32.gmra.mrb[48].mxu1 %vm3618_vm5, %v15531_v24 }
 0x531   : > { %10335 = vmatprep.mubr.msk.f32.mxu1 %vm3618_vm5, %v15532_v20 }
 0x534   : > { %10336 = vmatmul.mubr.msk.f32.gmra.mrb[50].mxu1 %vm3618_vm5, %v13880_v30  ;;  %v15537_v30 = vld [vmem:[#allocation73_spill] sm:$0xff] }
 0x535   : > { %10338 = vmatprep.mubr.msk.f32.mxu1 %vm3618_vm5, %v15505_v56 }
 0x538   : > { %10339 = vmatmul.mubr.msk.f32.gmra.mrb[52].mxu1 %vm3618_vm5, %v15533_v27 }
 0x539   : > { %10341 = vmatprep.mubr.msk.f32.mxu1 %vm3618_vm5, %v15534_v44 }
 0x53c   : > { %10342 = vmatmul.mubr.msk.f32.gmra.mrb[54].mxu1 %vm3618_vm5, %v13906_v15  ;;  %v6236_v15 = vsel %vm1159_vm2, %v6234_v36, %v6235_v16 }
 0x53d   : > { %10344 = vmatprep.mubr.msk.f32.mxu1 %vm3618_vm5, %v15535_v38 }
 0x540   : > { %10345 = vmatmul.mubr.msk.f32.gmra.mrb[56].mxu1 %vm3618_vm5, %v15536_v63 }
 0x541   : > { %10347 = vmatprep.mubr.msk.f32.mxu1 %vm3618_vm5, %v13925_v5  ;;  %v14374_v5 = vld [vmem:[%s15108_s5] ss:$0 sm:$0xff] }
 0x544   : > { %10348 = vmatmul.mubr.msk.f32.gmra.mrb[58].mxu1 %vm3618_vm5, %v15537_v30 }
 0x545   : > { %10350 = vmatprep.mubr.msk.f32.mxu1 %vm3618_vm5, %v14153_v58 }
 0x548   : > { %10351 = vmatmul.mubr.msk.f32.gmra.mrb[60].mxu1 %vm3618_vm5, %v14158_v29 }
 0x549   : > { %10353 = vmatprep.mubr.msk.f32.mxu1 %vm3618_vm5, %v6236_v15 }
 0x54c   : > { %10354 = vmatmul.mubr.msk.f32.gmra.mrb[62].mxu1 %vm3618_vm5, %v6238_v48 }
 0x5e3   : > { %v10310_v53 = vpop.f32.mrb[32].mxu1 }
 0x5e4   : > { %v6513_v51 = vmul.f32 %v10310_v53, %v14374_v5  ;;  %v6314_v29 = vpop.f32.mrb[33].mxu1 }
 0x5e5   : > { %v6512_v21 = vmul.f32 %v14374_v5, %v6314_v29 }
 0x5e6   : > { %v14384_v23 = vadd.f32 %v14379_v14, %v6513_v51 }
 0x5e7   : > { %v14387_v7 = vadd.f32 %v14379_v14, %v6512_v21  ;;  %v10313_v59 = vpop.f32.mrb[34].mxu1 }
 0x5e8   : > { %v6616_v3 = vand.u32 2147483647, %v14384_v23  ;;  %v6515_v6 = vmul.f32 %v10313_v59, %v14374_v5  ;;  %v6324_v32 = vpop.f32.mrb[35].mxu1 }
 0x5e9   : > { %v6615_v41 = vand.u32 2147483647, %v14387_v7  ;;  %v6514_v10 = vmul.f32 %v14374_v5, %v6324_v32 }
 0x5ea   : > { %v6648_v58 = vsub.f32 0.0, %v6616_v3  ;;  %v14394_v1 = vadd.f32 %v14379_v14, %v6515_v6 }
 0x5eb   : > { %v6647_v4 = vsub.f32 0.0, %v6615_v41  ;;  %v14397_v56 = vadd.f32 %v14379_v14, %v6514_v10  ;;  %v10316_v22 = vpop.f32.mrb[36].mxu1  ;;  %v6584_v41 = vmax.f32 %v14384_v23, 0.0 }
 0x5ec   : > { %v6681_v28 = vmul.f32 1.442695, %v6648_v58  ;;  %v6618_v0 = vand.u32 2147483647, %v14394_v1  ;;  %v6517_v57 = vmul.f32 %v10316_v22, %v14374_v5  ;;  %v6334_v50 = vpop.f32.mrb[37].mxu1 }
 0x5ed   : > { %v6679_v13 = vmul.f32 1.442695, %v6647_v4  ;;  %v6617_v26 = vand.u32 2147483647, %v14397_v56  ;;  %v6516_v18 = vmul.f32 %v14374_v5, %v6334_v50 }
 0x5ee   : > { %11202 = vpow2.f32 %v6681_v28  ;;  %v6650_v55 = vsub.f32 0.0, %v6618_v0  ;;  %v14411_v33 = vadd.f32 %v14379_v14, %v6517_v57 }
 0x5ef   : > { %11204 = vpow2.f32 %v6679_v13  ;;  %v6649_v35 = vsub.f32 0.0, %v6617_v26  ;;  %v14414_v47 = vadd.f32 %v14379_v14, %v6516_v18  ;;  %v10319_v37 = vpop.f32.mrb[38].mxu1  ;;  %v6583_v18 = vmax.f32 %v14387_v7, 0.0 }
 0x5f0   : > { %v6685_v39 = vmul.f32 1.442695, %v6650_v55  ;;  %v6620_v61 = vand.u32 2147483647, %v14411_v33  ;;  %v6519_v52 = vmul.f32 %v10319_v37, %v14374_v5  ;;  %v6344_v31 = vpop.f32.mrb[39].mxu1 }
 0x5f1   : > { %v6683_v11 = vmul.f32 1.442695, %v6649_v35  ;;  %v6619_v43 = vand.u32 2147483647, %v14414_v47  ;;  %v6518_v42 = vmul.f32 %v14374_v5, %v6344_v31 }
 0x5f2   : > { %11206 = vpow2.f32 %v6685_v39  ;;  %v6652_v34 = vsub.f32 0.0, %v6620_v61  ;;  %v14421_v46 = vadd.f32 %v14379_v14, %v6519_v52 }
 0x5f3   : > { %11208 = vpow2.f32 %v6683_v11  ;;  %v6651_v54 = vsub.f32 0.0, %v6619_v43  ;;  %v14424_v45 = vadd.f32 %v14379_v14, %v6518_v42  ;;  %v10322_v19 = vpop.f32.mrb[40].mxu1 }
 0x5f4   : > { %v6689_v25 = vmul.f32 1.442695, %v6652_v34  ;;  %v6622_v40 = vand.u32 2147483647, %v14421_v46  ;;  %v6521_v49 = vmul.f32 %v10322_v19, %v14374_v5  ;;  %v6354_v8 = vpop.f32.mrb[41].mxu1  ;;  %v6586_v19 = vmax.f32 %v14394_v1, 0.0 }
 0x5f5   : > { %v6687_v62 = vmul.f32 1.442695, %v6651_v54  ;;  %v6621_v12 = vand.u32 2147483647, %v14424_v45  ;;  %v6520_v9 = vmul.f32 %v14374_v5, %v6354_v8 }
 0x5f6   : > { %11210 = vpow2.f32 %v6689_v25  ;;  %v6654_v17 = vsub.f32 0.0, %v6622_v40  ;;  %v14431_v24 = vadd.f32 %v14379_v14, %v6521_v49  ;;  %v6585_v49 = vmax.f32 %v14397_v56, 0.0 }
 0x5f7   : > { %11212 = vpow2.f32 %v6687_v62  ;;  %v6653_v20 = vsub.f32 0.0, %v6621_v12  ;;  %v14434_v27 = vadd.f32 %v14379_v14, %v6520_v9  ;;  %v10325_v44 = vpop.f32.mrb[42].mxu1 }
 0x5f8   : > { %v11203_v38 = vpop.eup %11202  ;;  %v6693_v63 = vmul.f32 1.442695, %v6654_v17  ;;  %v6624_v36 = vand.u32 2147483647, %v14431_v24  ;;  %v6523_v16 = vmul.f32 %v10325_v44, %v14374_v5  ;;  %v6364_v30 = vpop.f32.mrb[43].mxu1  ;;  %v6588_v17 = vmax.f32 %v14411_v33, 0.0 }
 0x5f9   : > { %v11205_v60 = vpop.eup %11204  ;;  %v6744_v15 = vadd.f32 1.0, %v11203_v38  ;;  %v6691_v48 = vmul.f32 1.442695, %v6653_v20  ;;  %v6623_v53 = vand.u32 2147483647, %v14434_v27  ;;  %v6522_v3 = vmul.f32 %v14374_v5, %v6364_v30 }
 0x5fa   : > { %v6743_v51 = vadd.f32 1.0, %v11205_v60  ;;  %11214 = vpow2.f32 %v6693_v63  ;;  %v6656_v29 = vsub.f32 0.0, %v6624_v36  ;;  %v14440_v21 = vadd.f32 %v14379_v14, %v6523_v16 }
 0x5fb   : > { %11216 = vlog2.f32 %v6744_v15  ;;  %v6655_v59 = vsub.f32 0.0, %v6623_v53  ;;  %v10328_v6 = vpop.f32.mrb[44].mxu1  ;;  %v14446_v57 = vadd.f32 %v14379_v14, %v6522_v3  ;;  %v6587_v3 = vmax.f32 %v14414_v47, 0.0 }
 0x5fc   : > { %v11207_v32 = vpop.eup %11206  ;;  %11218 = vlog2.f32 %v6743_v51  ;;  %v6697_v10 = vmul.f32 1.442695, %v6656_v29  ;;  %v6626_v58 = vand.u32 2147483647, %v14440_v21  ;;  %v6374_v4 = vpop.f32.mrb[45].mxu1  ;;  %v6525_v26 = vmul.f32 %v10328_v6, %v14374_v5 }
 0x5fd   : > { %v11209_v22 = vpop.eup %11208  ;;  %v6746_v28 = vadd.f32 1.0, %v11207_v32  ;;  %11220 = vpow2.f32 %v6691_v48  ;;  %v6695_v0 = vmul.f32 1.442695, %v6655_v59  ;;  %v6625_v55 = vand.u32 2147483647, %v14446_v57 }
 0x5fe   : > { %v6745_v50 = vadd.f32 1.0, %v11209_v22  ;;  %11222 = vpow2.f32 %v6697_v10  ;;  %v6658_v13 = vsub.f32 0.0, %v6626_v58  ;;  %v6524_v35 = vmul.f32 %v14374_v5, %v6374_v4 }
 0x5ff   : > { %11224 = vlog2.f32 %v6746_v28  ;;  %v10331_v37 = vpop.f32.mrb[46].mxu1  ;;  %v14453_v52 = vadd.f32 %v14379_v14, %v6525_v26  ;;  %v6657_v34 = vsub.f32 0.0, %v6625_v55  ;;  %v6590_v58 = vmax.f32 %v14421_v46, 0.0 }
 0x600   : > { %v11211_v39 = vpop.eup %11210  ;;  %11226 = vlog2.f32 %v6745_v50  ;;  %v6701_v61 = vmul.f32 1.442695, %v6658_v13  ;;  %v6527_v31 = vmul.f32 %v10331_v37, %v14374_v5  ;;  %v6384_v11 = vpop.f32.mrb[47].mxu1  ;;  %v14457_v54 = vadd.f32 %v14379_v14, %v6524_v35 }
 0x601   : > { %v11213_v43 = vpop.eup %11212  ;;  %v6748_v42 = vadd.f32 1.0, %v11211_v39  ;;  %11228 = vpow2.f32 %v6695_v0  ;;  %v6628_v40 = vand.u32 2147483647, %v14453_v52  ;;  %v6699_v8 = vmul.f32 1.442695, %v6657_v34 }
 0x602   : > { %v6747_v25 = vadd.f32 1.0, %v11213_v43  ;;  %11230 = vpow2.f32 %v6701_v61  ;;  %v6627_v62 = vand.u32 2147483647, %v14457_v54  ;;  %v6526_v44 = vmul.f32 %v14374_v5, %v6384_v11 }
 0x603   : > { %11232 = vlog2.f32 %v6748_v42  ;;  %v10334_v12 = vpop.f32.mrb[48].mxu1  ;;  %v6660_v20 = vsub.f32 0.0, %v6628_v40  ;;  %v14466_v30 = vadd.f32 %v14379_v14, %v6527_v31  ;;  %v6589_v31 = vmax.f32 %v14424_v45, 0.0 }
 0x604   : > { %v11215_v9 = vpop.eup %11214  ;;  %11234 = vlog2.f32 %v6747_v25  ;;  %v6394_v38 = vpop.f32.mrb[49].mxu1  ;;  %v6659_v16 = vsub.f32 0.0, %v6627_v62  ;;  %v14469_v53 = vadd.f32 %v14379_v14, %v6526_v44  ;;  %v6529_v51 = vmul.f32 %v10334_v12, %v14374_v5 }
 0x605   : > { %v11217_v63 = vpop.eup %11216  ;;  %v6750_v36 = vadd.f32 1.0, %v11215_v9  ;;  %11236 = vpow2.f32 %v6699_v8  ;;  %v6705_v48 = vmul.f32 1.442695, %v6660_v20  ;;  %v6630_v13 = vand.u32 2147483647, %v14466_v30 }
 0x606   : > { %v11219_v60 = vpop.eup %11218  ;;  %v6778_v15 = vmul.f32 0.6931472, %v11217_v63  ;;  %v6703_v6 = vmul.f32 1.442695, %v6659_v16  ;;  %v6629_v37 = vand.u32 2147483647, %v14469_v53  ;;  %v14477_v39 = vadd.f32 %v14379_v14, %v6529_v51 }
 0x607   : > { %v11221_v29 = vpop.eup %11220  ;;  %v6776_v59 = vmul.f32 0.6931472, %v11219_v60  ;;  %11238 = vlog2.f32 %v6750_v36  ;;  %v10337_v22 = vpop.f32.mrb[50].mxu1  ;;  %v6592_v34 = vmax.f32 %v14431_v24, 0.0  ;;  %v6662_v9 = vsub.f32 0.0, %v6630_v13 }
 0x608   : > { %v11223_v32 = vpop.eup %11222  ;;  %v6840_v10 = vadd.f32 %v6778_v15, %v6584_v41  ;;  %v6749_v4 = vadd.f32 1.0, %v11221_v29  ;;  %11240 = vpow2.f32 %v6705_v48  ;;  %v6404_v26 = vpop.f32.mrb[51].mxu1  ;;  %v6661_v63 = vsub.f32 0.0, %v6629_v37 }
 0x609   : > { %v11225_v28 = vpop.eup %11224  ;;  %v6839_v0 = vadd.f32 %v6776_v59, %v6583_v18  ;;  %v6752_v50 = vadd.f32 1.0, %v11223_v32  ;;  %11242 = vpow2.f32 %v6703_v6  ;;  %v6528_v18 = vmul.f32 %v14374_v5, %v6394_v38 }
 0x60a   : > { %v11227_v55 = vpop.eup %11226  ;;  %11244 = vtanh.f32 %v6840_v10  ;;  %v6782_v35 = vmul.f32 0.6931472, %v11225_v28  ;;  %v6632_v36 = vand.u32 2147483647, %v14477_v39  ;;  %v6531_v60 = vmul.f32 %v10337_v22, %v14374_v5 }
 0x60b   : > { %v11229_v41 = vpop.eup %11228  ;;  %11246 = vtanh.f32 %v6839_v0  ;;  %v6780_v61 = vmul.f32 0.6931472, %v11227_v55  ;;  %v10340_v11 = vpop.f32.mrb[52].mxu1  ;;  %v6709_v32 = vmul.f32 1.442695, %v6662_v9  ;;  %v6530_v55 = vmul.f32 %v14374_v5, %v6404_v26 }
 0x60c   : > { %v11231_v43 = vpop.eup %11230  ;;  %v6842_v42 = vadd.f32 %v6782_v35, %v6586_v19  ;;  %11248 = vlog2.f32 %v6749_v4  ;;  %v6751_v25 = vadd.f32 1.0, %v11229_v41  ;;  %v6414_v40 = vpop.f32.mrb[53].mxu1  ;;  %v14484_v19 = vadd.f32 %v14379_v14, %v6528_v18 }
 0x60d   : > { %v11233_v8 = vpop.eup %11232  ;;  %v6841_v62 = vadd.f32 %v6780_v61, %v6585_v49  ;;  %11250 = vlog2.f32 %v6752_v50  ;;  %v6754_v12 = vadd.f32 1.0, %v11231_v43  ;;  %v6664_v51 = vsub.f32 0.0, %v6632_v36 }
 0x60e   : > { %v11235_v20 = vpop.eup %11234  ;;  %11252 = vtanh.f32 %v6842_v42  ;;  %v6786_v44 = vmul.f32 0.6931472, %v11233_v8  ;;  %v6631_v10 = vand.u32 2147483647, %v14484_v19  ;;  %v6707_v22 = vmul.f32 1.442695, %v6661_v63 }
 0x60f   : > { %v11237_v38 = vpop.eup %11236  ;;  %11254 = vtanh.f32 %v6841_v62  ;;  %v6784_v16 = vmul.f32 0.6931472, %v11235_v20  ;;  %v14487_v15 = vpop.f32.mrb[54].mxu1  ;;  %v14495_v0 = vadd.f32 %v14379_v14, %v6531_v60  ;;  %v6713_v61 = vmul.f32 1.442695, %v6664_v51 }
 0x610   : > { %v6844_v49 = vadd.f32 %v6786_v44, %v6588_v17  ;;  %11256 = vlog2.f32 %v6751_v25  ;;  %v6753_v48 = vadd.f32 1.0, %v11237_v38  ;;  %v14491_v29 = vpop.f32.mrb[55].mxu1  ;;  %v6663_v13 = vsub.f32 0.0, %v6631_v10 }
 0x611   : > { %v11239_v59 = vpop.eup %11238  ;;  %v6843_v6 = vadd.f32 %v6784_v16, %v6587_v3  ;;  %11258 = vlog2.f32 %v6754_v12  ;;  %v6634_v8 = vand.u32 2147483647, %v14495_v0  ;;  %v14508_v12 = vadd.f32 %v14379_v14, %v6530_v55 }
 0x612   : > { %v11241_v4 = vpop.eup %11240  ;;  %11260 = vtanh.f32 %v6844_v49  ;;  %v6790_v28 = vmul.f32 0.6931472, %v11239_v59  ;;  %v6711_v25 = vmul.f32 1.442695, %v6663_v13  ;;  %v6532_v63 = vmul.f32 %v14374_v5, %v6414_v40 }
 0x613   : > { %v11243_v50 = vpop.eup %11242  ;;  %11262 = vtanh.f32 %v6843_v6  ;;  %v6756_v17 = vadd.f32 1.0, %v11241_v4  ;;  %v14498_v35 = vpop.f32.mrb[56].mxu1  ;;  %v6666_v44 = vsub.f32 0.0, %v6634_v8  ;;  %v6591_v16 = vmax.f32 %v14434_v27, 0.0 }
 0x614   : > { %v11245_v3 = vpop.eup %11244  ;;  %v6846_v37 = vadd.f32 %v6790_v28, %v6590_v58  ;;  %11264 = vlog2.f32 %v6753_v48  ;;  %v6755_v41 = vadd.f32 1.0, %v11243_v50  ;;  %v14502_v18 = vpop.f32.mrb[57].mxu1  ;;  %v6533_v58 = vmul.f32 %v10340_v11, %v14374_v5 }
 0x615   : > { %v11247_v43 = vpop.eup %11246  ;;  %v6904_v42 = vmul.f32 %v11245_v3, %v14384_v23  ;;  %11266 = vlog2.f32 %v6756_v17  ;;  %v6717_v40 = vmul.f32 1.442695, %v6666_v44  ;;  %v14532_v4 = vadd.f32 %v14379_v14, %v6532_v63 }
 0x616   : > { %v11249_v62 = vpop.eup %11248  ;;  %v6903_v26 = vmul.f32 %v11247_v43, %v14387_v7  ;;  %11268 = vtanh.f32 %v6846_v37  ;;  %v6633_v7 = vand.u32 2147483647, %v14508_v12  ;;  %v6535_v50 = vmul.f32 %v14487_v15, %v14374_v5 }
 0x617   : > { %v11251_v9 = vpop.eup %11250  ;;  %v6788_v20 = vmul.f32 0.6931472, %v11249_v62  ;;  %11270 = vlog2.f32 %v6755_v41  ;;  %v14512_v23 = vpop.f32.mrb[58].mxu1  ;;  %v6593_v55 = vmax.f32 %v14446_v57, 0.0  ;;  %v6635_v62 = vand.u32 2147483647, %v14532_v4 }
 0x618   : > { %v11253_v36 = vpop.eup %11252  ;;  %v6794_v38 = vmul.f32 0.6931472, %v11251_v9  ;;  %11272 = vpow2.f32 %v6709_v32  ;;  %v14516_v60 = vpop.f32.mrb[59].mxu1  ;;  %10358 = vmatprep.mubr.msk.f32.mxu0 %vm3618_vm5, %v6903_v26  ;;  %v6665_v32 = vsub.f32 0.0, %v6633_v7 }
 0x619   : > { %v11255_v11 = vpop.eup %11254  ;;  %v6906_v49 = vmul.f32 %v11253_v36, %v14394_v1  ;;  %v6845_v48 = vadd.f32 %v6788_v20, %v6589_v31  ;;  %11274 = vpow2.f32 %v6707_v22  ;;  %10359 = vmatmul.mubr.msk.f32.vlgmr.msra.gmra.mrb[32].mxu0 %vm3618_vm5, %v6904_v42  ;;  %v14529_v31 = vadd.f32 %v14379_v14, %v6533_v58 }
 0x61a   : > { %v11257_v51 = vpop.eup %11256  ;;  %v6905_v59 = vmul.f32 %v11255_v11, %v14397_v56  ;;  %v6848_v6 = vadd.f32 %v6794_v38, %v6592_v34  ;;  %11276 = vpow2.f32 %v6713_v61  ;;  %10407 = vmatpush3.msk.msra.mxu0 %vm3956_vm4, %v14402_v2  ;;  %v6594_v34 = vmax.f32 %v14440_v21, 0.0 }
 0x61b   : > { %v11259_v10 = vpop.eup %11258  ;;  %11278 = vtanh.f32 %v6845_v48  ;;  %v6792_v1 = vmul.f32 0.6931472, %v11257_v51  ;;  %v14534_v28 = vpop.f32.mrb[60].mxu1  ;;  %v6715_v3 = vmul.f32 1.442695, %v6665_v32  ;;  %v6596_v58 = vmax.f32 %v14453_v52, 0.0 }
 0x61c   : > { %v11261_v56 = vpop.eup %11260  ;;  %11280 = vtanh.f32 %v6848_v6  ;;  %v6798_v22 = vmul.f32 0.6931472, %v11259_v10  ;;  %v14539_v2 = vpop.f32.mrb[61].mxu1  ;;  %10361 = vmatprep.mubr.msk.f32.mxu0 %vm3618_vm5, %v6905_v59  ;;  %v6636_v43 = vand.u32 2147483647, %v14529_v31  ;;  %v6595_v36 = vmax.f32 %v14457_v54, 0.0 }
 0x61d   : > { %v11263_v17 = vpop.eup %11262  ;;  %v6847_v13 = vadd.f32 %v6792_v1, %v6591_v16  ;;  %11282 = vpow2.f32 %v6711_v25  ;;  %10362 = vmatmul.mubr.msk.f32.gmra.mrb[34].mxu0 %vm3618_vm5, %v6906_v49  ;;  %v6908_v42 = vmul.f32 %v11261_v56, %v14411_v33  ;;  %v6667_v11 = vsub.f32 0.0, %v6635_v62 }
 0x61e   : > { %v11265_v37 = vpop.eup %11264  ;;  %v6907_v41 = vmul.f32 %v11263_v17, %v14414_v47  ;;  %v6850_v61 = vadd.f32 %v6798_v22, %v6594_v34  ;;  %11284 = vpow2.f32 %v6717_v40  ;;  %v6668_v20 = vsub.f32 0.0, %v6636_v43 }
 0x61f   : > { %v11267_v15 = vpop.eup %11266  ;;  %11286 = vtanh.f32 %v6847_v13  ;;  %v6796_v8 = vmul.f32 0.6931472, %v11265_v37  ;;  %v14548_v26 = vpop.f32.mrb[62].mxu1  ;;  %v14552_v47 = vadd.f32 %v14379_v14, %v6535_v50  ;;  %v6534_v10 = vmul.f32 %v14374_v5, %v14491_v29 }
 0x620   : > { %v11269_v25 = vpop.eup %11268  ;;  %v6802_v9 = vmul.f32 0.6931472, %v11267_v15  ;;  %v14554_v44 = vpop.f32.mrb[63].mxu1  ;;  %10364 = vmatprep.mubr.msk.f32.mxu0 %vm3618_vm5, %v6907_v41  ;;  %11288 = vpow2.f32 %v6715_v3  ;;  %v6721_v40 = vmul.f32 1.442695, %v6668_v20  ;;  %v6537_v22 = vmul.f32 %v14498_v35, %v14374_v5 }
 0x621   : > { %v11271_v63 = vpop.eup %11270  ;;  %v6849_v33 = vadd.f32 %v6796_v8, %v6593_v55  ;;  %10365 = vmatmul.mubr.msk.f32.gmra.mrb[36].mxu0 %vm3618_vm5, %v6908_v42  ;;  %11290 = vtanh.f32 %v6850_v61  ;;  %v6638_v51 = vand.u32 2147483647, %v14552_v47  ;;  %v14566_v13 = vadd.f32 %v14379_v14, %v6534_v10 }
 0x622   : > { %v11273_v38 = vpop.eup %11272  ;;  %v6852_v16 = vadd.f32 %v6802_v9, %v6596_v58  ;;  %v6800_v7 = vmul.f32 0.6931472, %v11271_v63  ;;  %v6536_v55 = vmul.f32 %v14374_v5, %v14502_v18  ;;  %v6910_v29 = vmul.f32 %v11269_v25, %v14421_v46 }
 0x623   : > { %v11275_v49 = vpop.eup %11274  ;;  %11292 = vtanh.f32 %v6849_v33  ;;  %v6758_v48 = vadd.f32 1.0, %v11273_v38  ;;  %v6670_v34 = vsub.f32 0.0, %v6638_v51  ;;  %v14572_v37 = vadd.f32 %v14379_v14, %v6537_v22 }
 0x624   : > { %v11277_v59 = vpop.eup %11276  ;;  %11294 = vtanh.f32 %v6852_v16  ;;  %v6851_v6 = vadd.f32 %v6800_v7, %v6595_v36  ;;  %v6757_v32 = vadd.f32 1.0, %v11275_v49  ;;  %v6719_v61 = vmul.f32 1.442695, %v6667_v11 }
 0x625   : > { %v11279_v1 = vpop.eup %11278  ;;  %11296 = vlog2.f32 %v6758_v48  ;;  %v6760_v56 = vadd.f32 1.0, %v11277_v59  ;;  %v6725_v42 = vmul.f32 1.442695, %v6670_v34  ;;  %v6640_v18 = vand.u32 2147483647, %v14572_v37 }
 0x626   : > { %v11281_v50 = vpop.eup %11280  ;;  %v6909_v17 = vmul.f32 %v11279_v1, %v14424_v45  ;;  %11298 = vtanh.f32 %v6851_v6  ;;  %v6637_v45 = vand.u32 2147483647, %v14566_v13  ;;  %v14580_v62 = vadd.f32 %v14379_v14, %v6536_v55 }
 0x627   : > { %v11283_v3 = vpop.eup %11282  ;;  %11300 = vlog2.f32 %v6757_v32  ;;  %v6912_v58 = vmul.f32 %v11281_v50, %v14431_v24  ;;  %v6672_v9 = vsub.f32 0.0, %v6640_v18  ;;  %v6539_v36 = vmul.f32 %v14512_v23, %v14374_v5 }
 0x628   : > { %v11285_v41 = vpop.eup %11284  ;;  %11302 = vlog2.f32 %v6760_v56  ;;  %v6759_v35 = vadd.f32 1.0, %v11283_v3  ;;  %10367 = vmatprep.mubr.msk.f32.mxu0 %vm3618_vm5, %v6909_v17  ;;  %v6669_v8 = vsub.f32 0.0, %v6637_v45  ;;  %v6598_v38 = vmax.f32 %v14466_v30, 0.0 }
 0x629   : > { %v11287_v43 = vpop.eup %11286  ;;  %v6762_v15 = vadd.f32 1.0, %v11285_v41  ;;  %11304 = vpow2.f32 %v6721_v40  ;;  %10368 = vmatmul.mubr.msk.f32.gmra.mrb[38].mxu0 %vm3618_vm5, %v6910_v29  ;;  %v6729_v16 = vmul.f32 1.442695, %v6672_v9  ;;  %v6639_v7 = vand.u32 2147483647, %v14580_v62 }
 0x62a   : > { %v6911_v46 = vmul.f32 %v11287_v43, %v14434_v27  ;;  %11306 = vlog2.f32 %v6759_v35  ;;  %v11289_v25 = vpop.eup %11288  ;;  %v6723_v33 = vmul.f32 1.442695, %v6669_v8  ;;  %v6597_v49 = vmax.f32 %v14469_v53, 0.0 }
 0x62b   : > { %11308 = vlog2.f32 %v6762_v15  ;;  %v11291_v20 = vpop.eup %11290  ;;  %v6761_v63 = vadd.f32 1.0, %v11289_v25  ;;  %v6538_v23 = vmul.f32 %v14374_v5, %v14516_v60  ;;  %v6671_v51 = vsub.f32 0.0, %v6639_v7 }
 0x62c   : > { %11310 = vpow2.f32 %v6719_v61  ;;  %10370 = vmatprep.mubr.msk.f32.mxu0 %vm3618_vm5, %v6911_v46  ;;  %v6914_v40 = vmul.f32 %v11291_v20, %v14440_v21  ;;  %v6541_v59 = vmul.f32 %v14534_v28, %v14374_v5  ;;  %v6600_v10 = vmax.f32 %v14477_v39, 0.0 }
 0x62d   : > { %v11293_v27 = vpop.eup %11292  ;;  %11312 = vpow2.f32 %v6725_v42  ;;  %10371 = vmatmul.mubr.msk.f32.gmra.mrb[40].mxu0 %vm3618_vm5, %v6912_v58  ;;  %v6599_v21 = vmax.f32 %v14484_v19, 0.0  ;;  %v6727_v56 = vmul.f32 1.442695, %v6671_v51  ;;  %v14604_v34 = vadd.f32 %v14379_v14, %v6538_v23 }
 0x62e   : > { %v11295_v24 = vpop.eup %11294  ;;  %v6913_v11 = vmul.f32 %v11293_v27, %v14446_v57  ;;  %11314 = vlog2.f32 %v6761_v63  ;;  %v14598_v57 = vadd.f32 %v14379_v14, %v6539_v36  ;;  %v6602_v17 = vmax.f32 %v14495_v0, 0.0 }
 0x62f   : > { %v11297_v48 = vpop.eup %11296  ;;  %11316 = vpow2.f32 %v6723_v33  ;;  %v6540_v55 = vmul.f32 %v14374_v5, %v14539_v2  ;;  %v6916_v29 = vmul.f32 %v11295_v24, %v14453_v52  ;;  %v14612_v41 = vadd.f32 %v14379_v14, %v6541_v59 }
 0x630   : > { %v11299_v6 = vpop.eup %11298  ;;  %v6806_v32 = vmul.f32 0.6931472, %v11297_v48  ;;  %11318 = vpow2.f32 %v6729_v16  ;;  %10373 = vmatprep.mubr.msk.f32.mxu0 %vm3618_vm5, %v6913_v11  ;;  %v6601_v45 = vmax.f32 %v14508_v12, 0.0  ;;  %v6642_v15 = vand.u32 2147483647, %v14598_v57 }
 0x631   : > { %v11301_v1 = vpop.eup %11300  ;;  %v6915_v60 = vmul.f32 %v11299_v6, %v14457_v54  ;;  %10374 = vmatmul.mubr.msk.f32.gmra.mrb[42].mxu0 %vm3618_vm5, %v6914_v40  ;;  %11320 = vpow2.f32 %v6727_v56  ;;  %v6641_v52 = vand.u32 2147483647, %v14604_v34  ;;  %v14620_v25 = vadd.f32 %v14379_v14, %v6540_v55 }
 0x632   : > { %v11303_v28 = vpop.eup %11302  ;;  %v6854_v22 = vadd.f32 %v6806_v32, %v6598_v38  ;;  %v6804_v50 = vmul.f32 0.6931472, %v11301_v1  ;;  %v6543_v58 = vmul.f32 %v14548_v26, %v14374_v5  ;;  %v6644_v33 = vand.u32 2147483647, %v14612_v41 }
 0x633   : > { %v11305_v3 = vpop.eup %11304  ;;  %v6810_v54 = vmul.f32 0.6931472, %v11303_v28  ;;  %10376 = vmatprep.mubr.msk.f32.mxu0 %vm3618_vm5, %v6915_v60  ;;  %v6674_v16 = vsub.f32 0.0, %v6642_v15  ;;  %v6673_v11 = vsub.f32 0.0, %v6641_v52 }
 0x634   : > { %v11307_v35 = vpop.eup %11306  ;;  %v6853_v61 = vadd.f32 %v6804_v50, %v6597_v49  ;;  %v6764_v43 = vadd.f32 1.0, %v11305_v3  ;;  %11322 = vtanh.f32 %v6854_v22  ;;  %v6643_v49 = vand.u32 2147483647, %v14620_v25 }
 0x635   : > { %v11309_v42 = vpop.eup %11308  ;;  %v6856_v2 = vadd.f32 %v6810_v54, %v6600_v10  ;;  %v6808_v18 = vmul.f32 0.6931472, %v11307_v35  ;;  %10377 = vmatmul.mubr.msk.f32.gmra.mrb[44].mxu0 %vm3618_vm5, %v6916_v29  ;;  %v14627_v48 = vadd.f32 %v14379_v14, %v6543_v58  ;;  %v6676_v59 = vsub.f32 0.0, %v6644_v33 }
 0x636   : > { %v11311_v46 = vpop.eup %11310  ;;  %11324 = vtanh.f32 %v6853_v61  ;;  %v6814_v8 = vmul.f32 0.6931472, %v11309_v42  ;;  %v6675_v6 = vsub.f32 0.0, %v6643_v49  ;;  %v6542_v10 = vmul.f32 %v14374_v5, %v14554_v44 }
 0x637   : > { %v11313_v9 = vpop.eup %11312  ;;  %11326 = vtanh.f32 %v6856_v2  ;;  %v6855_v20 = vadd.f32 %v6808_v18, %v6599_v21  ;;  %v6763_v63 = vadd.f32 1.0, %v11311_v46  ;;  %v6646_v32 = vand.u32 2147483647, %v14627_v48 }
 0x638   : > { %v11315_v36 = vpop.eup %11314  ;;  %v6858_v27 = vadd.f32 %v6814_v8, %v6602_v17  ;;  %11328 = vlog2.f32 %v6764_v43  ;;  %v6766_v38 = vadd.f32 1.0, %v11313_v9  ;;  %v6733_v60 = vmul.f32 1.442695, %v6674_v16 }
 0x639   : > { %v11317_v7 = vpop.eup %11316  ;;  %11330 = vtanh.f32 %v6855_v20  ;;  %v6812_v24 = vmul.f32 0.6931472, %v11315_v36  ;;  %v6731_v21 = vmul.f32 1.442695, %v6673_v11  ;;  %v6678_v28 = vsub.f32 0.0, %v6646_v32 }
 0x63a   : > { %v11319_v23 = vpop.eup %11318  ;;  %11332 = vtanh.f32 %v6858_v27  ;;  %v6765_v26 = vadd.f32 1.0, %v11317_v7  ;;  %v14633_v22 = vadd.f32 %v14379_v14, %v6542_v10  ;;  %v6737_v17 = vmul.f32 1.442695, %v6676_v59 }
 0x63b   : > { %v6857_v40 = vadd.f32 %v6812_v24, %v6601_v45  ;;  %11334 = vlog2.f32 %v6763_v63  ;;  %v6768_v51 = vadd.f32 1.0, %v11319_v23  ;;  %v11321_v1 = vpop.eup %11320  ;;  %v6735_v3 = vmul.f32 1.442695, %v6675_v6 }
 0x63c   : > { %11336 = vlog2.f32 %v6766_v38  ;;  %v6767_v56 = vadd.f32 1.0, %v11321_v1  ;;  %v6645_v29 = vand.u32 2147483647, %v14633_v22  ;;  %v6741_v44 = vmul.f32 1.442695, %v6678_v28 }
 0x63d   : > { %11338 = vtanh.f32 %v6857_v40  ;;  %v6604_v43 = vmax.f32 %v14529_v31, 0.0  ;;  %v6603_v8 = vmax.f32 %v14532_v4, 0.0  ;;  %v6606_v20 = vmax.f32 %v14552_v47, 0.0 }
 0x63e   : > { %11340 = vlog2.f32 %v6765_v26  ;;  %v11323_v50 = vpop.eup %11322  ;;  %v6677_v45 = vsub.f32 0.0, %v6645_v29  ;;  %v6608_v11 = vmax.f32 %v14572_v37, 0.0  ;;  %v6607_v26 = vmax.f32 %v14580_v62, 0.0 }
 0x63f   : > { %11342 = vlog2.f32 %v6768_v51  ;;  %v6918_v61 = vmul.f32 %v11323_v50, %v14466_v30 }
 0x640   : > { %v11325_v55 = vpop.eup %11324  ;;  %11344 = vlog2.f32 %v6767_v56  ;;  %v6739_v18 = vmul.f32 1.442695, %v6677_v45 }
 0x641   : > { %v11327_v54 = vpop.eup %11326  ;;  %v6917_v5 = vmul.f32 %v11325_v55, %v14469_v53  ;;  %11346 = vpow2.f32 %v6733_v60 }
 0x642   : > { %v11329_v35 = vpop.eup %11328  ;;  %11348 = vpow2.f32 %v6731_v21  ;;  %v6920_v46 = vmul.f32 %v11327_v54, %v14477_v39  ;;  %v6605_v39 = vmax.f32 %v14566_v13, 0.0 }
 0x643   : > { %v11331_v14 = vpop.eup %11330  ;;  %v6818_v15 = vmul.f32 0.6931472, %v11329_v35  ;;  %11350 = vpow2.f32 %v6737_v17  ;;  %10379 = vmatprep.mubr.msk.f32.mxu0 %vm3618_vm5, %v6917_v5 }
 0x644   : > { %v11333_v42 = vpop.eup %11332  ;;  %v6919_v2 = vmul.f32 %v11331_v14, %v14484_v19  ;;  %11352 = vpow2.f32 %v6735_v3  ;;  %10380 = vmatmul.mubr.msk.f32.gmra.mrb[46].mxu0 %vm3618_vm5, %v6918_v61 }
 0x645   : > { %v11335_v53 = vpop.eup %11334  ;;  %v6860_v52 = vadd.f32 %v6818_v15, %v6604_v43  ;;  %11354 = vpow2.f32 %v6741_v44  ;;  %v6922_v24 = vmul.f32 %v11333_v42, %v14495_v0  ;;  %v6610_v42 = vmax.f32 %v14598_v57, 0.0 }
 0x646   : > { %v11337_v30 = vpop.eup %11336  ;;  %v6816_v58 = vmul.f32 0.6931472, %v11335_v53  ;;  %11356 = vpow2.f32 %v6739_v18  ;;  %10382 = vmatprep.mubr.msk.f32.mxu0 %vm3618_vm5, %v6919_v2  ;;  %v6609_v18 = vmax.f32 %v14604_v34, 0.0 }
 0x647   : > { %v11339_v9 = vpop.eup %11338  ;;  %v6822_v19 = vmul.f32 0.6931472, %v11337_v30  ;;  %11358 = vtanh.f32 %v6860_v52  ;;  %v6612_v30 = vmax.f32 %v14612_v41, 0.0 }
 0x648   : > { %v11341_v63 = vpop.eup %11340  ;;  %v6921_v33 = vmul.f32 %v11339_v9, %v14508_v12  ;;  %v6859_v36 = vadd.f32 %v6816_v58, %v6603_v8  ;;  %10383 = vmatmul.mubr.msk.f32.gmra.mrb[48].mxu0 %vm3618_vm5, %v6920_v46  ;;  %v6611_v58 = vmax.f32 %v14620_v25, 0.0 }
 0x649   : > { %v11343_v27 = vpop.eup %11342  ;;  %v6862_v38 = vadd.f32 %v6822_v19, %v6606_v20  ;;  %v6820_v16 = vmul.f32 0.6931472, %v11341_v63 }
 0x64a   : > { %v11345_v7 = vpop.eup %11344  ;;  %11360 = vtanh.f32 %v6859_v36  ;;  %v6826_v49 = vmul.f32 0.6931472, %v11343_v27  ;;  %10385 = vmatprep.mubr.msk.f32.mxu0 %vm3618_vm5, %v6921_v33  ;;  %v6613_v36 = vmax.f32 %v14633_v22, 0.0 }
 0x64b   : > { %v11347_v23 = vpop.eup %11346  ;;  %v6861_v12 = vadd.f32 %v6820_v16, %v6605_v39  ;;  %v6824_v40 = vmul.f32 0.6931472, %v11345_v7  ;;  %11362 = vtanh.f32 %v6862_v38  ;;  %v6614_v38 = vmax.f32 %v14627_v48, 0.0 }
 0x64c   : > { %v11349_v51 = vpop.eup %11348  ;;  %v6864_v59 = vadd.f32 %v6826_v49, %v6608_v11  ;;  %v6770_v6 = vadd.f32 1.0, %v11347_v23  ;;  %10386 = vmatmul.mubr.msk.f32.gmra.mrb[50].mxu0 %vm3618_vm5, %v6922_v24 }
 0x64d   : > { %v11351_v32 = vpop.eup %11350  ;;  %11364 = vtanh.f32 %v6861_v12  ;;  %v6863_v0 = vadd.f32 %v6824_v40, %v6607_v26  ;;  %v6769_v10 = vadd.f32 1.0, %v11349_v51 }
 0x64e   : > { %v11353_v1 = vpop.eup %11352  ;;  %11366 = vtanh.f32 %v6864_v59  ;;  %v6772_v60 = vadd.f32 1.0, %v11351_v32  ;;  %v15543_v32 = vld [vmem:[#allocation6_spill] sm:$0xff] }
 0x64f   : > { %v11355_v21 = vpop.eup %11354  ;;  %11368 = vtanh.f32 %v6863_v0  ;;  %v6771_v56 = vadd.f32 1.0, %v11353_v1  ;;  %v15545_v0 = vld [vmem:[#allocation33_spill] sm:$0xff]  ;;  %v15547_v1 = vld [vmem:[#allocation35_spill] sm:$0xff] }
 0x650   : > { %v11357_v28 = vpop.eup %11356  ;;  %11370 = vlog2.f32 %v6770_v6  ;;  %v6774_v50 = vadd.f32 1.0, %v11355_v21  ;;  %v15541_v6 = vld [vmem:[#allocation9_spill] sm:$0xff] }
 0x651   : > { %11372 = vlog2.f32 %v6769_v10  ;;  %v6773_v17 = vadd.f32 1.0, %v11357_v28  ;;  %v11359_v55 = vpop.eup %11358  ;;  %v15546_v10 = vld [vmem:[#allocation36_spill] sm:$0xff]  ;;  %v15549_v21 = vld [vmem:[#allocation37_spill] sm:$0xff]  ;;  %v15551_v28 = vld [vmem:[#allocation39_spill] sm:$0xff] }
 0x652   : > { %11374 = vlog2.f32 %v6772_v60  ;;  %v6924_v5 = vmul.f32 %v11359_v55, %v14529_v31  ;;  %v15548_v60 = vld [vmem:[#allocation38_spill] sm:$0xff]  ;;  %v15554_v55 = vld [vmem:[#allocation8_spill] sm:$0xff] }
 0x653   : > { %11376 = vlog2.f32 %v6771_v56  ;;  %v15550_v56 = vld [vmem:[#allocation40_spill] sm:$0xff] }
 0x654   : > { %v11361_v3 = vpop.eup %11360  ;;  %11378 = vlog2.f32 %v6774_v50  ;;  %v15552_v50 = vld [vmem:[#allocation42_spill] sm:$0xff] }
 0x655   : > { %v6923_v29 = vmul.f32 %v11361_v3, %v14532_v4  ;;  %11380 = vlog2.f32 %v6773_v17  ;;  %v11363_v54 = vpop.eup %11362  ;;  %v15553_v17 = vld [vmem:[#allocation41_spill] sm:$0xff]  ;;  %v15555_v3 = vld [vmem:[#allocation43_spill] sm:$0xff] }
 0x656   : > { %v6926_v43 = vmul.f32 %v11363_v54, %v14552_v47  ;;  %v15557_v54 = vld [vmem:[#allocation44_spill] sm:$0xff] }
 0x657   : > { %v11365_v44 = vpop.eup %11364  ;;  %10388 = vmatprep.mubr.msk.f32.mxu0 %vm3618_vm5, %v6923_v29  ;;  %v15556_v29 = vld [vmem:[#allocation10_spill] sm:$0xff] }
 0x658   : > { %v11367_v35 = vpop.eup %11366  ;;  %v6925_v61 = vmul.f32 %v11365_v44, %v14566_v13  ;;  %10389 = vmatmul.mubr.msk.f32.gmra.mrb[52].mxu0 %vm3618_vm5, %v6924_v5  ;;  %v15558_v5 = vld [vmem:[#allocation12_spill] sm:$0xff]  ;;  %v15559_v44 = vld [vmem:[#allocation11_spill] sm:$0xff] }
 0x659   : > { %v11369_v45 = vpop.eup %11368 }
 0x65a   : > { %v11371_v14 = vpop.eup %11370  ;;  %v6927_v15 = vmul.f32 %v11369_v45, %v14580_v62  ;;  %10391 = vmatprep.mubr.msk.f32.mxu0 %vm3618_vm5, %v6925_v61  ;;  %v6928_v62 = vmul.f32 %v11367_v35, %v14572_v37  ;;  %v15560_v35 = vld [vmem:[#allocation16_spill] sm:$0xff]  ;;  %v15561_v61 = vld [vmem:[#allocation13_spill] sm:$0xff] }
 0x65b   : > { %v11373_v4 = vpop.eup %11372  ;;  %v6830_v31 = vmul.f32 0.6931472, %v11371_v14  ;;  %v15562_v45 = vld [vmem:[#allocation25_spill] sm:$0xff]  ;;  %v15563_v14 = vld [vmem:[#allocation18_spill] sm:$0xff] }
 0x65c   : > { %v11375_v2 = vpop.eup %11374  ;;  %v6828_v53 = vmul.f32 0.6931472, %v11373_v4  ;;  %10392 = vmatmul.mubr.msk.f32.gmra.mrb[54].mxu0 %vm3618_vm5, %v6926_v43  ;;  %v15564_v43 = vld [vmem:[#allocation30_spill] sm:$0xff] }
 0x65d   : > { %v11377_v13 = vpop.eup %11376  ;;  %v6866_v52 = vadd.f32 %v6830_v31, %v6610_v42  ;;  %v6834_v46 = vmul.f32 0.6931472, %v11375_v2  ;;  %10394 = vmatprep.mubr.msk.f32.mxu0 %vm3618_vm5, %v6927_v15  ;;  %v15565_v15 = vld [vmem:[#allocation29_spill] sm:$0xff]  ;;  %v15566_v4 = vld [vmem:[#allocation46_spill] sm:$0xff]  ;;  %v15567_v42 = vld [vmem:[#allocation31_spill] sm:$0xff] }
 0x65e   : > { %v11379_v47 = vpop.eup %11378  ;;  %v6865_v8 = vadd.f32 %v6828_v53, %v6609_v18  ;;  %v6832_v9 = vmul.f32 0.6931472, %v11377_v13  ;;  %v15568_v31 = vld [vmem:[#allocation50_spill] sm:$0xff]  ;;  %v15569_v2 = vld [vmem:[#allocation49_spill] sm:$0xff] }
 0x65f   : > { %v11381_v20 = vpop.eup %11380  ;;  %11382 = vtanh.f32 %v6866_v52  ;;  %v6868_v19 = vadd.f32 %v6834_v46, %v6612_v30  ;;  %v6838_v63 = vmul.f32 0.6931472, %v11379_v47  ;;  %v14751_v18 = vld [vmem:[%s15112_s9] ss:$0 sm:$0xff] }
 0x660   : > { %11384 = vtanh.f32 %v6865_v8  ;;  %v6867_v33 = vadd.f32 %v6832_v9, %v6611_v58  ;;  %v6836_v27 = vmul.f32 0.6931472, %v11381_v20  ;;  %10395 = vmatmul.mubr.msk.f32.gmra.mrb[56].mxu0 %vm3618_vm5, %v6928_v62  ;;  %v14756_v13 = vld [vmem:[%s15113_s10] ss:$0 sm:$0xff] }
 0x661   : > { %v6870_v37 = vadd.f32 %v6838_v63, %v6614_v38 }
 0x662   : > { %11386 = vtanh.f32 %v6867_v33  ;;  %v6869_v39 = vadd.f32 %v6836_v27, %v6613_v36 }
 0x663   : > { %11388 = vtanh.f32 %v6868_v19 }
 0x664   : > { %11390 = vtanh.f32 %v6869_v39 }
 0x665   : > { %11392 = vtanh.f32 %v6870_v37 }
 0x669   : > { %v11383_v16 = vpop.eup %11382 }
 0x66a   : > { %v11385_v7 = vpop.eup %11384  ;;  %v6930_v49 = vmul.f32 %v11383_v16, %v14598_v57 }
 0x66b   : > { %v6929_v24 = vmul.f32 %v11385_v7, %v14604_v34  ;;  %v15538_v34 = vld [vmem:[#allocation4_spill] sm:$0xff] }
 0x66c   : > { %v11387_v11 = vpop.eup %11386 }
 0x66d   : > { %v11389_v23 = vpop.eup %11388  ;;  %v6931_v12 = vmul.f32 %v11387_v11, %v14620_v25  ;;  %10397 = vmatprep.mubr.msk.f32.mxu0 %vm3618_vm5, %v6929_v24  ;;  %v15539_v25 = vld [vmem:[#allocation3_spill] sm:$0xff] }
 0x66e   : > { %v11391_v26 = vpop.eup %11390  ;;  %10398 = vmatmul.mubr.msk.f32.gmra.mrb[58].mxu0 %vm3618_vm5, %v6930_v49  ;;  %v6932_v51 = vmul.f32 %v11389_v23, %v14612_v41  ;;  %v15542_v41 = vld [vmem:[#allocation7_spill] sm:$0xff] }
 0x66f   : > { %v6933_v40 = vmul.f32 %v11391_v26, %v14633_v22  ;;  %10400 = vmatprep.mubr.msk.f32.mxu0 %vm3618_vm5, %v6931_v12  ;;  %v11393_v59 = vpop.eup %11392  ;;  %v15540_v22 = vld [vmem:[#allocation5_spill] sm:$0xff] }
 0x670   : > { %v6934_v57 = vmul.f32 %v11393_v59, %v14627_v48  ;;  %v15544_v48 = vld [vmem:[#allocation34_spill] sm:$0xff] }
 0x672   : > { %10401 = vmatmul.mubr.msk.f32.gmra.mrb[60].mxu0 %vm3618_vm5, %v6932_v51 }
 0x673   : > { %10403 = vmatprep.mubr.msk.f32.mxu0 %vm3618_vm5, %v6933_v40 }
 0x676   : > { %10404 = vmatmul.mubr.msk.f32.gmra.mrb[62].mxu0 %vm3618_vm5, %v6934_v57 }
 0x677   : > { %10408 = vmatprep.mubr.msk.f32.mxu0 %vm3618_vm5, %v15538_v34 }
 0x67a   : > { %10409 = vmatmul.mubr.msk.f32.vlgmr.msra.gmra.mrb[32].mxu0 %vm3618_vm5, %v15539_v25 }
 0x67b   : > { %10411 = vmatprep.mubr.msk.f32.mxu0 %vm3618_vm5, %v15540_v22 }
 0x67e   : > { %10412 = vmatmul.mubr.msk.f32.gmra.mrb[34].mxu0 %vm3618_vm5, %v15541_v6 }
 0x67f   : > { %10414 = vmatprep.mubr.msk.f32.mxu0 %vm3618_vm5, %v15542_v41 }
 0x682   : > { %10415 = vmatmul.mubr.msk.f32.gmra.mrb[36].mxu0 %vm3618_vm5, %v15543_v32 }
 0x683   : > { %10417 = vmatprep.mubr.msk.f32.mxu0 %vm3618_vm5, %v15544_v48 }
 0x686   : > { %10418 = vmatmul.mubr.msk.f32.gmra.mrb[38].mxu0 %vm3618_vm5, %v15545_v0 }
 0x687   : > { %10420 = vmatprep.mubr.msk.f32.mxu0 %vm3618_vm5, %v15546_v10 }
 0x68a   : > { %10421 = vmatmul.mubr.msk.f32.gmra.mrb[40].mxu0 %vm3618_vm5, %v15547_v1 }
 0x68b   : > { %10423 = vmatprep.mubr.msk.f32.mxu0 %vm3618_vm5, %v15548_v60 }
 0x68e   : > { %10424 = vmatmul.mubr.msk.f32.gmra.mrb[42].mxu0 %vm3618_vm5, %v15549_v21 }
 0x68f   : > { %10426 = vmatprep.mubr.msk.f32.mxu0 %vm3618_vm5, %v15550_v56 }
 0x692   : > { %10427 = vmatmul.mubr.msk.f32.gmra.mrb[44].mxu0 %vm3618_vm5, %v15551_v28 }
 0x693   : > { %10429 = vmatprep.mubr.msk.f32.mxu0 %vm3618_vm5, %v15552_v50 }
 0x696   : > { %10430 = vmatmul.mubr.msk.f32.gmra.mrb[46].mxu0 %vm3618_vm5, %v15553_v17 }
 0x697   : > { %10432 = vmatprep.mubr.msk.f32.mxu0 %vm3618_vm5, %v15554_v55 }
 0x69a   : > { %10433 = vmatmul.mubr.msk.f32.gmra.mrb[48].mxu0 %vm3618_vm5, %v15555_v3 }
 0x69b   : > { %10435 = vmatprep.mubr.msk.f32.mxu0 %vm3618_vm5, %v15556_v29 }
 0x69e   : > { %10436 = vmatmul.mubr.msk.f32.gmra.mrb[50].mxu0 %vm3618_vm5, %v15557_v54 }
 0x69f   : > { %10438 = vmatprep.mubr.msk.f32.mxu0 %vm3618_vm5, %v15558_v5 }
 0x6a2   : > { %10439 = vmatmul.mubr.msk.f32.gmra.mrb[52].mxu0 %vm3618_vm5, %v15559_v44 }
 0x6a3   : > { %10441 = vmatprep.mubr.msk.f32.mxu0 %vm3618_vm5, %v15560_v35 }
 0x6a6   : > { %10442 = vmatmul.mubr.msk.f32.gmra.mrb[54].mxu0 %vm3618_vm5, %v15561_v61 }
 0x6a7   : > { %10444 = vmatprep.mubr.msk.f32.mxu0 %vm3618_vm5, %v15562_v45 }
 0x6aa   : > { %10445 = vmatmul.mubr.msk.f32.gmra.mrb[56].mxu0 %vm3618_vm5, %v15563_v14 }
 0x6ab   : > { %10447 = vmatprep.mubr.msk.f32.mxu0 %vm3618_vm5, %v15564_v43 }
 0x6ae   : > { %10448 = vmatmul.mubr.msk.f32.gmra.mrb[58].mxu0 %vm3618_vm5, %v15565_v15 }
 0x6af   : > { %10450 = vmatprep.mubr.msk.f32.mxu0 %vm3618_vm5, %v15566_v4 }
 0x6b2   : > { %10451 = vmatmul.mubr.msk.f32.gmra.mrb[60].mxu0 %vm3618_vm5, %v15567_v42 }
 0x6b3   : > { %10453 = vmatprep.mubr.msk.f32.mxu0 %vm3618_vm5, %v15568_v31 }
 0x6b6   : > { %10454 = vmatmul.mubr.msk.f32.gmra.mrb[62].mxu0 %vm3618_vm5, %v15569_v2 }
 0x74d   : > { %v10410_v53 = vpop.f32.mrb[32].mxu0 }
 0x74e   : > { %v7593_v52 = vmul.f32 %v10410_v53, %v14751_v18  ;;  %v7426_v30 = vpop.f32.mrb[33].mxu0 }
 0x74f   : > { %v7592_v46 = vmul.f32 %v14751_v18, %v7426_v30 }
 0x750   : > { %v14761_v47 = vadd.f32 %v14756_v13, %v7593_v52 }
 0x751   : > { %v14764_v62 = vadd.f32 %v14756_v13, %v7592_v46  ;;  %v10413_v8 = vpop.f32.mrb[34].mxu0 }
 0x752   : > { %v7696_v58 = vand.u32 2147483647, %v14761_v47  ;;  %v7595_v9 = vmul.f32 %v10413_v8, %v14751_v18  ;;  %v7436_v20 = vpop.f32.mrb[35].mxu0  ;;  %v7664_v46 = vmax.f32 %v14761_v47, 0.0 }
 0x753   : > { %v7695_v19 = vand.u32 2147483647, %v14764_v62  ;;  %v7594_v63 = vmul.f32 %v14751_v18, %v7436_v20 }
 0x754   : > { %v7728_v33 = vsub.f32 0.0, %v7696_v58  ;;  %v14771_v36 = vadd.f32 %v14756_v13, %v7595_v9 }
 0x755   : > { %v7727_v27 = vsub.f32 0.0, %v7695_v19  ;;  %v14774_v38 = vadd.f32 %v14756_v13, %v7594_v63  ;;  %v10416_v39 = vpop.f32.mrb[36].mxu0  ;;  %v7663_v19 = vmax.f32 %v14764_v62, 0.0 }
 0x756   : > { %v7761_v37 = vmul.f32 1.442695, %v7728_v33  ;;  %v7698_v16 = vand.u32 2147483647, %v14771_v36  ;;  %v7597_v7 = vmul.f32 %v10416_v39, %v14751_v18  ;;  %v7446_v24 = vpop.f32.mrb[37].mxu0 }
 0x757   : > { %v7759_v11 = vmul.f32 1.442695, %v7727_v27  ;;  %v7697_v49 = vand.u32 2147483647, %v14774_v38  ;;  %v7596_v23 = vmul.f32 %v14751_v18, %v7446_v24 }
 0x758   : > { %11394 = vpow2.f32 %v7761_v37  ;;  %v7730_v12 = vsub.f32 0.0, %v7698_v16  ;;  %v14781_v26 = vadd.f32 %v14756_v13, %v7597_v7 }
 0x759   : > { %11396 = vpow2.f32 %v7759_v11  ;;  %v7729_v40 = vsub.f32 0.0, %v7697_v49  ;;  %v14784_v51 = vadd.f32 %v14756_v13, %v7596_v23  ;;  %v10419_v59 = vpop.f32.mrb[38].mxu0  ;;  %v7666_v23 = vmax.f32 %v14771_v36, 0.0 }
 0x75a   : > { %v7765_v57 = vmul.f32 1.442695, %v7730_v12  ;;  %v7700_v34 = vand.u32 2147483647, %v14781_v26  ;;  %v7599_v25 = vmul.f32 %v10419_v59, %v14751_v18  ;;  %v7456_v22 = vpop.f32.mrb[39].mxu0 }
 0x75b   : > { %v7763_v6 = vmul.f32 1.442695, %v7729_v40  ;;  %v7699_v41 = vand.u32 2147483647, %v14784_v51  ;;  %v7598_v32 = vmul.f32 %v14751_v18, %v7456_v22 }
 0x75c   : > { %11398 = vpow2.f32 %v7765_v57  ;;  %v7732_v48 = vsub.f32 0.0, %v7700_v34  ;;  %v14791_v0 = vadd.f32 %v14756_v13, %v7599_v25 }
 0x75d   : > { %11400 = vpow2.f32 %v7763_v6  ;;  %v7731_v10 = vsub.f32 0.0, %v7699_v41  ;;  %v14794_v1 = vadd.f32 %v14756_v13, %v7598_v32  ;;  %v10422_v60 = vpop.f32.mrb[40].mxu0 }
 0x75e   : > { %v7769_v21 = vmul.f32 1.442695, %v7732_v48  ;;  %v7702_v56 = vand.u32 2147483647, %v14791_v0  ;;  %v7601_v28 = vmul.f32 %v10422_v60, %v14751_v18  ;;  %v7466_v50 = vpop.f32.mrb[41].mxu0  ;;  %v7665_v60 = vmax.f32 %v14774_v38, 0.0 }
 0x75f   : > { %v7767_v17 = vmul.f32 1.442695, %v7731_v10  ;;  %v7701_v55 = vand.u32 2147483647, %v14794_v1  ;;  %v7600_v3 = vmul.f32 %v14751_v18, %v7466_v50 }
 0x760   : > { %11402 = vpow2.f32 %v7769_v21  ;;  %v7734_v29 = vsub.f32 0.0, %v7702_v56  ;;  %v14801_v54 = vadd.f32 %v14756_v13, %v7601_v28  ;;  %v7668_v28 = vmax.f32 %v14781_v26, 0.0 }
 0x761   : > { %11404 = vpow2.f32 %v7767_v17  ;;  %v7733_v5 = vsub.f32 0.0, %v7701_v55  ;;  %v14804_v44 = vadd.f32 %v14756_v13, %v7600_v3  ;;  %v10425_v35 = vpop.f32.mrb[42].mxu0 }
 0x762   : > { %v11395_v61 = vpop.eup %11394  ;;  %v7773_v45 = vmul.f32 1.442695, %v7734_v29  ;;  %v7704_v14 = vand.u32 2147483647, %v14801_v54  ;;  %v7603_v43 = vmul.f32 %v10425_v35, %v14751_v18  ;;  %v7476_v15 = vpop.f32.mrb[43].mxu0  ;;  %v7667_v29 = vmax.f32 %v14784_v51, 0.0 }
 0x763   : > { %v11397_v4 = vpop.eup %11396  ;;  %v7824_v42 = vadd.f32 1.0, %v11395_v61  ;;  %v7771_v31 = vmul.f32 1.442695, %v7733_v5  ;;  %v7703_v2 = vand.u32 2147483647, %v14804_v44  ;;  %v7602_v58 = vmul.f32 %v14751_v18, %v7476_v15 }
 0x764   : > { %v7823_v53 = vadd.f32 1.0, %v11397_v4  ;;  %11406 = vpow2.f32 %v7773_v45  ;;  %v7736_v52 = vsub.f32 0.0, %v7704_v14  ;;  %v14810_v30 = vadd.f32 %v14756_v13, %v7603_v43 }
 0x765   : > { %11408 = vlog2.f32 %v7824_v42  ;;  %v7735_v8 = vsub.f32 0.0, %v7703_v2  ;;  %v10428_v9 = vpop.f32.mrb[44].mxu0  ;;  %v14817_v7 = vadd.f32 %v14756_v13, %v7602_v58  ;;  %v7670_v58 = vmax.f32 %v14791_v0, 0.0 }
 0x766   : > { %v11399_v20 = vpop.eup %11398  ;;  %11410 = vlog2.f32 %v7823_v53  ;;  %v7777_v63 = vmul.f32 1.442695, %v7736_v52  ;;  %v7706_v33 = vand.u32 2147483647, %v14810_v30  ;;  %v7486_v27 = vpop.f32.mrb[45].mxu0  ;;  %v7605_v49 = vmul.f32 %v10428_v9, %v14751_v18 }
 0x767   : > { %v11401_v39 = vpop.eup %11400  ;;  %v7826_v37 = vadd.f32 1.0, %v11399_v20  ;;  %11412 = vpow2.f32 %v7771_v31  ;;  %v7775_v16 = vmul.f32 1.442695, %v7735_v8  ;;  %v7705_v12 = vand.u32 2147483647, %v14817_v7 }
 0x768   : > { %v7825_v24 = vadd.f32 1.0, %v11401_v39  ;;  %11414 = vpow2.f32 %v7777_v63  ;;  %v7738_v11 = vsub.f32 0.0, %v7706_v33  ;;  %v7604_v40 = vmul.f32 %v14751_v18, %v7486_v27 }
 0x769   : > { %11416 = vlog2.f32 %v7826_v37  ;;  %v10431_v59 = vpop.f32.mrb[46].mxu0  ;;  %v14824_v25 = vadd.f32 %v14756_v13, %v7605_v49  ;;  %v7737_v48 = vsub.f32 0.0, %v7705_v12  ;;  %v7669_v33 = vmax.f32 %v14794_v1, 0.0 }
 0x76a   : > { %v11403_v57 = vpop.eup %11402  ;;  %11418 = vlog2.f32 %v7825_v24  ;;  %v7781_v34 = vmul.f32 1.442695, %v7738_v11  ;;  %v7607_v22 = vmul.f32 %v10431_v59, %v14751_v18  ;;  %v7496_v6 = vpop.f32.mrb[47].mxu0  ;;  %v14828_v10 = vadd.f32 %v14756_v13, %v7604_v40 }
 0x76b   : > { %v11405_v41 = vpop.eup %11404  ;;  %v7828_v32 = vadd.f32 1.0, %v11403_v57  ;;  %11420 = vpow2.f32 %v7775_v16  ;;  %v7708_v56 = vand.u32 2147483647, %v14824_v25  ;;  %v7779_v50 = vmul.f32 1.442695, %v7737_v48 }
 0x76c   : > { %v7827_v21 = vadd.f32 1.0, %v11405_v41  ;;  %11422 = vpow2.f32 %v7781_v34  ;;  %v7707_v17 = vand.u32 2147483647, %v14828_v10  ;;  %v7606_v35 = vmul.f32 %v14751_v18, %v7496_v6 }
 0x76d   : > { %11424 = vlog2.f32 %v7828_v32  ;;  %v10434_v55 = vpop.f32.mrb[48].mxu0  ;;  %v7740_v5 = vsub.f32 0.0, %v7708_v56  ;;  %v14837_v15 = vadd.f32 %v14756_v13, %v7607_v22  ;;  %v7672_v22 = vmax.f32 %v14801_v54, 0.0 }
 0x76e   : > { %v11407_v3 = vpop.eup %11406  ;;  %11426 = vlog2.f32 %v7827_v21  ;;  %v7506_v61 = vpop.f32.mrb[49].mxu0  ;;  %v7739_v43 = vsub.f32 0.0, %v7707_v17  ;;  %v14840_v2 = vadd.f32 %v14756_v13, %v7606_v35  ;;  %v7609_v53 = vmul.f32 %v10434_v55, %v14751_v18 }
 0x76f   : > { %v11409_v45 = vpop.eup %11408  ;;  %v7830_v14 = vadd.f32 1.0, %v11407_v3  ;;  %11428 = vpow2.f32 %v7779_v50  ;;  %v7785_v31 = vmul.f32 1.442695, %v7740_v5  ;;  %v7710_v11 = vand.u32 2147483647, %v14837_v15 }
 0x770   : > { %v11411_v4 = vpop.eup %11410  ;;  %v7858_v42 = vmul.f32 0.6931472, %v11409_v45  ;;  %v7783_v9 = vmul.f32 1.442695, %v7739_v43  ;;  %v7709_v59 = vand.u32 2147483647, %v14840_v2 }
 0x771   : > { %v11413_v52 = vpop.eup %11412  ;;  %v7856_v8 = vmul.f32 0.6931472, %v11411_v4  ;;  %11430 = vlog2.f32 %v7830_v14  ;;  %v10437_v39 = vpop.f32.mrb[50].mxu0  ;;  %v7671_v48 = vmax.f32 %v14804_v44, 0.0  ;;  %v7742_v3 = vsub.f32 0.0, %v7710_v11 }
 0x772   : > { %v11415_v20 = vpop.eup %11414  ;;  %v7920_v63 = vadd.f32 %v7858_v42, %v7664_v46  ;;  %v7829_v27 = vadd.f32 1.0, %v11413_v52  ;;  %11432 = vpow2.f32 %v7785_v31  ;;  %v7516_v49 = vpop.f32.mrb[51].mxu0  ;;  %v14852_v46 = vadd.f32 %v14756_v13, %v7609_v53 }
 0x773   : > { %v11417_v37 = vpop.eup %11416  ;;  %v7919_v16 = vadd.f32 %v7856_v8, %v7663_v19  ;;  %v7832_v24 = vadd.f32 1.0, %v11415_v20  ;;  %11434 = vpow2.f32 %v7783_v9  ;;  %v7608_v19 = vmul.f32 %v14751_v18, %v7506_v61 }
 0x774   : > { %v11419_v12 = vpop.eup %11418  ;;  %11436 = vtanh.f32 %v7920_v63  ;;  %v7862_v40 = vmul.f32 0.6931472, %v11417_v37  ;;  %v7741_v61 = vsub.f32 0.0, %v7709_v59  ;;  %v7712_v45 = vand.u32 2147483647, %v14852_v46 }
 0x775   : > { %v11421_v57 = vpop.eup %11420  ;;  %11438 = vtanh.f32 %v7919_v16  ;;  %v7860_v34 = vmul.f32 0.6931472, %v11419_v12  ;;  %v10440_v6 = vpop.f32.mrb[52].mxu0  ;;  %v14861_v43 = vadd.f32 %v14756_v13, %v7608_v19  ;;  %v7611_v4 = vmul.f32 %v10437_v39, %v14751_v18 }
 0x776   : > { %v11423_v41 = vpop.eup %11422  ;;  %v7922_v32 = vadd.f32 %v7862_v40, %v7666_v23  ;;  %11440 = vlog2.f32 %v7829_v27  ;;  %v7831_v21 = vadd.f32 1.0, %v11421_v57  ;;  %v7526_v56 = vpop.f32.mrb[53].mxu0  ;;  %v7744_v53 = vsub.f32 0.0, %v7712_v45 }
 0x777   : > { %v11425_v50 = vpop.eup %11424  ;;  %v7921_v17 = vadd.f32 %v7860_v34, %v7665_v60  ;;  %11442 = vlog2.f32 %v7832_v24  ;;  %v7834_v55 = vadd.f32 1.0, %v11423_v41  ;;  %v7789_v20 = vmul.f32 1.442695, %v7742_v3 }
 0x778   : > { %v11427_v5 = vpop.eup %11426  ;;  %11444 = vtanh.f32 %v7922_v32  ;;  %v7866_v35 = vmul.f32 0.6931472, %v11425_v50  ;;  %v7711_v63 = vand.u32 2147483647, %v14861_v43  ;;  %v7787_v37 = vmul.f32 1.442695, %v7741_v61 }
 0x779   : > { %v11429_v14 = vpop.eup %11428  ;;  %11446 = vtanh.f32 %v7921_v17  ;;  %v7864_v23 = vmul.f32 0.6931472, %v11427_v5  ;;  %v14864_v42 = vpop.f32.mrb[54].mxu0  ;;  %v7610_v12 = vmul.f32 %v14751_v18, %v7516_v49  ;;  %v7793_v34 = vmul.f32 1.442695, %v7744_v53 }
 0x77a   : > { %v7924_v60 = vadd.f32 %v7866_v35, %v7668_v28  ;;  %11448 = vlog2.f32 %v7831_v21  ;;  %v7833_v31 = vadd.f32 1.0, %v11429_v14  ;;  %v14868_v52 = vpop.f32.mrb[55].mxu0  ;;  %v14875_v28 = vadd.f32 %v14756_v13, %v7611_v4 }
 0x77b   : > { %v11431_v8 = vpop.eup %11430  ;;  %v7923_v9 = vadd.f32 %v7864_v23, %v7667_v29  ;;  %11450 = vlog2.f32 %v7834_v55  ;;  %v7743_v11 = vsub.f32 0.0, %v7711_v63  ;;  %v7613_v55 = vmul.f32 %v10440_v6, %v14751_v18 }
 0x77c   : > { %v11433_v27 = vpop.eup %11432  ;;  %11452 = vtanh.f32 %v7924_v60  ;;  %v7870_v39 = vmul.f32 0.6931472, %v11431_v8  ;;  %v7714_v21 = vand.u32 2147483647, %v14875_v28  ;;  %v7612_v35 = vmul.f32 %v14751_v18, %v7526_v56 }
 0x77d   : > { %v11435_v16 = vpop.eup %11434  ;;  %11454 = vtanh.f32 %v7923_v9  ;;  %v7836_v24 = vadd.f32 1.0, %v11433_v27  ;;  %v14878_v40 = vpop.f32.mrb[56].mxu0  ;;  %v7791_v32 = vmul.f32 1.442695, %v7743_v11  ;;  %v7674_v14 = vmax.f32 %v14810_v30, 0.0 }
 0x77e   : > { %v11437_v29 = vpop.eup %11436  ;;  %v7926_v59 = vadd.f32 %v7870_v39, %v7670_v58  ;;  %11456 = vlog2.f32 %v7833_v31  ;;  %v7835_v57 = vadd.f32 1.0, %v11435_v16  ;;  %v14887_v19 = vpop.f32.mrb[57].mxu0  ;;  %v14893_v58 = vadd.f32 %v14756_v13, %v7610_v12 }
 0x77f   : > { %v11439_v41 = vpop.eup %11438  ;;  %v7984_v49 = vmul.f32 %v11437_v29, %v14761_v47  ;;  %11458 = vlog2.f32 %v7836_v24  ;;  %v7746_v47 = vsub.f32 0.0, %v7714_v21  ;;  %v7615_v16 = vmul.f32 %v14864_v42, %v14751_v18 }
 0x780   : > { %v11441_v50 = vpop.eup %11440  ;;  %v7983_v17 = vmul.f32 %v11439_v41, %v14764_v62  ;;  %11460 = vtanh.f32 %v7926_v59  ;;  %v7713_v6 = vand.u32 2147483647, %v14893_v58 }
 0x781   : > { %v11443_v3 = vpop.eup %11442  ;;  %8017 = vst.msk [vmem:[%s14883_s28 + $0x8] sm:$0xff] %vm8015_vm7, %v7984_v49  ;;  %v7868_v5 = vmul.f32 0.6931472, %v11441_v50  ;;  %11462 = vlog2.f32 %v7835_v57  ;;  %v14899_v61 = vpop.f32.mrb[58].mxu0 }
 0x782   : > { %v11445_v45 = vpop.eup %11444  ;;  %8016 = vst.msk [vmem:[%s14883_s28] sm:$0xff] %vm8015_vm7, %v7983_v17  ;;  %v7874_v62 = vmul.f32 0.6931472, %v11443_v3  ;;  %11464 = vpow2.f32 %v7789_v20  ;;  %v14905_v23 = vpop.f32.mrb[59].mxu0  ;;  %v7797_v31 = vmul.f32 1.442695, %v7746_v47 }
 0x783   : > { %v11447_v4 = vpop.eup %11446  ;;  %v7986_v60 = vmul.f32 %v11445_v45, %v14771_v36  ;;  %v7925_v56 = vadd.f32 %v7868_v5, %v7669_v33  ;;  %11466 = vpow2.f32 %v7787_v37  ;;  %v7745_v20 = vsub.f32 0.0, %v7713_v6 }
 0x784   : > { %v11449_v53 = vpop.eup %11448  ;;  %v7985_v8 = vmul.f32 %v11447_v4, %v14774_v38  ;;  %v7928_v9 = vadd.f32 %v7874_v62, %v7672_v22  ;;  %11468 = vpow2.f32 %v7793_v34  ;;  %v14916_v36 = vadd.f32 %v14756_v13, %v7613_v55 }
 0x785   : > { %v11451_v63 = vpop.eup %11450  ;;  %8019 = vst.msk [vmem:[%s14883_s28 + $0x18] sm:$0xff] %vm8015_vm7, %v7986_v60  ;;  %11470 = vtanh.f32 %v7925_v56  ;;  %v7872_v27 = vmul.f32 0.6931472, %v11449_v53  ;;  %v14919_v33 = vadd.f32 %v14756_v13, %v7612_v35  ;;  %v14921_v39 = vpop.f32.mrb[60].mxu0  ;;  %v7673_v22 = vmax.f32 %v14817_v7, 0.0 }
 0x786   : > { %v11453_v37 = vpop.eup %11452  ;;  %8018 = vst.msk [vmem:[%s14883_s28 + $0x10] sm:$0xff] %vm8015_vm7, %v7985_v8  ;;  %11472 = vtanh.f32 %v7928_v9  ;;  %v7878_v38 = vmul.f32 0.6931472, %v11451_v63  ;;  %v14928_v24 = vpop.f32.mrb[61].mxu0  ;;  %v14944_v55 = vadd.f32 %v14756_v13, %v7615_v16 }
 0x787   : > { %v11455_v11 = vpop.eup %11454  ;;  %v7988_v12 = vmul.f32 %v11453_v37, %v14781_v26  ;;  %v7927_v29 = vadd.f32 %v7872_v27, %v7671_v48  ;;  %11474 = vpow2.f32 %v7791_v32  ;;  %v7795_v59 = vmul.f32 1.442695, %v7745_v20 }
 0x788   : > { %v11457_v57 = vpop.eup %11456  ;;  %v7987_v34 = vmul.f32 %v11455_v11, %v14784_v51  ;;  %v7930_v41 = vadd.f32 %v7878_v38, %v7674_v14  ;;  %11476 = vpow2.f32 %v7797_v31  ;;  %v7716_v49 = vand.u32 2147483647, %v14916_v36 }
 0x789   : > { %v11459_v21 = vpop.eup %11458  ;;  %8021 = vst.msk [vmem:[%s14883_s28 + $0x28] sm:$0xff] %vm8015_vm7, %v7988_v12  ;;  %11478 = vtanh.f32 %v7927_v29  ;;  %v7876_v42 = vmul.f32 0.6931472, %v11457_v57  ;;  %v7676_v26 = vmax.f32 %v14824_v25, 0.0  ;;  %v7715_v50 = vand.u32 2147483647, %v14919_v33 }
 0x78a   : > { %v14939_v48 = vpop.f32.mrb[62].mxu0  ;;  %v11461_v32 = vpop.eup %11460  ;;  %8020 = vst.msk [vmem:[%s14883_s28 + $0x20] sm:$0xff] %vm8015_vm7, %v7987_v34  ;;  %11480 = vtanh.f32 %v7930_v41  ;;  %v7882_v51 = vmul.f32 0.6931472, %v11459_v21  ;;  %v7748_v17 = vsub.f32 0.0, %v7716_v49  ;;  %v7675_v14 = vmax.f32 %v14828_v10, 0.0 }
 0x78b   : > { %v14946_v3 = vpop.f32.mrb[63].mxu0  ;;  %v11463_v5 = vpop.eup %11462  ;;  %v7990_v47 = vmul.f32 %v11461_v32, %v14791_v0  ;;  %v7929_v35 = vadd.f32 %v7876_v42, %v7673_v22  ;;  %11482 = vpow2.f32 %v7795_v59  ;;  %v7747_v4 = vsub.f32 0.0, %v7715_v50 }
 0x78c   : > { %v11465_v45 = vpop.eup %11464  ;;  %v7932_v62 = vadd.f32 %v7882_v51, %v7676_v26  ;;  %v7880_v6 = vmul.f32 0.6931472, %v11463_v5  ;;  %v7801_v31 = vmul.f32 1.442695, %v7748_v17  ;;  %v7718_v53 = vand.u32 2147483647, %v14944_v55 }
 0x78d   : > { %v11467_v60 = vpop.eup %11466  ;;  %8023 = vst.msk [vmem:[%s14883_s28 + $0x38] sm:$0xff] %vm8015_vm7, %v7990_v47  ;;  %11484 = vtanh.f32 %v7929_v35  ;;  %v7838_v56 = vadd.f32 1.0, %v11465_v45  ;;  %v7614_v20 = vmul.f32 %v14751_v18, %v14868_v52  ;;  %v7617_v38 = vmul.f32 %v14878_v40, %v14751_v18 }
 0x78e   : > { %v11469_v8 = vpop.eup %11468  ;;  %11486 = vtanh.f32 %v7932_v62  ;;  %v7931_v9 = vadd.f32 %v7880_v6, %v7675_v14  ;;  %v7837_v0 = vadd.f32 1.0, %v11467_v60  ;;  %v7750_v37 = vsub.f32 0.0, %v7718_v53 }
 0x78f   : > { %v11471_v63 = vpop.eup %11470  ;;  %11488 = vlog2.f32 %v7838_v56  ;;  %v7840_v27 = vadd.f32 1.0, %v11469_v8  ;;  %v14959_v11 = vadd.f32 %v14756_v13, %v7614_v20  ;;  %v7616_v12 = vmul.f32 %v14751_v18, %v14887_v19 }
 0x790   : > { %v11473_v22 = vpop.eup %11472  ;;  %v7989_v16 = vmul.f32 %v11471_v63, %v14794_v1  ;;  %11490 = vtanh.f32 %v7931_v9  ;;  %v14965_v59 = vadd.f32 %v14756_v13, %v7617_v38  ;;  %v7799_v1 = vmul.f32 1.442695, %v7747_v4 }
 0x791   : > { %v11475_v52 = vpop.eup %11474  ;;  %v7992_v29 = vmul.f32 %v11473_v22, %v14801_v54  ;;  %11492 = vlog2.f32 %v7837_v0  ;;  %v7717_v34 = vand.u32 2147483647, %v14959_v11  ;;  %v7805_v49 = vmul.f32 1.442695, %v7750_v37 }
 0x792   : > { %v11477_v57 = vpop.eup %11476  ;;  %8022 = vst.msk [vmem:[%s14883_s28 + $0x30] sm:$0xff] %vm8015_vm7, %v7989_v16  ;;  %11494 = vlog2.f32 %v7840_v27  ;;  %v7839_v40 = vadd.f32 1.0, %v11475_v52  ;;  %v7720_v54 = vand.u32 2147483647, %v14965_v59  ;;  %v14975_v50 = vadd.f32 %v14756_v13, %v7616_v12 }
 0x793   : > { %v11479_v41 = vpop.eup %11478  ;;  %8025 = vst.msk [vmem:[%s14883_s28 + $0x48] sm:$0xff] %vm8015_vm7, %v7992_v29  ;;  %v7842_v19 = vadd.f32 1.0, %v11477_v57  ;;  %11496 = vpow2.f32 %v7801_v31  ;;  %v7749_v26 = vsub.f32 0.0, %v7717_v34  ;;  %v7619_v35 = vmul.f32 %v14899_v61, %v14751_v18 }
 0x794   : > { %v11481_v21 = vpop.eup %11480  ;;  %v7991_v42 = vmul.f32 %v11479_v41, %v14804_v44  ;;  %11498 = vlog2.f32 %v7839_v40  ;;  %v7752_v17 = vsub.f32 0.0, %v7720_v54  ;;  %v7719_v62 = vand.u32 2147483647, %v14975_v50 }
 0x795   : > { %v11483_v32 = vpop.eup %11482  ;;  %v7994_v51 = vmul.f32 %v11481_v21, %v14810_v30  ;;  %11500 = vlog2.f32 %v7842_v19  ;;  %v7803_v47 = vmul.f32 1.442695, %v7749_v26  ;;  %v7678_v6 = vmax.f32 %v14837_v15, 0.0 }
 0x796   : > { %8024 = vst.msk [vmem:[%s14883_s28 + $0x40] sm:$0xff] %vm8015_vm7, %v7991_v42  ;;  %v7841_v5 = vadd.f32 1.0, %v11483_v32  ;;  %11502 = vpow2.f32 %v7799_v1  ;;  %v7809_v44 = vmul.f32 1.442695, %v7752_v17  ;;  %v7618_v4 = vmul.f32 %v14751_v18, %v14905_v23 }
 0x797   : > { %v11485_v45 = vpop.eup %11484  ;;  %8027 = vst.msk [vmem:[%s14883_s28 + $0x58] sm:$0xff] %vm8015_vm7, %v7994_v51  ;;  %11504 = vpow2.f32 %v7805_v49  ;;  %v7751_v56 = vsub.f32 0.0, %v7719_v62  ;;  %v7621_v31 = vmul.f32 %v14921_v39, %v14751_v18  ;;  %v14996_v9 = vadd.f32 %v14756_v13, %v7619_v35 }
 0x798   : > { %v11487_v14 = vpop.eup %11486  ;;  %v7993_v30 = vmul.f32 %v11485_v45, %v14817_v7  ;;  %11506 = vlog2.f32 %v7841_v5  ;;  %v7677_v7 = vmax.f32 %v14840_v2, 0.0  ;;  %v7680_v0 = vmax.f32 %v14852_v46, 0.0 }
 0x799   : > { %v11489_v60 = vpop.eup %11488  ;;  %v7996_v61 = vmul.f32 %v11487_v14, %v14824_v25  ;;  %11508 = vpow2.f32 %v7803_v47  ;;  %v7807_v20 = vmul.f32 1.442695, %v7751_v56  ;;  %v15003_v39 = vadd.f32 %v14756_v13, %v7618_v4 }
 0x79a   : > { %v11491_v53 = vpop.eup %11490  ;;  %8026 = vst.msk [vmem:[%s14883_s28 + $0x50] sm:$0xff] %vm8015_vm7, %v7993_v30  ;;  %v7886_v8 = vmul.f32 0.6931472, %v11489_v60  ;;  %11510 = vpow2.f32 %v7809_v44  ;;  %v7679_v38 = vmax.f32 %v14861_v43, 0.0  ;;  %v7620_v22 = vmul.f32 %v14751_v18, %v14928_v24 }
 0x79b   : > { %v11493_v23 = vpop.eup %11492  ;;  %8029 = vst.msk [vmem:[%s14883_s28 + $0x68] sm:$0xff] %vm8015_vm7, %v7996_v61  ;;  %v7995_v25 = vmul.f32 %v11491_v53, %v14828_v10  ;;  %v7682_v10 = vmax.f32 %v14875_v28, 0.0  ;;  %11512 = vpow2.f32 %v7807_v20  ;;  %v15012_v52 = vadd.f32 %v14756_v13, %v7621_v31 }
 0x79c   : > { %v11495_v63 = vpop.eup %11494  ;;  %v7934_v27 = vadd.f32 %v7886_v8, %v7678_v6  ;;  %v7884_v37 = vmul.f32 0.6931472, %v11493_v23  ;;  %v7722_v1 = vand.u32 2147483647, %v14996_v9  ;;  %v7681_v24 = vmax.f32 %v14893_v58, 0.0 }
 0x79d   : > { %v11497_v16 = vpop.eup %11496  ;;  %8028 = vst.msk [vmem:[%s14883_s28 + $0x60] sm:$0xff] %vm8015_vm7, %v7995_v25  ;;  %v7890_v12 = vmul.f32 0.6931472, %v11495_v63  ;;  %v7721_v49 = vand.u32 2147483647, %v15003_v39  ;;  %v15018_v42 = vadd.f32 %v14756_v13, %v7620_v22  ;;  %v7623_v26 = vmul.f32 %v14939_v48, %v14751_v18 }
 0x79e   : > { %v11499_v29 = vpop.eup %11498  ;;  %11514 = vtanh.f32 %v7934_v27  ;;  %v7933_v57 = vadd.f32 %v7884_v37, %v7677_v7  ;;  %v7844_v40 = vadd.f32 1.0, %v11497_v16  ;;  %v7724_v5 = vand.u32 2147483647, %v15012_v52 }
 0x79f   : > { %v11501_v34 = vpop.eup %11500  ;;  %v7936_v41 = vadd.f32 %v7890_v12, %v7680_v0  ;;  %v7888_v19 = vmul.f32 0.6931472, %v11499_v29  ;;  %v7754_v44 = vsub.f32 0.0, %v7722_v1  ;;  %v7753_v30 = vsub.f32 0.0, %v7721_v49 }
 0x7a0   : > { %v11503_v54 = vpop.eup %11502  ;;  %11516 = vtanh.f32 %v7933_v57  ;;  %v7894_v21 = vmul.f32 0.6931472, %v11501_v34  ;;  %v7723_v6 = vand.u32 2147483647, %v15018_v42  ;;  %v15025_v60 = vadd.f32 %v14756_v13, %v7623_v26 }
 0x7a1   : > { %v11505_v32 = vpop.eup %11504  ;;  %11518 = vtanh.f32 %v7936_v41  ;;  %v7935_v51 = vadd.f32 %v7888_v19, %v7679_v38  ;;  %v7843_v17 = vadd.f32 1.0, %v11503_v54  ;;  %v7756_v31 = vsub.f32 0.0, %v7724_v5 }
 0x7a2   : > { %v11507_v47 = vpop.eup %11506  ;;  %v7938_v35 = vadd.f32 %v7894_v21, %v7682_v10  ;;  %11520 = vlog2.f32 %v7844_v40  ;;  %v7846_v45 = vadd.f32 1.0, %v11505_v32  ;;  %v7755_v53 = vsub.f32 0.0, %v7723_v6 }
 0x7a3   : > { %v11509_v62 = vpop.eup %11508  ;;  %11522 = vtanh.f32 %v7935_v51  ;;  %v7892_v14 = vmul.f32 0.6931472, %v11507_v47  ;;  %v7726_v8 = vand.u32 2147483647, %v15025_v60  ;;  %v7622_v7 = vmul.f32 %v14751_v18, %v14946_v3 }
 0x7a4   : > { %v11511_v4 = vpop.eup %11510  ;;  %11524 = vtanh.f32 %v7938_v35  ;;  %v7845_v48 = vadd.f32 1.0, %v11509_v62  ;;  %v7813_v25 = vmul.f32 1.442695, %v7754_v44  ;;  %v7811_v0 = vmul.f32 1.442695, %v7753_v30 }
 0x7a5   : > { %v7937_v61 = vadd.f32 %v7892_v14, %v7681_v24  ;;  %11526 = vlog2.f32 %v7843_v17  ;;  %v7848_v56 = vadd.f32 1.0, %v11511_v4  ;;  %v11513_v23 = vpop.eup %11512  ;;  %v7758_v27 = vsub.f32 0.0, %v7726_v8 }
 0x7a6   : > { %11528 = vlog2.f32 %v7846_v45  ;;  %v7847_v63 = vadd.f32 1.0, %v11513_v23  ;;  %v15031_v37 = vadd.f32 %v14756_v13, %v7622_v7  ;;  %v7817_v22 = vmul.f32 1.442695, %v7756_v31 }
 0x7a7   : > { %11530 = vtanh.f32 %v7937_v61  ;;  %v7815_v18 = vmul.f32 1.442695, %v7755_v53  ;;  %v7821_v29 = vmul.f32 1.442695, %v7758_v27  ;;  %v7684_v1 = vmax.f32 %v14916_v36, 0.0 }
 0x7a8   : > { %v11515_v20 = vpop.eup %11514  ;;  %11532 = vlog2.f32 %v7845_v48  ;;  %v7725_v3 = vand.u32 2147483647, %v15031_v37  ;;  %v7683_v21 = vmax.f32 %v14919_v33, 0.0  ;;  %v7685_v45 = vmax.f32 %v14959_v11, 0.0 }
 0x7a9   : > { %v7998_v38 = vmul.f32 %v11515_v20, %v14837_v15  ;;  %11534 = vlog2.f32 %v7848_v56  ;;  %v7688_v14 = vmax.f32 %v14965_v59, 0.0  ;;  %v7687_v48 = vmax.f32 %v14975_v50, 0.0 }
 0x7aa   : > { %v11517_v16 = vpop.eup %11516  ;;  %11536 = vlog2.f32 %v7847_v63  ;;  %v7757_v15 = vsub.f32 0.0, %v7725_v3 }
 0x7ab   : > { %v11519_v12 = vpop.eup %11518  ;;  %8031 = vst.msk [vmem:[%s14883_s28 + $0x78] sm:$0xff] %vm8015_vm7, %v7998_v38  ;;  %v7997_v10 = vmul.f32 %v11517_v16, %v14840_v2  ;;  %11538 = vpow2.f32 %v7813_v25 }
 0x7ac   : > { %v11521_v13 = vpop.eup %11520  ;;  %v8000_v57 = vmul.f32 %v11519_v12, %v14852_v46  ;;  %11540 = vpow2.f32 %v7811_v0  ;;  %v7819_v19 = vmul.f32 1.442695, %v7757_v15 }
 0x7ad   : > { %v11523_v40 = vpop.eup %11522  ;;  %8030 = vst.msk [vmem:[%s14883_s28 + $0x70] sm:$0xff] %vm8015_vm7, %v7997_v10  ;;  %v7898_v34 = vmul.f32 0.6931472, %v11521_v13  ;;  %11542 = vpow2.f32 %v7817_v22 }
 0x7ae   : > { %v11525_v41 = vpop.eup %11524  ;;  %8033 = vst.msk [vmem:[%s14883_s28 + $0x88] sm:$0xff] %vm8015_vm7, %v8000_v57  ;;  %v7999_v2 = vmul.f32 %v11523_v40, %v14861_v43  ;;  %11544 = vpow2.f32 %v7815_v18  ;;  %v7686_v43 = vmax.f32 %v14944_v55, 0.0 }
 0x7af   : > { %v11527_v24 = vpop.eup %11526  ;;  %v8002_v46 = vmul.f32 %v11525_v41, %v14875_v28  ;;  %v7940_v49 = vadd.f32 %v7898_v34, %v7684_v1  ;;  %11546 = vpow2.f32 %v7821_v29 }
 0x7b0   : > { %v11529_v54 = vpop.eup %11528  ;;  %8032 = vst.msk [vmem:[%s14883_s28 + $0x80] sm:$0xff] %vm8015_vm7, %v7999_v2  ;;  %v7896_v26 = vmul.f32 0.6931472, %v11527_v24  ;;  %11548 = vpow2.f32 %v7819_v19  ;;  %v7689_v2 = vmax.f32 %v15003_v39, 0.0 }
 0x7b1   : > { %v11531_v32 = vpop.eup %11530  ;;  %8035 = vst.msk [vmem:[%s14883_s28 + $0x98] sm:$0xff] %vm8015_vm7, %v8002_v46  ;;  %11550 = vtanh.f32 %v7940_v49  ;;  %v7902_v51 = vmul.f32 0.6931472, %v11529_v54 }
 0x7b2   : > { %v11533_v17 = vpop.eup %11532  ;;  %v8001_v28 = vmul.f32 %v11531_v32, %v14893_v58  ;;  %v7939_v5 = vadd.f32 %v7896_v26, %v7683_v21 }
 0x7b3   : > { %v11535_v47 = vpop.eup %11534  ;;  %v7942_v35 = vadd.f32 %v7902_v51, %v7686_v43  ;;  %v7900_v44 = vmul.f32 0.6931472, %v11533_v17  ;;  %v7694_v43 = vmax.f32 %v15025_v60, 0.0 }
 0x7b4   : > { %v11537_v62 = vpop.eup %11536  ;;  %8034 = vst.msk [vmem:[%s14883_s28 + $0x90] sm:$0xff] %vm8015_vm7, %v8001_v28  ;;  %11552 = vtanh.f32 %v7939_v5  ;;  %v7906_v30 = vmul.f32 0.6931472, %v11535_v47  ;;  %v7693_v28 = vmax.f32 %v15031_v37, 0.0 }
 0x7b5   : > { %v11539_v6 = vpop.eup %11538  ;;  %11554 = vtanh.f32 %v7942_v35  ;;  %v7941_v4 = vadd.f32 %v7900_v44, %v7685_v45  ;;  %v7904_v61 = vmul.f32 0.6931472, %v11537_v62 }
 0x7b6   : > { %v11541_v58 = vpop.eup %11540  ;;  %v7944_v56 = vadd.f32 %v7906_v30, %v7688_v14  ;;  %v7850_v31 = vadd.f32 1.0, %v11539_v6 }
 0x7b7   : > { %v11543_v53 = vpop.eup %11542  ;;  %11556 = vtanh.f32 %v7941_v4  ;;  %v7943_v8 = vadd.f32 %v7904_v61, %v7687_v48  ;;  %v7849_v7 = vadd.f32 1.0, %v11541_v58 }
 0x7b8   : > { %v11545_v23 = vpop.eup %11544  ;;  %11558 = vtanh.f32 %v7944_v56  ;;  %v7852_v25 = vadd.f32 1.0, %v11543_v53 }
 0x7b9   : > { %v11547_v0 = vpop.eup %11546  ;;  %11560 = vtanh.f32 %v7943_v8  ;;  %v7851_v20 = vadd.f32 1.0, %v11545_v23 }
 0x7ba   : > { %v11549_v63 = vpop.eup %11548  ;;  %11562 = vlog2.f32 %v7850_v31  ;;  %v7854_v27 = vadd.f32 1.0, %v11547_v0 }
 0x7bb   : > { %v11551_v38 = vpop.eup %11550  ;;  %11564 = vlog2.f32 %v7849_v7  ;;  %v7853_v22 = vadd.f32 1.0, %v11549_v63 }
 0x7bc   : > { %v8004_v16 = vmul.f32 %v11551_v38, %v14916_v36  ;;  %11566 = vlog2.f32 %v7852_v25 }
 0x7bd   : > { %11568 = vlog2.f32 %v7851_v20 }
 0x7be   : > { %v11553_v18 = vpop.eup %11552  ;;  %8037 = vst.msk [vmem:[%s14883_s28 + $0xa8] sm:$0xff] %vm8015_vm7, %v8004_v16  ;;  %11570 = vlog2.f32 %v7854_v27 }
 0x7bf   : > { %v11555_v3 = vpop.eup %11554  ;;  %v8003_v12 = vmul.f32 %v11553_v18, %v14919_v33  ;;  %11572 = vlog2.f32 %v7853_v22 }
 0x7c0   : > { %v8006_v10 = vmul.f32 %v11555_v3, %v14944_v55  ;;  %v7690_v55 = vmax.f32 %v14996_v9, 0.0 }
 0x7c1   : > { %v11557_v29 = vpop.eup %11556  ;;  %8036 = vst.msk [vmem:[%s14883_s28 + $0xa0] sm:$0xff] %vm8015_vm7, %v8003_v12 }
 0x7c2   : > { %v11559_v13 = vpop.eup %11558  ;;  %8039 = vst.msk [vmem:[%s14883_s28 + $0xb8] sm:$0xff] %vm8015_vm7, %v8006_v10  ;;  %v8005_v36 = vmul.f32 %v11557_v29, %v14959_v11 }
 0x7c3   : > { %v11561_v57 = vpop.eup %11560  ;;  %v8008_v15 = vmul.f32 %v11559_v13, %v14965_v59  ;;  %v7692_v59 = vmax.f32 %v15012_v52, 0.0 }
 0x7c4   : > { %v11563_v40 = vpop.eup %11562  ;;  %8038 = vst.msk [vmem:[%s14883_s28 + $0xb0] sm:$0xff] %vm8015_vm7, %v8005_v36  ;;  %v8007_v33 = vmul.f32 %v11561_v57, %v14975_v50  ;;  %v7691_v50 = vmax.f32 %v15018_v42, 0.0 }
 0x7c5   : > { %v11565_v1 = vpop.eup %11564  ;;  %8041 = vst.msk [vmem:[%s14883_s28 + $0xc8] sm:$0xff] %vm8015_vm7, %v8008_v15  ;;  %v7910_v34 = vmul.f32 0.6931472, %v11563_v40 }
 0x7c6   : > { %v11567_v41 = vpop.eup %11566  ;;  %8040 = vst.msk [vmem:[%s14883_s28 + $0xc0] sm:$0xff] %vm8015_vm7, %v8007_v33  ;;  %v7908_v11 = vmul.f32 0.6931472, %v11565_v1 }
 0x7c7   : > { %v11569_v19 = vpop.eup %11568  ;;  %v7946_v24 = vadd.f32 %v7910_v34, %v7690_v55  ;;  %v7914_v46 = vmul.f32 0.6931472, %v11567_v41 }
 0x7c8   : > { %v11571_v49 = vpop.eup %11570  ;;  %v7945_v54 = vadd.f32 %v7908_v11, %v7689_v2  ;;  %v7912_v21 = vmul.f32 0.6931472, %v11569_v19 }
 0x7c9   : > { %v11573_v26 = vpop.eup %11572  ;;  %11574 = vtanh.f32 %v7946_v24  ;;  %v7948_v32 = vadd.f32 %v7914_v46, %v7692_v59  ;;  %v7918_v51 = vmul.f32 0.6931472, %v11571_v49 }
 0x7ca   : > { %11576 = vtanh.f32 %v7945_v54  ;;  %v7947_v17 = vadd.f32 %v7912_v21, %v7691_v50  ;;  %v7916_v5 = vmul.f32 0.6931472, %v11573_v26 }
 0x7cb   : > { %11578 = vtanh.f32 %v7948_v32  ;;  %v7950_v47 = vadd.f32 %v7918_v51, %v7694_v43 }
 0x7cc   : > { %11580 = vtanh.f32 %v7947_v17  ;;  %v7949_v35 = vadd.f32 %v7916_v5, %v7693_v28 }
 0x7cd   : > { %11582 = vtanh.f32 %v7950_v47 }
 0x7ce   : > { %11584 = vtanh.f32 %v7949_v35 }
 0x7d3   : > { %v11575_v45 = vpop.eup %11574 }
 0x7d4   : > { %v11577_v44 = vpop.eup %11576  ;;  %v8010_v62 = vmul.f32 %v11575_v45, %v14996_v9 }
 0x7d5   : > { %v11579_v14 = vpop.eup %11578  ;;  %v8009_v30 = vmul.f32 %v11577_v44, %v15003_v39 }
 0x7d6   : > { %v11581_v6 = vpop.eup %11580  ;;  %8043 = vst.msk [vmem:[%s14883_s28 + $0xd8] sm:$0xff] %vm8015_vm7, %v8010_v62  ;;  %v8012_v4 = vmul.f32 %v11579_v14, %v15012_v52 }
 0x7d7   : > { %v11583_v48 = vpop.eup %11582  ;;  %8042 = vst.msk [vmem:[%s14883_s28 + $0xd0] sm:$0xff] %vm8015_vm7, %v8009_v30  ;;  %v8011_v61 = vmul.f32 %v11581_v6, %v15018_v42 }
 0x7d8   : > { %v11585_v58 = vpop.eup %11584  ;;  %8045 = vst.msk [vmem:[%s14883_s28 + $0xe8] sm:$0xff] %vm8015_vm7, %v8012_v4  ;;  %v8014_v56 = vmul.f32 %v11583_v48, %v15025_v60 }
 0x7d9   : > { %8044 = vst.msk [vmem:[%s14883_s28 + $0xe0] sm:$0xff] %vm8015_vm7, %v8011_v61  ;;  %v8013_v9 = vmul.f32 %v11585_v58, %v15031_v37 }
 0x7da   : > { %8047 = vst.msk [vmem:[%s14883_s28 + $0xf8] sm:$0xff] %vm8015_vm7, %v8014_v56 }
 0x7db   : > { %8046 = vst.msk [vmem:[%s14883_s28 + $0xf0] sm:$0xff] %vm8015_vm7, %v8013_v9 }
 0x7dc PF: > { %s21_s17 = sadd.s32 1, %s11598_s17  }
 0x7dd   : > { %p18_p4 = scmp.ge.s32.totalorder %s21_s17, 4  }
 0x7df   :  { %20 = sbr.rel (!%p18_p4) target bundleno = 1 (0x1), region = 111 }

</bundles_post_ra>
